<compile_context>
chip_gen: v5e
topology: v5e:2x2
jax: 0.10.0
libtpu: 0.0.40
codegen_flags: <defaults>
</compile_context>

<pallas_src>
import functools
import math

import jax
import jax.numpy as jnp
from jax import lax
from jax.experimental import pallas as pl
from jax.experimental.pallas import tpu as pltpu


# -----------------------------------------------------------------------------
# Pallas kernel: all pre-norm transformer blocks over a (rows, E) slab
# -----------------------------------------------------------------------------
def _fused_layers_kernel(
    x_ref,
    ln1_w_ref, ln1_b_ref,
    wqkv_ref, bqkv_ref,
    wo_ref, bo_ref,
    ln2_w_ref, ln2_b_ref,
    w1_ref, b1_ref, w2_ref, b2_ref,
    o_ref,
    act_ref,
    *, batch_per_step: int, seq_len: int, num_heads: int, head_dim: int,
    eps: float):
  layer = pl.program_id(1)
  rows, embed_dim = x_ref.shape
  scale = head_dim ** (-0.5)
  inv_sqrt2 = 1.0 / math.sqrt(2.0)

  @pl.when(layer == 0)
  def _():
    # Load the input slab once; it stays resident in VMEM across all layers.
    act_ref[...] = x_ref[...]

  x = act_ref[...]                             # (rows, E) f32

  def layernorm(v, w, b):
    # Fused reductions: var = E[v^2] - mu^2.
    mu = jnp.mean(v, axis=-1, keepdims=True)
    ms = jnp.mean(v * v, axis=-1, keepdims=True)
    var = ms - mu * mu
    return (v - mu) * lax.rsqrt(var + eps) * w + b

  # ---- attention branch (pre-norm) ----
  h = layernorm(x, ln1_w_ref[0], ln1_b_ref[0])
  h_bf = h.astype(jnp.bfloat16)                # bf16 only at the MXU inputs
  # Single fused QKV matmul: (rows, E) x (E, 3E) -> (rows, 3E).
  qkv = jnp.dot(h_bf, wqkv_ref[0], preferred_element_type=jnp.float32)
  qkv = qkv + bqkv_ref[0]

  ctx_heads = []
  for head in range(num_heads):                # static unroll over heads
    lo = head * head_dim
    q = qkv[:, lo:lo + head_dim]
    k = qkv[:, embed_dim + lo:embed_dim + lo + head_dim]
    v = qkv[:, 2 * embed_dim + lo:2 * embed_dim + lo + head_dim]
    # Split only the sublane (row) axis into (batch, seq) -- no lane movement.
    qb = q.reshape(batch_per_step, seq_len, head_dim).astype(jnp.bfloat16)
    kb = k.reshape(batch_per_step, seq_len, head_dim).astype(jnp.bfloat16)
    vb = v.reshape(batch_per_step, seq_len, head_dim).astype(jnp.bfloat16)

    s = jnp.einsum('bqd,bkd->bqk', qb, kb,
                   preferred_element_type=jnp.float32) * scale
    # TODO(synk): attention_mask (masked_fill with -inf) path not implemented;
    # forward assumes attention_mask=None (module default).
    s_max = jnp.max(s, axis=-1, keepdims=True)
    e = jnp.exp(s - s_max)
    denom = jnp.sum(e, axis=-1, keepdims=True)
    p = e * pl.reciprocal(denom, approx=True)   # EUP slot instead of divide
    ctx = jnp.einsum('bqk,bkd->bqd', p.astype(jnp.bfloat16), vb,
                     preferred_element_type=jnp.float32)
    ctx_heads.append(ctx.reshape(rows, head_dim))

  # Lane-concat the per-head contexts, then ONE K=E output projection.
  ctx_all = jnp.concatenate(ctx_heads, axis=-1)        # (rows, E)
  attn_out = jnp.dot(ctx_all.astype(jnp.bfloat16), wo_ref[0],
                     preferred_element_type=jnp.float32) + bo_ref[0]
  x = x + attn_out                            # residual 1

  # ---- MLP branch (pre-norm) ----
  h2 = layernorm(x, ln2_w_ref[0], ln2_b_ref[0])
  m = jnp.dot(h2.astype(jnp.bfloat16), w1_ref[0],
              preferred_element_type=jnp.float32) + b1_ref[0]
  m = 0.5 * m * (1.0 + lax.erf(m * inv_sqrt2))   # exact GELU (nn.GELU default)
  m = jnp.dot(m.astype(jnp.bfloat16), w2_ref[0],
              preferred_element_type=jnp.float32) + b2_ref[0]
  x = x + m                                   # residual 2

  act_ref[...] = x                            # carry to next layer

  @pl.when(layer == pl.num_programs(1) - 1)
  def _():
    o_ref[...] = x                            # single lane-dense store


@functools.lru_cache(maxsize=None)
def _build_stack_call(rows_total, rows_per_step, embed_dim, num_heads,
                      mlp_hidden, num_layers, num_steps, batch_per_step,
                      seq_len):
  head_dim = embed_dim // num_heads
  kernel = functools.partial(
      _fused_layers_kernel,
      batch_per_step=batch_per_step, seq_len=seq_len,
      num_heads=num_heads, head_dim=head_dim, eps=1e-5)

  E, F, L = embed_dim, mlp_hidden, num_layers

  def wspec(shape):
    # Layer-stacked operand: block is one layer's slab; default double
    # buffering lets layer l+1 weights DMA under layer l compute.
    nd = len(shape)
    return pl.BlockSpec((1,) + tuple(shape[1:]),
                        lambda s, l, _nd=nd: (l,) + (0,) * (_nd - 1))

  act_spec = pl.BlockSpec((rows_per_step, E), lambda s, l: (s, 0))

  in_specs = [
      act_spec,                                     # activation slab
      wspec((L, 1, E)), wspec((L, 1, E)),           # ln1 w, b
      wspec((L, E, 3 * E)), wspec((L, 1, 3 * E)),   # fused Wqkv, bqkv
      wspec((L, E, E)), wspec((L, 1, E)),           # Wo, bo
      wspec((L, 1, E)), wspec((L, 1, E)),           # ln2 w, b
      wspec((L, E, F)), wspec((L, 1, F)),           # fc1 w, b
      wspec((L, F, E)), wspec((L, 1, E)),           # fc2 w, b
  ]

  grid_spec = pltpu.PrefetchScalarGridSpec(
      num_scalar_prefetch=0,
      grid=(num_steps, num_layers),                 # layer axis last
      in_specs=in_specs,
      out_specs=act_spec,
      scratch_shapes=[pltpu.VMEM((rows_per_step, E), jnp.float32)],
  )

  # TODO(synk): at real model sizes (long sequences / E >= 512) tile the row
  # axis and set vmem_limit_bytes per generation (v7x has 64 MiB VMEM/TC);
  # unnecessary at these test shapes (<1 MiB resident).
  return pl.pallas_call(
      kernel,
      grid_spec=grid_spec,
      out_shape=jax.ShapeDtypeStruct((rows_total, E), jnp.float32),
      compiler_params=pltpu.CompilerParams(
          dimension_semantics=("parallel", "arbitrary")),
  )


def _num_row_steps(batch, seq):
  """2-way row split only on 2-TensorCore chips (v7x); else one fat step."""
  try:
    kind = jax.devices()[0].device_kind.lower()
  except Exception:
    kind = ""
  two_tc = ('v7' in kind) or ('7x' in kind)
  if two_tc and batch % 2 == 0 and ((batch // 2) * seq) % 8 == 0:
    return 2
  return 1


def transformer_stack(x, ops, *, num_heads):
  """x: (B, S, E) f32; ops: stacked (leading layer axis), pre-laid-out operands."""
  B, S, E = x.shape
  L = ops['w_qkv'].shape[0]
  F = ops['w1'].shape[2]
  num_steps = _num_row_steps(B, S)
  batch_per_step = B // num_steps
  rows_per_step = batch_per_step * S

  call = _build_stack_call(B * S, rows_per_step, E, num_heads, F, L,
                           num_steps, batch_per_step, S)
  x2 = x.reshape(B * S, E)                    # lane-dense (rows, E) slab
  out = call(x2,
             ops['ln1_w'], ops['ln1_b'],
             ops['w_qkv'], ops['b_qkv'],
             ops['w_o'], ops['b_o'],
             ops['ln2_w'], ops['ln2_b'],
             ops['w1'], ops['b1'], ops['w2'], ops['b2'])
  return out.reshape(B, S, E)


# -----------------------------------------------------------------------------
# Wrapper-side model pieces (patch embed / pos encoding / head) and parameters
# -----------------------------------------------------------------------------
def _layernorm(v, w, b, eps=1e-5):
  mu = jnp.mean(v, axis=-1, keepdims=True)
  var = jnp.mean((v - mu) ** 2, axis=-1, keepdims=True)
  return (v - mu) / jnp.sqrt(var + eps) * w + b


def embed_inputs(spectrograms, params, config):
  """PatchEmbedding (conv stride=kernel == patch extract + matmul) + PosEnc2D."""
  B, C, T, F = spectrograms.shape
  pt, pf = config['patch_size']
  E = config['hidden_size']
  Tp, Fp = T // pt, F // pf
  patches = spectrograms.reshape(B, C, Tp, pt, Fp, pf)
  patches = patches.transpose(0, 2, 4, 1, 3, 5).reshape(B, Tp * Fp, C * pt * pf)
  # TODO(synk): patch projection + classifier head are plain XLA matmuls
  # (tiny, one-off); only the transformer blocks run as a Pallas kernel.
  x = patches @ params['patch_w'] + params['patch_b']          # (B, P, E)

  tp_use = min(Tp, config['max_time_patches'])
  fp_use = min(Fp, config['max_freq_patches'])
  # Matches the PyTorch module: time_embed.repeat (fast axis) + freq
  # repeat_interleave (slow axis).
  time_pos = jnp.tile(params['time_embed'][:, :tp_use, :], (1, fp_use, 1))
  freq_pos = jnp.repeat(params['freq_embed'][:, :fp_use, :], tp_use, axis=1)
  pos = jnp.concatenate([time_pos, freq_pos], axis=-1)         # (1, tp*fp, E)
  P = x.shape[1]
  actual = min(P, pos.shape[1])
  pos = pos[:, :actual, :]
  if actual < P:
    pos = jnp.concatenate(
        [pos, jnp.zeros((1, P - actual, E), pos.dtype)], axis=1)
  x = x + pos
  cls = jnp.broadcast_to(params['cls_token'], (B, 1, E))
  return jnp.concatenate([cls, x], axis=1)                     # (B, P+1, E)


def prepare_stacked_operands(layers_raw):
  """Free, static wrapper-side re-layout: stack layers, bf16 weights, 2-D biases."""
  E = layers_raw[0]['ln1_w'].shape[0]
  L = len(layers_raw)
  F = layers_raw[0]['fc1_w'].shape[1]

  def stack(key):
    return jnp.stack([r[key] for r in layers_raw], axis=0)

  to_bf = lambda a: a.astype(jnp.bfloat16)
  return {
      'ln1_w': stack('ln1_w').reshape(L, 1, E),
      'ln1_b': stack('ln1_b').reshape(L, 1, E),
      'w_qkv': to_bf(stack('qkv_w')),                  # (L, E, 3E)
      'b_qkv': stack('qkv_b').reshape(L, 1, 3 * E),
      'w_o': to_bf(stack('proj_w')),                   # (L, E, E)
      'b_o': stack('proj_b').reshape(L, 1, E),
      'ln2_w': stack('ln2_w').reshape(L, 1, E),
      'ln2_b': stack('ln2_b').reshape(L, 1, E),
      'w1': to_bf(stack('fc1_w')),                     # (L, E, F)
      'b1': stack('fc1_b').reshape(L, 1, F),
      'w2': to_bf(stack('fc2_w')),                     # (L, F, E)
      'b2': stack('fc2_b').reshape(L, 1, E),
  }


def init_params(key, config):
  E = config['hidden_size']
  pt, pf = config['patch_size']
  C = 1
  hidden = int(E * config['mlp_ratio'])
  n_cls = config['num_drum_classes']
  std = 0.02
  keys = iter(jax.random.split(key, 64))

  def tn(shape):
    return std * jax.random.normal(next(keys), shape, jnp.float32)

  params = {
      'patch_w': tn((C * pt * pf, E)),
      'patch_b': tn((E,)),
      'time_embed': jax.random.normal(next(keys),
                                      (1, config['max_time_patches'], E // 2),
                                      jnp.float32),
      'freq_embed': jax.random.normal(next(keys),
                                      (1, config['max_freq_patches'], E // 2),
                                      jnp.float32),
      'cls_token': jax.random.normal(next(keys), (1, 1, E), jnp.float32),
      'norm_w': jnp.ones((E,), jnp.float32),
      'norm_b': jnp.zeros((E,), jnp.float32),
      'cls_w': tn((E, n_cls)),
      'cls_b': tn((n_cls,)),
  }
  layers_raw = []
  for _ in range(config['num_layers']):
    layers_raw.append({
        'ln1_w': jnp.ones((E,), jnp.float32),
        'ln1_b': jnp.zeros((E,), jnp.float32),
        'qkv_w': tn((E, 3 * E)), 'qkv_b': tn((3 * E,)),
        'proj_w': tn((E, E)), 'proj_b': tn((E,)),
        'ln2_w': jnp.ones((E,), jnp.float32),
        'ln2_b': jnp.zeros((E,), jnp.float32),
        'fc1_w': tn((E, hidden)), 'fc1_b': tn((hidden,)),
        'fc2_w': tn((hidden, E)), 'fc2_b': tn((E,)),
    })
  params['layers_raw'] = layers_raw
  params['stacked'] = prepare_stacked_operands(layers_raw)
  return params


def drum_transformer_forward(spectrograms, params, config):
  x = embed_inputs(spectrograms, params, config)
  x = transformer_stack(x, params['stacked'], num_heads=config['num_heads'])
  x = _layernorm(x, params['norm_w'], params['norm_b'])
  cls_embedding = x[:, 0]
  logits = cls_embedding @ params['cls_w'] + params['cls_b']
  return logits, cls_embedding


# -----------------------------------------------------------------------------
# Pure-JAX reference (mirrors the PyTorch forward, eval mode, mask=None; same
# bf16-at-linear-MXU-inputs policy so the comparison is apples-to-apples).
# -----------------------------------------------------------------------------
def _reference_block(x, raw, *, num_heads, eps=1e-5):
  B, S, E = x.shape
  H = num_heads
  d = E // H
  scale = d ** (-0.5)

  def mm(a, w):
    return jnp.dot(a.astype(jnp.bfloat16), w.astype(jnp.bfloat16),
                   preferred_element_type=jnp.float32)

  h = _layernorm(x, raw['ln1_w'], raw['ln1_b'], eps)
  qkv = mm(h, raw['qkv_w']) + raw['qkv_b']
  qkv = qkv.reshape(B, S, 3, H, d).transpose(2, 0, 3, 1, 4)
  q, k, v = qkv[0], qkv[1], qkv[2]
  attn = jnp.einsum('bhqd,bhkd->bhqk', q, k) * scale
  attn = jax.nn.softmax(attn, axis=-1)
  ctx = jnp.einsum('bhqk,bhkd->bhqd', attn, v)
  ctx = ctx.transpose(0, 2, 1, 3).reshape(B, S, E)
  x = x + mm(ctx, raw['proj_w']) + raw['proj_b']

  h2 = _layernorm(x, raw['ln2_w'], raw['ln2_b'], eps)
  m = mm(h2, raw['fc1_w']) + raw['fc1_b']
  m = 0.5 * m * (1.0 + lax.erf(m / math.sqrt(2.0)))
  return x + mm(m, raw['fc2_w']) + raw['fc2_b']


def reference_forward(spectrograms, params, config):
  x = embed_inputs(spectrograms, params, config)
  for raw in params['layers_raw']:
    x = _reference_block(x, raw, num_heads=config['num_heads'])
  x = _layernorm(x, params['norm_w'], params['norm_b'])
  cls_embedding = x[:, 0]
  logits = cls_embedding @ params['cls_w'] + params['cls_b']
  return logits, cls_embedding


# -----------------------------------------------------------------------------
if __name__ == "__main__":
  config = dict(
      hidden_size=128,        # embed dim: multiple of 128 -> lane-dense slabs
      num_heads=4,
      num_layers=2,
      mlp_ratio=2.0,          # DrumTranscriptionTransformer uses mlp_ratio=2.0
      patch_size=(16, 16),
      num_drum_classes=8,
      max_time_patches=8,
      max_freq_patches=3,
  )
  # (4, 1, 80, 48) spectrograms -> 5x3 = 15 patches + CLS = 16 tokens/seq.
  B, C, T, F = 4, 1, 80, 48
  key = jax.random.PRNGKey(0)
  k_x, k_p = jax.random.split(key)
  spectrograms = jax.random.normal(k_x, (B, C, T, F), jnp.float32)
  params = init_params(k_p, config)

  logits, cls_emb = drum_transformer_forward(spectrograms, params, config)
  jax.block_until_ready((logits, cls_emb))

  ref_logits, ref_cls = reference_forward(spectrograms, params, config)
  assert logits.shape == (B, config['num_drum_classes'])
  assert jnp.allclose(logits, ref_logits, atol=2e-2, rtol=2e-2), (
      float(jnp.max(jnp.abs(logits - ref_logits))))
  assert jnp.allclose(cls_emb, ref_cls, atol=2e-2, rtol=2e-2), (
      float(jnp.max(jnp.abs(cls_emb - ref_cls))))
  print("KERNEL_OK")
</pallas_src>

<mosaic_0001>
module attributes {stable_mosaic.version = 11 : i64} {
  func.func @_fused_layers_kernel(%arg0: i32, %arg1: i32, %arg2: memref<64x128xf32, #tpu.memory_space<vmem>>, %arg3: memref<1x1x128xf32, #tpu.memory_space<vmem>>, %arg4: memref<1x1x128xf32, #tpu.memory_space<vmem>>, %arg5: memref<1x128x384xbf16, #tpu.memory_space<vmem>>, %arg6: memref<1x1x384xf32, #tpu.memory_space<vmem>>, %arg7: memref<1x128x128xbf16, #tpu.memory_space<vmem>>, %arg8: memref<1x1x128xf32, #tpu.memory_space<vmem>>, %arg9: memref<1x1x128xf32, #tpu.memory_space<vmem>>, %arg10: memref<1x1x128xf32, #tpu.memory_space<vmem>>, %arg11: memref<1x128x256xbf16, #tpu.memory_space<vmem>>, %arg12: memref<1x1x256xf32, #tpu.memory_space<vmem>>, %arg13: memref<1x256x128xbf16, #tpu.memory_space<vmem>>, %arg14: memref<1x1x128xf32, #tpu.memory_space<vmem>>, %arg15: memref<64x128xf32, #tpu.memory_space<vmem>>, %arg16: memref<64x128xf32, #tpu.memory_space<vmem>>) attributes {dimension_semantics = [#tpu.dimension_semantics<parallel>, #tpu.dimension_semantics<arbitrary>], iteration_bounds = array<i64: 1, 2>, scalar_prefetch = 0 : i64, scratch_operands = 1 : i64, tpu.core_type = #tpu.core_type<tc>, window_params = [{transform_indices = @transform_0, window_bounds = array<i64: 64, 128>}, {transform_indices = @transform_1, window_bounds = array<i64: 1, 1, 128>}, {transform_indices = @transform_2, window_bounds = array<i64: 1, 1, 128>}, {transform_indices = @transform_3, window_bounds = array<i64: 1, 128, 384>}, {transform_indices = @transform_4, window_bounds = array<i64: 1, 1, 384>}, {transform_indices = @transform_5, window_bounds = array<i64: 1, 128, 128>}, {transform_indices = @transform_6, window_bounds = array<i64: 1, 1, 128>}, {transform_indices = @transform_7, window_bounds = array<i64: 1, 1, 128>}, {transform_indices = @transform_8, window_bounds = array<i64: 1, 1, 128>}, {transform_indices = @transform_9, window_bounds = array<i64: 1, 128, 256>}, {transform_indices = @transform_10, window_bounds = array<i64: 1, 1, 256>}, {transform_indices = @transform_11, window_bounds = array<i64: 1, 256, 128>}, {transform_indices = @transform_12, window_bounds = array<i64: 1, 1, 128>}, {transform_indices = @transform_13, window_bounds = array<i64: 64, 128>}]} {
    %c0_i32 = arith.constant 0 : i32
    %0 = arith.cmpi eq, %arg1, %c0_i32 : i32
    %1 = arith.extui %0 : i1 to i32
    %c0_i32_0 = arith.constant 0 : i32
    %2 = arith.cmpi ne, %1, %c0_i32_0 : i32
    scf.if %2 {
      %c0_77 = arith.constant 0 : index
      %c0_78 = arith.constant 0 : index
      %203 = vector.load %arg2[%c0_77, %c0_78] : memref<64x128xf32, #tpu.memory_space<vmem>>, vector<64x128xf32>
      %c0_79 = arith.constant 0 : index
      %c0_80 = arith.constant 0 : index
      %204 = vector.load %arg16[%c0_79, %c0_80] : memref<64x128xf32, #tpu.memory_space<vmem>>, vector<64x128xf32>
      tpu.vector_store %arg16[%c0_79, %c0_80], %203 {strides = array<i32>} : memref<64x128xf32, #tpu.memory_space<vmem>>, vector<64x128xf32>,
    } else {
    }
    %c0 = arith.constant 0 : index
    %c0_1 = arith.constant 0 : index
    %3 = vector.load %arg16[%c0, %c0_1] : memref<64x128xf32, #tpu.memory_space<vmem>>, vector<64x128xf32>
    %c0_2 = arith.constant 0 : index
    %c0_3 = arith.constant 0 : index
    %c0_4 = arith.constant 0 : index
    %4 = vector.load %arg3[%c0_2, %c0_3, %c0_4] : memref<1x1x128xf32, #tpu.memory_space<vmem>>, vector<1x1x128xf32>
    %5 = vector.shape_cast %4 : vector<1x1x128xf32> to vector<1x128xf32>
    %c0_5 = arith.constant 0 : index
    %c0_6 = arith.constant 0 : index
    %c0_7 = arith.constant 0 : index
    %6 = vector.load %arg4[%c0_5, %c0_6, %c0_7] : memref<1x1x128xf32, #tpu.memory_space<vmem>>, vector<1x1x128xf32>
    %7 = vector.shape_cast %6 : vector<1x1x128xf32> to vector<1x128xf32>
    %cst = arith.constant dense<0.000000e+00> : vector<64xf32>
    %8 = vector.multi_reduction <add>, %3, %cst [1] : vector<64x128xf32> to vector<64xf32>
    %9 = vector.shape_cast %8 : vector<64xf32> to vector<64x1xf32>
    %cst_8 = arith.constant 1.280000e+02 : f32
    %10 = vector.broadcast %cst_8 : f32 to vector<64x1xf32>
    %11 = arith.divf %9, %10 : vector<64x1xf32>
    %12 = arith.mulf %3, %3 : vector<64x128xf32>
    %cst_9 = arith.constant dense<0.000000e+00> : vector<64xf32>
    %13 = vector.multi_reduction <add>, %12, %cst_9 [1] : vector<64x128xf32> to vector<64xf32>
    %14 = vector.shape_cast %13 : vector<64xf32> to vector<64x1xf32>
    %cst_10 = arith.constant 1.280000e+02 : f32
    %15 = vector.broadcast %cst_10 : f32 to vector<64x1xf32>
    %16 = arith.divf %14, %15 : vector<64x1xf32>
    %17 = arith.mulf %11, %11 : vector<64x1xf32>
    %18 = arith.subf %16, %17 : vector<64x1xf32>
    %19 = vector.broadcast %11 : vector<64x1xf32> to vector<64x128xf32>
    %20 = arith.subf %3, %19 : vector<64x128xf32>
    %cst_11 = arith.constant 9.99999974E-6 : f32
    %21 = vector.broadcast %cst_11 : f32 to vector<64x1xf32>
    %22 = arith.addf %18, %21 : vector<64x1xf32>
    %23 = math.rsqrt %22 : vector<64x1xf32>
    %24 = vector.broadcast %23 : vector<64x1xf32> to vector<64x128xf32>
    %25 = arith.mulf %20, %24 : vector<64x128xf32>
    %26 = vector.broadcast %5 : vector<1x128xf32> to vector<64x128xf32>
    %27 = arith.mulf %25, %26 : vector<64x128xf32>
    %28 = vector.broadcast %7 : vector<1x128xf32> to vector<64x128xf32>
    %29 = arith.addf %27, %28 : vector<64x128xf32>
    %30 = arith.truncf %29 : vector<64x128xf32> to vector<64x128xbf16>
    %c0_12 = arith.constant 0 : index
    %c0_13 = arith.constant 0 : index
    %c0_14 = arith.constant 0 : index
    %31 = vector.load %arg5[%c0_12, %c0_13, %c0_14] : memref<1x128x384xbf16, #tpu.memory_space<vmem>>, vector<1x128x384xbf16>
    %32 = vector.shape_cast %31 : vector<1x128x384xbf16> to vector<128x384xbf16>
    %cst_15 = arith.constant dense<0.000000e+00> : vector<64x384xf32>
    %33 = tpu.matmul %30, %32, %cst_15 {dimension_numbers = #tpu.dot_dimension_numbers<[1], [0], [0], [1], [0, 0, 1, 1], [], []>} : vector<64x128xbf16>, vector<128x384xbf16>, vector<64x384xf32> -> vector<64x384xf32>
    %c0_16 = arith.constant 0 : index
    %c0_17 = arith.constant 0 : index
    %c0_18 = arith.constant 0 : index
    %34 = vector.load %arg6[%c0_16, %c0_17, %c0_18] : memref<1x1x384xf32, #tpu.memory_space<vmem>>, vector<1x1x384xf32>
    %35 = vector.shape_cast %34 : vector<1x1x384xf32> to vector<1x384xf32>
    %36 = vector.broadcast %35 : vector<1x384xf32> to vector<64x384xf32>
    %37 = arith.addf %33, %36 : vector<64x384xf32>
    %38 = vector.extract_strided_slice %37 {offsets = [0, 0], sizes = [64, 32], strides = [1, 1]} : vector<64x384xf32> to vector<64x32xf32>
    %39 = vector.extract_strided_slice %37 {offsets = [0, 128], sizes = [64, 32], strides = [1, 1]} : vector<64x384xf32> to vector<64x32xf32>
    %40 = vector.extract_strided_slice %37 {offsets = [0, 256], sizes = [64, 32], strides = [1, 1]} : vector<64x384xf32> to vector<64x32xf32>
    %41 = vector.shape_cast %38 : vector<64x32xf32> to vector<4x16x32xf32>
    %42 = arith.truncf %41 : vector<4x16x32xf32> to vector<4x16x32xbf16>
    %43 = vector.shape_cast %39 : vector<64x32xf32> to vector<4x16x32xf32>
    %44 = arith.truncf %43 : vector<4x16x32xf32> to vector<4x16x32xbf16>
    %45 = vector.shape_cast %40 : vector<64x32xf32> to vector<4x16x32xf32>
    %46 = arith.truncf %45 : vector<4x16x32xf32> to vector<4x16x32xbf16>
    "tpu.trace_start"() <{level = 10 : i32, message = "bqd,bkd->bqk"}> : () -> ()
    %cst_19 = arith.constant dense<0.000000e+00> : vector<4x16x16xf32>
    %47 = tpu.matmul %42, %44, %cst_19 {dimension_numbers = #tpu.dot_dimension_numbers<[2], [2], [1], [1], [0, 0, 0, 1, 1, 1], [0], [0]>} : vector<4x16x32xbf16>, vector<4x16x32xbf16>, vector<4x16x16xf32> -> vector<4x16x16xf32>
    "tpu.trace_stop"() : () -> ()
    %cst_20 = arith.constant 0.176776692 : f32
    %48 = vector.broadcast %cst_20 : f32 to vector<4x16x16xf32>
    %49 = arith.mulf %47, %48 : vector<4x16x16xf32>
    %cst_21 = arith.constant dense<0xFF800000> : vector<4x16xf32>
    %50 = vector.multi_reduction <maximumf>, %49, %cst_21 [2] : vector<4x16x16xf32> to vector<4x16xf32>
    %51 = vector.shape_cast %50 : vector<4x16xf32> to vector<4x16x1xf32>
    %52 = vector.broadcast %51 : vector<4x16x1xf32> to vector<4x16x16xf32>
    %53 = arith.subf %49, %52 : vector<4x16x16xf32>
    %54 = math.exp %53 : vector<4x16x16xf32>
    %cst_22 = arith.constant dense<0.000000e+00> : vector<4x16xf32>
    %55 = vector.multi_reduction <add>, %54, %cst_22 [2] : vector<4x16x16xf32> to vector<4x16xf32>
    %56 = vector.shape_cast %55 : vector<4x16xf32> to vector<4x16x1xf32>
    %57 = tpu.reciprocal %56 {approx = true} : vector<4x16x1xf32> -> vector<4x16x1xf32>
    %58 = vector.broadcast %57 : vector<4x16x1xf32> to vector<4x16x16xf32>
    %59 = arith.mulf %54, %58 : vector<4x16x16xf32>
    %60 = arith.truncf %59 : vector<4x16x16xf32> to vector<4x16x16xbf16>
    "tpu.trace_start"() <{level = 10 : i32, message = "bqk,bkd->bqd"}> : () -> ()
    %cst_23 = arith.constant dense<0.000000e+00> : vector<4x16x32xf32>
    %61 = tpu.matmul %60, %46, %cst_23 {dimension_numbers = #tpu.dot_dimension_numbers<[2], [1], [1], [2], [0, 0, 0, 1, 1, 2], [0], [0]>} : vector<4x16x16xbf16>, vector<4x16x32xbf16>, vector<4x16x32xf32> -> vector<4x16x32xf32>
    "tpu.trace_stop"() : () -> ()
    %62 = vector.shape_cast %61 : vector<4x16x32xf32> to vector<64x32xf32>
    %63 = vector.extract_strided_slice %37 {offsets = [0, 32], sizes = [64, 32], strides = [1, 1]} : vector<64x384xf32> to vector<64x32xf32>
    %64 = vector.extract_strided_slice %37 {offsets = [0, 160], sizes = [64, 32], strides = [1, 1]} : vector<64x384xf32> to vector<64x32xf32>
    %65 = vector.extract_strided_slice %37 {offsets = [0, 288], sizes = [64, 32], strides = [1, 1]} : vector<64x384xf32> to vector<64x32xf32>
    %66 = vector.shape_cast %63 : vector<64x32xf32> to vector<4x16x32xf32>
    %67 = arith.truncf %66 : vector<4x16x32xf32> to vector<4x16x32xbf16>
    %68 = vector.shape_cast %64 : vector<64x32xf32> to vector<4x16x32xf32>
    %69 = arith.truncf %68 : vector<4x16x32xf32> to vector<4x16x32xbf16>
    %70 = vector.shape_cast %65 : vector<64x32xf32> to vector<4x16x32xf32>
    %71 = arith.truncf %70 : vector<4x16x32xf32> to vector<4x16x32xbf16>
    "tpu.trace_start"() <{level = 10 : i32, message = "bqd,bkd->bqk"}> : () -> ()
    %cst_24 = arith.constant dense<0.000000e+00> : vector<4x16x16xf32>
    %72 = tpu.matmul %67, %69, %cst_24 {dimension_numbers = #tpu.dot_dimension_numbers<[2], [2], [1], [1], [0, 0, 0, 1, 1, 1], [0], [0]>} : vector<4x16x32xbf16>, vector<4x16x32xbf16>, vector<4x16x16xf32> -> vector<4x16x16xf32>
    "tpu.trace_stop"() : () -> ()
    %cst_25 = arith.constant 0.176776692 : f32
    %73 = vector.broadcast %cst_25 : f32 to vector<4x16x16xf32>
    %74 = arith.mulf %72, %73 : vector<4x16x16xf32>
    %cst_26 = arith.constant dense<0xFF800000> : vector<4x16xf32>
    %75 = vector.multi_reduction <maximumf>, %74, %cst_26 [2] : vector<4x16x16xf32> to vector<4x16xf32>
    %76 = vector.shape_cast %75 : vector<4x16xf32> to vector<4x16x1xf32>
    %77 = vector.broadcast %76 : vector<4x16x1xf32> to vector<4x16x16xf32>
    %78 = arith.subf %74, %77 : vector<4x16x16xf32>
    %79 = math.exp %78 : vector<4x16x16xf32>
    %cst_27 = arith.constant dense<0.000000e+00> : vector<4x16xf32>
    %80 = vector.multi_reduction <add>, %79, %cst_27 [2] : vector<4x16x16xf32> to vector<4x16xf32>
    %81 = vector.shape_cast %80 : vector<4x16xf32> to vector<4x16x1xf32>
    %82 = tpu.reciprocal %81 {approx = true} : vector<4x16x1xf32> -> vector<4x16x1xf32>
    %83 = vector.broadcast %82 : vector<4x16x1xf32> to vector<4x16x16xf32>
    %84 = arith.mulf %79, %83 : vector<4x16x16xf32>
    %85 = arith.truncf %84 : vector<4x16x16xf32> to vector<4x16x16xbf16>
    "tpu.trace_start"() <{level = 10 : i32, message = "bqk,bkd->bqd"}> : () -> ()
    %cst_28 = arith.constant dense<0.000000e+00> : vector<4x16x32xf32>
    %86 = tpu.matmul %85, %71, %cst_28 {dimension_numbers = #tpu.dot_dimension_numbers<[2], [1], [1], [2], [0, 0, 0, 1, 1, 2], [0], [0]>} : vector<4x16x16xbf16>, vector<4x16x32xbf16>, vector<4x16x32xf32> -> vector<4x16x32xf32>
    "tpu.trace_stop"() : () -> ()
    %87 = vector.shape_cast %86 : vector<4x16x32xf32> to vector<64x32xf32>
    %88 = vector.extract_strided_slice %37 {offsets = [0, 64], sizes = [64, 32], strides = [1, 1]} : vector<64x384xf32> to vector<64x32xf32>
    %89 = vector.extract_strided_slice %37 {offsets = [0, 192], sizes = [64, 32], strides = [1, 1]} : vector<64x384xf32> to vector<64x32xf32>
    %90 = vector.extract_strided_slice %37 {offsets = [0, 320], sizes = [64, 32], strides = [1, 1]} : vector<64x384xf32> to vector<64x32xf32>
    %91 = vector.shape_cast %88 : vector<64x32xf32> to vector<4x16x32xf32>
    %92 = arith.truncf %91 : vector<4x16x32xf32> to vector<4x16x32xbf16>
    %93 = vector.shape_cast %89 : vector<64x32xf32> to vector<4x16x32xf32>
    %94 = arith.truncf %93 : vector<4x16x32xf32> to vector<4x16x32xbf16>
    %95 = vector.shape_cast %90 : vector<64x32xf32> to vector<4x16x32xf32>
    %96 = arith.truncf %95 : vector<4x16x32xf32> to vector<4x16x32xbf16>
    "tpu.trace_start"() <{level = 10 : i32, message = "bqd,bkd->bqk"}> : () -> ()
    %cst_29 = arith.constant dense<0.000000e+00> : vector<4x16x16xf32>
    %97 = tpu.matmul %92, %94, %cst_29 {dimension_numbers = #tpu.dot_dimension_numbers<[2], [2], [1], [1], [0, 0, 0, 1, 1, 1], [0], [0]>} : vector<4x16x32xbf16>, vector<4x16x32xbf16>, vector<4x16x16xf32> -> vector<4x16x16xf32>
    "tpu.trace_stop"() : () -> ()
    %cst_30 = arith.constant 0.176776692 : f32
    %98 = vector.broadcast %cst_30 : f32 to vector<4x16x16xf32>
    %99 = arith.mulf %97, %98 : vector<4x16x16xf32>
    %cst_31 = arith.constant dense<0xFF800000> : vector<4x16xf32>
    %100 = vector.multi_reduction <maximumf>, %99, %cst_31 [2] : vector<4x16x16xf32> to vector<4x16xf32>
    %101 = vector.shape_cast %100 : vector<4x16xf32> to vector<4x16x1xf32>
    %102 = vector.broadcast %101 : vector<4x16x1xf32> to vector<4x16x16xf32>
    %103 = arith.subf %99, %102 : vector<4x16x16xf32>
    %104 = math.exp %103 : vector<4x16x16xf32>
    %cst_32 = arith.constant dense<0.000000e+00> : vector<4x16xf32>
    %105 = vector.multi_reduction <add>, %104, %cst_32 [2] : vector<4x16x16xf32> to vector<4x16xf32>
    %106 = vector.shape_cast %105 : vector<4x16xf32> to vector<4x16x1xf32>
    %107 = tpu.reciprocal %106 {approx = true} : vector<4x16x1xf32> -> vector<4x16x1xf32>
    %108 = vector.broadcast %107 : vector<4x16x1xf32> to vector<4x16x16xf32>
    %109 = arith.mulf %104, %108 : vector<4x16x16xf32>
    %110 = arith.truncf %109 : vector<4x16x16xf32> to vector<4x16x16xbf16>
    "tpu.trace_start"() <{level = 10 : i32, message = "bqk,bkd->bqd"}> : () -> ()
    %cst_33 = arith.constant dense<0.000000e+00> : vector<4x16x32xf32>
    %111 = tpu.matmul %110, %96, %cst_33 {dimension_numbers = #tpu.dot_dimension_numbers<[2], [1], [1], [2], [0, 0, 0, 1, 1, 2], [0], [0]>} : vector<4x16x16xbf16>, vector<4x16x32xbf16>, vector<4x16x32xf32> -> vector<4x16x32xf32>
    "tpu.trace_stop"() : () -> ()
    %112 = vector.shape_cast %111 : vector<4x16x32xf32> to vector<64x32xf32>
    %113 = vector.extract_strided_slice %37 {offsets = [0, 96], sizes = [64, 32], strides = [1, 1]} : vector<64x384xf32> to vector<64x32xf32>
    %114 = vector.extract_strided_slice %37 {offsets = [0, 224], sizes = [64, 32], strides = [1, 1]} : vector<64x384xf32> to vector<64x32xf32>
    %115 = vector.extract_strided_slice %37 {offsets = [0, 352], sizes = [64, 32], strides = [1, 1]} : vector<64x384xf32> to vector<64x32xf32>
    %116 = vector.shape_cast %113 : vector<64x32xf32> to vector<4x16x32xf32>
    %117 = arith.truncf %116 : vector<4x16x32xf32> to vector<4x16x32xbf16>
    %118 = vector.shape_cast %114 : vector<64x32xf32> to vector<4x16x32xf32>
    %119 = arith.truncf %118 : vector<4x16x32xf32> to vector<4x16x32xbf16>
    %120 = vector.shape_cast %115 : vector<64x32xf32> to vector<4x16x32xf32>
    %121 = arith.truncf %120 : vector<4x16x32xf32> to vector<4x16x32xbf16>
    "tpu.trace_start"() <{level = 10 : i32, message = "bqd,bkd->bqk"}> : () -> ()
    %cst_34 = arith.constant dense<0.000000e+00> : vector<4x16x16xf32>
    %122 = tpu.matmul %117, %119, %cst_34 {dimension_numbers = #tpu.dot_dimension_numbers<[2], [2], [1], [1], [0, 0, 0, 1, 1, 1], [0], [0]>} : vector<4x16x32xbf16>, vector<4x16x32xbf16>, vector<4x16x16xf32> -> vector<4x16x16xf32>
    "tpu.trace_stop"() : () -> ()
    %cst_35 = arith.constant 0.176776692 : f32
    %123 = vector.broadcast %cst_35 : f32 to vector<4x16x16xf32>
    %124 = arith.mulf %122, %123 : vector<4x16x16xf32>
    %cst_36 = arith.constant dense<0xFF800000> : vector<4x16xf32>
    %125 = vector.multi_reduction <maximumf>, %124, %cst_36 [2] : vector<4x16x16xf32> to vector<4x16xf32>
    %126 = vector.shape_cast %125 : vector<4x16xf32> to vector<4x16x1xf32>
    %127 = vector.broadcast %126 : vector<4x16x1xf32> to vector<4x16x16xf32>
    %128 = arith.subf %124, %127 : vector<4x16x16xf32>
    %129 = math.exp %128 : vector<4x16x16xf32>
    %cst_37 = arith.constant dense<0.000000e+00> : vector<4x16xf32>
    %130 = vector.multi_reduction <add>, %129, %cst_37 [2] : vector<4x16x16xf32> to vector<4x16xf32>
    %131 = vector.shape_cast %130 : vector<4x16xf32> to vector<4x16x1xf32>
    %132 = tpu.reciprocal %131 {approx = true} : vector<4x16x1xf32> -> vector<4x16x1xf32>
    %133 = vector.broadcast %132 : vector<4x16x1xf32> to vector<4x16x16xf32>
    %134 = arith.mulf %129, %133 : vector<4x16x16xf32>
    %135 = arith.truncf %134 : vector<4x16x16xf32> to vector<4x16x16xbf16>
    "tpu.trace_start"() <{level = 10 : i32, message = "bqk,bkd->bqd"}> : () -> ()
    %cst_38 = arith.constant dense<0.000000e+00> : vector<4x16x32xf32>
    %136 = tpu.matmul %135, %121, %cst_38 {dimension_numbers = #tpu.dot_dimension_numbers<[2], [1], [1], [2], [0, 0, 0, 1, 1, 2], [0], [0]>} : vector<4x16x16xbf16>, vector<4x16x32xbf16>, vector<4x16x32xf32> -> vector<4x16x32xf32>
    "tpu.trace_stop"() : () -> ()
    %137 = vector.shape_cast %136 : vector<4x16x32xf32> to vector<64x32xf32>
    %138 = tpu.concatenate %62, %87, %112, %137 in 1 : vector<64x32xf32>, vector<64x32xf32>, vector<64x32xf32>, vector<64x32xf32> -> vector<64x128xf32>
    %139 = arith.truncf %138 : vector<64x128xf32> to vector<64x128xbf16>
    %c0_39 = arith.constant 0 : index
    %c0_40 = arith.constant 0 : index
    %c0_41 = arith.constant 0 : index
    %140 = vector.load %arg7[%c0_39, %c0_40, %c0_41] : memref<1x128x128xbf16, #tpu.memory_space<vmem>>, vector<1x128x128xbf16>
    %141 = vector.shape_cast %140 : vector<1x128x128xbf16> to vector<128x128xbf16>
    %cst_42 = arith.constant dense<0.000000e+00> : vector<64x128xf32>
    %142 = tpu.matmul %139, %141, %cst_42 {dimension_numbers = #tpu.dot_dimension_numbers<[1], [0], [0], [1], [0, 0, 1, 1], [], []>} : vector<64x128xbf16>, vector<128x128xbf16>, vector<64x128xf32> -> vector<64x128xf32>
    %c0_43 = arith.constant 0 : index
    %c0_44 = arith.constant 0 : index
    %c0_45 = arith.constant 0 : index
    %143 = vector.load %arg8[%c0_43, %c0_44, %c0_45] : memref<1x1x128xf32, #tpu.memory_space<vmem>>, vector<1x1x128xf32>
    %144 = vector.shape_cast %143 : vector<1x1x128xf32> to vector<1x128xf32>
    %145 = vector.broadcast %144 : vector<1x128xf32> to vector<64x128xf32>
    %146 = arith.addf %142, %145 : vector<64x128xf32>
    %147 = arith.addf %3, %146 : vector<64x128xf32>
    %c0_46 = arith.constant 0 : index
    %c0_47 = arith.constant 0 : index
    %c0_48 = arith.constant 0 : index
    %148 = vector.load %arg9[%c0_46, %c0_47, %c0_48] : memref<1x1x128xf32, #tpu.memory_space<vmem>>, vector<1x1x128xf32>
    %149 = vector.shape_cast %148 : vector<1x1x128xf32> to vector<1x128xf32>
    %c0_49 = arith.constant 0 : index
    %c0_50 = arith.constant 0 : index
    %c0_51 = arith.constant 0 : index
    %150 = vector.load %arg10[%c0_49, %c0_50, %c0_51] : memref<1x1x128xf32, #tpu.memory_space<vmem>>, vector<1x1x128xf32>
    %151 = vector.shape_cast %150 : vector<1x1x128xf32> to vector<1x128xf32>
    %cst_52 = arith.constant dense<0.000000e+00> : vector<64xf32>
    %152 = vector.multi_reduction <add>, %147, %cst_52 [1] : vector<64x128xf32> to vector<64xf32>
    %153 = vector.shape_cast %152 : vector<64xf32> to vector<64x1xf32>
    %cst_53 = arith.constant 1.280000e+02 : f32
    %154 = vector.broadcast %cst_53 : f32 to vector<64x1xf32>
    %155 = arith.divf %153, %154 : vector<64x1xf32>
    %156 = arith.mulf %147, %147 : vector<64x128xf32>
    %cst_54 = arith.constant dense<0.000000e+00> : vector<64xf32>
    %157 = vector.multi_reduction <add>, %156, %cst_54 [1] : vector<64x128xf32> to vector<64xf32>
    %158 = vector.shape_cast %157 : vector<64xf32> to vector<64x1xf32>
    %cst_55 = arith.constant 1.280000e+02 : f32
    %159 = vector.broadcast %cst_55 : f32 to vector<64x1xf32>
    %160 = arith.divf %158, %159 : vector<64x1xf32>
    %161 = arith.mulf %155, %155 : vector<64x1xf32>
    %162 = arith.subf %160, %161 : vector<64x1xf32>
    %163 = vector.broadcast %155 : vector<64x1xf32> to vector<64x128xf32>
    %164 = arith.subf %147, %163 : vector<64x128xf32>
    %cst_56 = arith.constant 9.99999974E-6 : f32
    %165 = vector.broadcast %cst_56 : f32 to vector<64x1xf32>
    %166 = arith.addf %162, %165 : vector<64x1xf32>
    %167 = math.rsqrt %166 : vector<64x1xf32>
    %168 = vector.broadcast %167 : vector<64x1xf32> to vector<64x128xf32>
    %169 = arith.mulf %164, %168 : vector<64x128xf32>
    %170 = vector.broadcast %149 : vector<1x128xf32> to vector<64x128xf32>
    %171 = arith.mulf %169, %170 : vector<64x128xf32>
    %172 = vector.broadcast %151 : vector<1x128xf32> to vector<64x128xf32>
    %173 = arith.addf %171, %172 : vector<64x128xf32>
    %174 = arith.truncf %173 : vector<64x128xf32> to vector<64x128xbf16>
    %c0_57 = arith.constant 0 : index
    %c0_58 = arith.constant 0 : index
    %c0_59 = arith.constant 0 : index
    %175 = vector.load %arg11[%c0_57, %c0_58, %c0_59] : memref<1x128x256xbf16, #tpu.memory_space<vmem>>, vector<1x128x256xbf16>
    %176 = vector.shape_cast %175 : vector<1x128x256xbf16> to vector<128x256xbf16>
    %cst_60 = arith.constant dense<0.000000e+00> : vector<64x256xf32>
    %177 = tpu.matmul %174, %176, %cst_60 {dimension_numbers = #tpu.dot_dimension_numbers<[1], [0], [0], [1], [0, 0, 1, 1], [], []>} : vector<64x128xbf16>, vector<128x256xbf16>, vector<64x256xf32> -> vector<64x256xf32>
    %c0_61 = arith.constant 0 : index
    %c0_62 = arith.constant 0 : index
    %c0_63 = arith.constant 0 : index
    %178 = vector.load %arg12[%c0_61, %c0_62, %c0_63] : memref<1x1x256xf32, #tpu.memory_space<vmem>>, vector<1x1x256xf32>
    %179 = vector.shape_cast %178 : vector<1x1x256xf32> to vector<1x256xf32>
    %180 = vector.broadcast %179 : vector<1x256xf32> to vector<64x256xf32>
    %181 = arith.addf %177, %180 : vector<64x256xf32>
    %cst_64 = arith.constant 5.000000e-01 : f32
    %182 = vector.broadcast %cst_64 : f32 to vector<64x256xf32>
    %183 = arith.mulf %182, %181 : vector<64x256xf32>
    %cst_65 = arith.constant 0.707106769 : f32
    %184 = vector.broadcast %cst_65 : f32 to vector<64x256xf32>
    %185 = arith.mulf %181, %184 : vector<64x256xf32>
    %186 = math.erf %185 : vector<64x256xf32>
    %cst_66 = arith.constant 1.000000e+00 : f32
    %187 = vector.broadcast %cst_66 : f32 to vector<64x256xf32>
    %188 = arith.addf %187, %186 : vector<64x256xf32>
    %189 = arith.mulf %183, %188 : vector<64x256xf32>
    %190 = arith.truncf %189 : vector<64x256xf32> to vector<64x256xbf16>
    %c0_67 = arith.constant 0 : index
    %c0_68 = arith.constant 0 : index
    %c0_69 = arith.constant 0 : index
    %191 = vector.load %arg13[%c0_67, %c0_68, %c0_69] : memref<1x256x128xbf16, #tpu.memory_space<vmem>>, vector<1x256x128xbf16>
    %192 = vector.shape_cast %191 : vector<1x256x128xbf16> to vector<256x128xbf16>
    %cst_70 = arith.constant dense<0.000000e+00> : vector<64x128xf32>
    %193 = tpu.matmul %190, %192, %cst_70 {dimension_numbers = #tpu.dot_dimension_numbers<[1], [0], [0], [1], [0, 0, 1, 1], [], []>} : vector<64x256xbf16>, vector<256x128xbf16>, vector<64x128xf32> -> vector<64x128xf32>
    %c0_71 = arith.constant 0 : index
    %c0_72 = arith.constant 0 : index
    %c0_73 = arith.constant 0 : index
    %194 = vector.load %arg14[%c0_71, %c0_72, %c0_73] : memref<1x1x128xf32, #tpu.memory_space<vmem>>, vector<1x1x128xf32>
    %195 = vector.shape_cast %194 : vector<1x1x128xf32> to vector<1x128xf32>
    %196 = vector.broadcast %195 : vector<1x128xf32> to vector<64x128xf32>
    %197 = arith.addf %193, %196 : vector<64x128xf32>
    %198 = arith.addf %147, %197 : vector<64x128xf32>
    %c0_74 = arith.constant 0 : index
    %c0_75 = arith.constant 0 : index
    %199 = vector.load %arg16[%c0_74, %c0_75] : memref<64x128xf32, #tpu.memory_space<vmem>>, vector<64x128xf32>
    tpu.vector_store %arg16[%c0_74, %c0_75], %198 {strides = array<i32>} : memref<64x128xf32, #tpu.memory_space<vmem>>, vector<64x128xf32>,
    %c1_i32 = arith.constant 1 : i32
    %200 = arith.cmpi eq, %arg1, %c1_i32 : i32
    %201 = arith.extui %200 : i1 to i32
    %c0_i32_76 = arith.constant 0 : i32
    %202 = arith.cmpi ne, %201, %c0_i32_76 : i32
    scf.if %202 {
      %c0_77 = arith.constant 0 : index
      %c0_78 = arith.constant 0 : index
      %203 = vector.load %arg15[%c0_77, %c0_78] : memref<64x128xf32, #tpu.memory_space<vmem>>, vector<64x128xf32>
      tpu.vector_store %arg15[%c0_77, %c0_78], %198 {strides = array<i32>} : memref<64x128xf32, #tpu.memory_space<vmem>>, vector<64x128xf32>,
    } else {
    }
    return
  }
  func.func @transform_0(%arg0: i32, %arg1: i32) -> (i32, i32) {
    %c0_i32 = arith.constant 0 : i32
    %c0_i32_0 = arith.constant 0 : i32
    return %arg0, %c0_i32 : i32, i32
  }
  func.func @transform_1(%arg0: i32, %arg1: i32) -> (i32, i32, i32) {
    %c0_i32 = arith.constant 0 : i32
    %c0_i32_0 = arith.constant 0 : i32
    %c0_i32_1 = arith.constant 0 : i32
    return %arg1, %c0_i32, %c0_i32_0 : i32, i32, i32
  }
  func.func @transform_2(%arg0: i32, %arg1: i32) -> (i32, i32, i32) {
    %c0_i32 = arith.constant 0 : i32
    %c0_i32_0 = arith.constant 0 : i32
    %c0_i32_1 = arith.constant 0 : i32
    return %arg1, %c0_i32, %c0_i32_0 : i32, i32, i32
  }
  func.func @transform_3(%arg0: i32, %arg1: i32) -> (i32, i32, i32) {
    %c0_i32 = arith.constant 0 : i32
    %c0_i32_0 = arith.constant 0 : i32
    %c0_i32_1 = arith.constant 0 : i32
    return %arg1, %c0_i32, %c0_i32_0 : i32, i32, i32
  }
  func.func @transform_4(%arg0: i32, %arg1: i32) -> (i32, i32, i32) {
    %c0_i32 = arith.constant 0 : i32
    %c0_i32_0 = arith.constant 0 : i32
    %c0_i32_1 = arith.constant 0 : i32
    return %arg1, %c0_i32, %c0_i32_0 : i32, i32, i32
  }
  func.func @transform_5(%arg0: i32, %arg1: i32) -> (i32, i32, i32) {
    %c0_i32 = arith.constant 0 : i32
    %c0_i32_0 = arith.constant 0 : i32
    %c0_i32_1 = arith.constant 0 : i32
    return %arg1, %c0_i32, %c0_i32_0 : i32, i32, i32
  }
  func.func @transform_6(%arg0: i32, %arg1: i32) -> (i32, i32, i32) {
    %c0_i32 = arith.constant 0 : i32
    %c0_i32_0 = arith.constant 0 : i32
    %c0_i32_1 = arith.constant 0 : i32
    return %arg1, %c0_i32, %c0_i32_0 : i32, i32, i32
  }
  func.func @transform_7(%arg0: i32, %arg1: i32) -> (i32, i32, i32) {
    %c0_i32 = arith.constant 0 : i32
    %c0_i32_0 = arith.constant 0 : i32
    %c0_i32_1 = arith.constant 0 : i32
    return %arg1, %c0_i32, %c0_i32_0 : i32, i32, i32
  }
  func.func @transform_8(%arg0: i32, %arg1: i32) -> (i32, i32, i32) {
    %c0_i32 = arith.constant 0 : i32
    %c0_i32_0 = arith.constant 0 : i32
    %c0_i32_1 = arith.constant 0 : i32
    return %arg1, %c0_i32, %c0_i32_0 : i32, i32, i32
  }
  func.func @transform_9(%arg0: i32, %arg1: i32) -> (i32, i32, i32) {
    %c0_i32 = arith.constant 0 : i32
    %c0_i32_0 = arith.constant 0 : i32
    %c0_i32_1 = arith.constant 0 : i32
    return %arg1, %c0_i32, %c0_i32_0 : i32, i32, i32
  }
  func.func @transform_10(%arg0: i32, %arg1: i32) -> (i32, i32, i32) {
    %c0_i32 = arith.constant 0 : i32
    %c0_i32_0 = arith.constant 0 : i32
    %c0_i32_1 = arith.constant 0 : i32
    return %arg1, %c0_i32, %c0_i32_0 : i32, i32, i32
  }
  func.func @transform_11(%arg0: i32, %arg1: i32) -> (i32, i32, i32) {
    %c0_i32 = arith.constant 0 : i32
    %c0_i32_0 = arith.constant 0 : i32
    %c0_i32_1 = arith.constant 0 : i32
    return %arg1, %c0_i32, %c0_i32_0 : i32, i32, i32
  }
  func.func @transform_12(%arg0: i32, %arg1: i32) -> (i32, i32, i32) {
    %c0_i32 = arith.constant 0 : i32
    %c0_i32_0 = arith.constant 0 : i32
    %c0_i32_1 = arith.constant 0 : i32
    return %arg1, %c0_i32, %c0_i32_0 : i32, i32, i32
  }
  func.func @transform_13(%arg0: i32, %arg1: i32) -> (i32, i32) {
    %c0_i32 = arith.constant 0 : i32
    %c0_i32_0 = arith.constant 0 : i32
    return %arg0, %c0_i32 : i32, i32
  }
}

</mosaic_0001>

<bundles_post_ra>
// kernel: tpu_custom_call.1
= control target key start
LH: loop header
LB: loop body
LE: loop exit
PB: predicated region body
PF: predicated region fallthrough
CT: control target
= control target key end

     0   :  { %s7388_s0 = inlined_call_operand.hbm [shape: f32[64,128], index: 0, kind: input, shape index: {}]   ;;  %s7389_s1 = inlined_call_operand.hbm [shape: f32[2,1,128], index: 1, kind: input, shape index: {}]   ;;  %s7390_s2 = inlined_call_operand.hbm [shape: f32[2,1,128], index: 2, kind: input, shape index: {}]   ;;  %s7391_s3 = inlined_call_operand.hbm [shape: bf16[2,128,384], index: 3, kind: input, shape index: {}]   ;;  %s7392_s4 = inlined_call_operand.hbm [shape: f32[2,1,384], index: 4, kind: input, shape index: {}]   ;;  %s7393_s5 = inlined_call_operand.hbm [shape: bf16[2,128,128], index: 5, kind: input, shape index: {}]   ;;  %s7394_s6 = inlined_call_operand.vmem [shape: f32[2,1,128], index: 6, kind: input, shape index: {}]   ;;  %s7395_s7 = inlined_call_operand.hbm [shape: f32[2,1,128], index: 7, kind: input, shape index: {}]   ;;  %s7396_s8 = inlined_call_operand.hbm [shape: f32[2,1,128], index: 8, kind: input, shape index: {}]   ;;  %s7397_s9 = inlined_call_operand.hbm [shape: bf16[2,128,256], index: 9, kind: input, shape index: {}]   ;;  %s7398_s10 = inlined_call_operand.vmem [shape: f32[2,1,256], index: 10, kind: input, shape index: {}]   ;;  %s7399_s11 = inlined_call_operand.hbm [shape: bf16[2,256,128], index: 11, kind: input, shape index: {}]   ;;  %s7400_s12 = inlined_call_operand.vmem [shape: f32[2,1,128], index: 12, kind: input, shape index: {}]   ;;  %s7401_s13 = inlined_call_operand.hbm [shape: f32[64,128], index: 13, kind: output, shape index: {}]  }
   0x1   :  { %7412 = sst [smem:[#allocation31_spill]] %s7388_s0 }
   0x2   :  { %7413 = sst [smem:[#allocation32_spill]] %s7389_s1 }
   0x3   :  { %7414 = sst [smem:[#allocation33_spill]] %s7390_s2 }
   0x4   :  { %7415 = sst [smem:[#allocation34_spill]] %s7391_s3 }
   0x5   :  { %7416 = sst [smem:[#allocation35_spill]] %s7392_s4 }
   0x6   :  { %7417 = sst [smem:[#allocation36_spill]] %s7394_s6 }
   0x7   :  { %7418 = sst [smem:[#allocation37_spill]] %s7398_s10 }
   0x8   :  { %7419 = sst [smem:[#allocation38_spill]] %s7400_s12 }
   0x9   :  { %7420 = sst [smem:[#allocation39_spill]] %s7401_s13 }
   0xa   :  { %18 = vsyncpa [#allocation4], 0 }
   0xb   :  { %19 = vsyncpa [#allocation7], 0 }
   0xc   :  { %21 = vsyncpa [#allocation7 + $0x1], 0 }
   0xd   :  { %22 = vsyncpa [#allocation10], 0 }
   0xe   :  { %24 = vsyncpa [#allocation10 + $0x1], 0 }
   0xf   :  { %25 = vsyncpa [#allocation13], 0 }
  0x10   :  { %27 = vsyncpa [#allocation13 + $0x1], 0 }
  0x11   :  { %28 = vsyncpa [#allocation16], 0 }
  0x12   :  { %30 = vsyncpa [#allocation16 + $0x1], 0 }
  0x13   :  { %31 = vsyncpa [#allocation19], 0 }
  0x14   :  { %33 = vsyncpa [#allocation19 + $0x1], 0 }
  0x15   :  { %34 = vsyncpa [#allocation5], 0  ;;  %s5680_s25 = smov 0   ;;  %s5682_s26 = smov 0  }
  0x16   :  { %s5684_s27 = smov 0   ;;  %s5686_s28 = smov 0  }
  0x17   :  { %s5688_s29 = smov 0   ;;  %s5690_s30 = smov 0  }
  0x18 LB: > { %7421 = sst [smem:[#allocation28_spill]] %s5582_s27  ;;  %s49_s14 = sadd.s32 1, %s5590_s29  ;;  %s5594_s30 = sphi %s5690_s30, %s40_s30   ;;  %s5590_s29 = sphi %s5688_s29, %s7474_s29   ;;  %s5586_s28 = sphi %s5686_s28, %s7473_s28   ;;  %s5582_s27 = sphi %s5684_s27, %s7469_s27   ;;  %s5578_s26 = sphi %s5682_s26, %s7472_s26   ;;  %s5574_s25 = sphi %s5680_s25, %s7471_s25  }
  0x19   : > { %s85_s15 = sadd.s32 1, %s5582_s27  ;;  %p50_p0 = scmp.ge.s32.totalorder %s49_s14, 2 }
  0x1a   : > { %p92_p1 = scmp.ne.s32.totalorder %s5582_s27, %s5578_s26  ;;  %p93_p2 = scmp.eq.s32.totalorder %s5594_s30, 0 }
  0x1b   : > { %s7476_s14 = smov (%p50_p0, %s49_s14), 0  ;;  %p4858_p4 = scmp.lt.s32.totalorder %s5594_s30, 2 }
  0x1c   : > { %7422 = sst [smem:[#allocation29_spill]] %s7476_s14  ;;  %p5717_p3 = por %p93_p2, %p92_p1 }
  0x1d   : > { %s82_s17 = ssub.s32 %s5590_s29, %s7476_s14  ;;  %s5725_s18 = sand.u32 1, %s5594_s30  }
  0x1e   : > { %p83_p5 = scmp.eq.s32.totalorder %s82_s17, 0  ;;  %s5728_s19 = sand.u32 1, %s5582_s27  }
  0x1f   : > { %s7424_s1 = sld [smem:[#allocation32_spill]]  ;;  %s454_s13 = scalar_lea.vmem [#allocation6], %s5728_s19 }
  0x20   : > { %s5735_s23 = scalar_select %p83_p5, %s5582_s27, %s85_s15  }
  0x21   : > { %s461_s14 = sshll.u32 %s454_s13, 4  ;;  %p5740_p6 = pnand %p4858_p4, %p5717_p3  ;;  %s462_s14 = int_to_ptr.vmem [resolvable:$true] %s461_s14 }
  0x22   : > { %7425 = sst [smem:[#allocation30_spill]] %s5735_s23  ;;  %s4793_s20 = smul.u32 192, %s5728_s19 }
  0x23   : > { %s4794_s21 = smul.u32 192, %s5590_s29  ;;  %s7404_s15 = scalar_lea.sflag [#allocation7], %s5725_s18 }
  0x24   : > { %s7427_s3 = sld [smem:[#allocation34_spill]]  ;;  %s489_s16 = scalar_lea.vmem [#allocation9], %s4793_s20 }
  0x25   : > { %s457_s22 = scalar_lea.hbm %s7424_s1, %s5590_s29  ;;  %s497_s27 = sshll.u32 %s489_s16, 4  ;;  %s498_s27 = int_to_ptr.vmem [resolvable:$true] %s497_s27 }
  0x26   : > { %s459_s24 = sshll.u32 %s457_s22, 4  ;;  %s7409_s12 = scalar_lea.sflag [#allocation10], %s5725_s18  ;;  %s460_s24 = int_to_ptr.hbm [resolvable:$true] %s459_s24 }
  0x27   : > { %4832 = dma.hbm_to_vmem [thread:$0]  (!%p5740_p6), %s460_s24, 16, %s462_s14, %s7404_s15  }
  0x28   : > { %s5596_s10 = smov 192   ;;  %s5597_s6 = smov 12  }
  0x29   : > { %s4393_s14 = sshll.u32 %s5728_s19, 6  ;;  %s4718_s24 = sshll.u32 %s5590_s29, 6 }
  0x2a   : > { %s494_s13 = scalar_lea.hbm %s7427_s3, %s4794_s21  ;;  %s535_s20 = scalar_lea.hbm %s7393_s5, %s4718_s24 }
  0x2b   : > { %s495_s23 = sshll.u32 %s494_s13, 4  ;;  %s530_s22 = scalar_lea.vmem [#allocation12], %s4393_s14  ;;  %s496_s23 = int_to_ptr.hbm [resolvable:$true] %s495_s23 }
  0x2c   : > { %4838 = dma.hbm_to_vmem [thread:$0]  (!%p5740_p6), %s496_s23, 3072, %s498_s27, %s7409_s12, %s5596_s10, %s5596_s10, %s5597_s6  }
  0x2d   : > { %s538_s13 = sshll.u32 %s530_s22, 4  ;;  %s536_s16 = sshll.u32 %s535_s20, 4  ;;  %s539_s13 = int_to_ptr.vmem [resolvable:$true] %s538_s13  ;;  %s537_s16 = int_to_ptr.hbm [resolvable:$true] %s536_s16 }
  0x2e   : > { %s7408_s15 = scalar_lea.sflag [#allocation13], %s5725_s18  ;;  %s7405_s6 = smov 64  }
  0x2f   : > { %s7406_s10 = smov 4   ;;  %s577_s14 = scalar_lea.hbm %s7396_s8, %s5590_s29 }
  0x30   : > { %4844 = dma.hbm_to_vmem [thread:$0]  (!%p5740_p6), %s537_s16, 1024, %s539_s13, %s7408_s15, %s7405_s6, %s7405_s6, %s7406_s10  }
  0x31   : > { %s579_s24 = sshll.u32 %s577_s14, 4  ;;  %s574_s1 = scalar_lea.vmem [#allocation15], %s5728_s19  ;;  %s580_s24 = int_to_ptr.hbm [resolvable:$true] %s579_s24 }
  0x32   : > { %s581_s21 = sshll.u32 %s574_s1, 4  ;;  %s7407_s20 = scalar_lea.sflag [#allocation16], %s5725_s18  ;;  %s582_s21 = int_to_ptr.vmem [resolvable:$true] %s581_s21 }
  0x33   : > { %4850 = dma.hbm_to_vmem [thread:$0]  (!%p5740_p6), %s580_s24, 16, %s582_s21, %s7407_s20  }
  0x34   : > { %s5783_s22 = sadd.s32 4294967295, %s5594_s30   ;;  %p98_p7 = scmp.ne.s32.totalorder %s5578_s26, %s5574_s25 }
  0x35   : > { %p99_p8 = scmp.eq.s32.totalorder %s5783_s22, 0  ;;  %p4389_p9 = scmp.ge.s32.totalorder %s5594_s30, 1 }
  0x36   : > { %p421_p10 = scmp.lt.s32.totalorder %s5594_s30, 3  ;;  %s7429_s0 = sld [smem:[#allocation31_spill]] }
  0x37   : > { %p5792_p11 = por %p99_p8, %p98_p7  ;;  %s5600_s25 = smov [#allocation3]  }
  0x38   : > { %p5799_p12 = pnand %p4389_p9, %p421_p10  ;;  %s437_s24 = sshll.u32 %s5600_s25, 4  ;;  %s438_s24 = int_to_ptr.vmem [resolvable:$true] %s437_s24 }
  0x39   : > { %s7431_s2 = sld [smem:[#allocation33_spill]]  ;;  %s471_s27 = scalar_lea.vmem [#allocation8], %s5728_s19 }
  0x3a   : > { %p4825_p13 = pneg %p5799_p12  ;;  %s478_s6 = sshll.u32 %s471_s27, 4  ;;  %s479_s6 = int_to_ptr.vmem [resolvable:$true] %s478_s6 }
  0x3b   : > { %s7410_s20 = smov 128   ;;  %s7411_s15 = smov 8  }
  0x3c   : > { %s435_s23 = sshll.u32 %s7429_s0, 4  ;;  %p4826_p0 = pnand %p4825_p13, %p99_p8  ;;  %s436_s23 = int_to_ptr.hbm [resolvable:$true] %s435_s23 }
  0x3d   : > { %s7432_s25 = scalar_lea.sflag [#allocation7], %s5725_s18  ;;  %s4795_s1 = smul.u32 3, %s5728_s19 }
  0x3e   : > { %4828 = dma.hbm_to_vmem [thread:$0]  (!%p4826_p0), %s436_s23, 1024, %s438_s24, [#allocation4], %s7410_s20, %s7410_s20, %s7411_s15  }
  0x3f   : > { %s474_s16 = scalar_lea.hbm %s7431_s2, %s5590_s29  ;;  %s4796_s21 = smul.u32 3, %s5590_s29 }
  0x40   : > { %s476_s10 = sshll.u32 %s474_s16, 4  ;;  %s560_s12 = scalar_lea.hbm %s7395_s7, %s5590_s29  ;;  %s477_s10 = int_to_ptr.hbm [resolvable:$true] %s476_s10 }
  0x41   : > { %4835 = dma.hbm_to_vmem [thread:$0]  (!%p5740_p6), %s477_s10, 16, %s479_s6, %s7432_s25  }
  0x42   : > { %s562_s0 = sshll.u32 %s560_s12, 4  ;;  %s7433_s4 = sld [smem:[#allocation35_spill]]  ;;  %s563_s0 = int_to_ptr.hbm [resolvable:$true] %s562_s0 }
  0x43   : > { %s511_s24 = scalar_lea.vmem [#allocation11], %s4795_s1  ;;  %s7434_s6 = scalar_lea.sflag [#allocation10], %s5725_s18 }
  0x44   : > { %s519_s20 = sshll.u32 %s511_s24, 4  ;;  %s557_s10 = scalar_lea.vmem [#allocation14], %s5728_s19  ;;  %s520_s20 = int_to_ptr.vmem [resolvable:$true] %s519_s20 }
  0x45   : > { %s564_s25 = sshll.u32 %s557_s10, 4  ;;  %s4396_s16 = sshll.u32 %s5728_s19, 7  ;;  %s565_s25 = int_to_ptr.vmem [resolvable:$true] %s564_s25 }
  0x46   : > { %s7435_s12 = scalar_lea.sflag [#allocation13], %s5725_s18  ;;  %s4719_s2 = sshll.u32 %s5590_s29, 7 }
  0x47   : > { %4847 = dma.hbm_to_vmem [thread:$0]  (!%p5740_p6), %s563_s0, 16, %s565_s25, %s7435_s12  }
  0x48   : > { %s515_s23 = scalar_lea.hbm %s7433_s4, %s4796_s21  ;;  %s592_s3 = scalar_lea.vmem [#allocation17], %s4396_s16 }
  0x49   : > { %s517_s15 = sshll.u32 %s515_s23, 4  ;;  %s600_s1 = sshll.u32 %s592_s3, 4  ;;  %s518_s15 = int_to_ptr.hbm [resolvable:$true] %s517_s15  ;;  %s601_s1 = int_to_ptr.vmem [resolvable:$true] %s600_s1 }
  0x4a   : > { %4841 = dma.hbm_to_vmem [thread:$0]  (!%p5740_p6), %s518_s15, 48, %s520_s20, %s7434_s6  }
  0x4b   : > { %s597_s23 = scalar_lea.hbm %s7397_s9, %s4719_s2  ;;  %s7436_s15 = smov 8  }
  0x4c   : > { %s598_s24 = sshll.u32 %s597_s23, 4  ;;  %s7437_s20 = smov 128   ;;  %s599_s24 = int_to_ptr.hbm [resolvable:$true] %s598_s24 }
  0x4d   : > { %s7438_s6 = scalar_lea.sflag [#allocation16], %s5725_s18  ;;  %s626_s0 = scalar_lea.hbm %s7399_s11, %s4719_s2 }
  0x4e   : > { %4853 = dma.hbm_to_vmem [thread:$0]  (!%p5740_p6), %s599_s24, 2048, %s601_s1, %s7438_s6, %s7437_s20, %s7437_s20, %s7436_s15  }
  0x4f   : > { %s621_s25 = scalar_lea.vmem [#allocation18], %s4396_s16  ;;  %s627_s3 = sshll.u32 %s626_s0, 4  ;;  %s628_s3 = int_to_ptr.hbm [resolvable:$true] %s627_s3 }
  0x50   : > { %s629_s12 = sshll.u32 %s621_s25, 4  ;;  %s618_s21 = scalar_lea.sflag [#allocation19], %s5728_s19  ;;  %s630_s12 = int_to_ptr.vmem [resolvable:$true] %s629_s12 }
  0x51   : > { %s7439_s27 = smov 4   ;;  %s7440_s23 = smov 64  }
  0x52   : > { %4856 = dma.hbm_to_vmem [thread:$0]  (!%p5740_p6), %s628_s3, 2048, %s630_s12, %s618_s21, %s7440_s23, %s7440_s23, %s7439_s27  }
  0x53   : > { %647 = sbr.rel (%p5799_p12) target bundleno = 3275 (0xccb), region = 72 }
  0x58   : > { %5545 = dma.done.wait (%p99_p8), [#allocation4], 1024  }
  0x59   : > { %5547 = vsyncadd (%p99_p8), [#allocation4], 4294966272  ;;  %s654_s4 = sand.u32 1, %s5783_s22   ;;  %s5866_s18 = sand.u32 1, %s5578_s26  }
  0x5a   : > { %s655_s19 = scalar_lea.sflag [#allocation7], %s654_s4  ;;  %s657_s17 = scalar_lea.vmem [#allocation6], %s5866_s18 }
  0x5b   : > { %5549 = dma.done.wait (%p5792_p11), %s655_s19, 32  }
  0x5c   : > { %5551 = vsyncadd (%p5792_p11), %s655_s19, 4294967264  ;;  %s4797_s14 = smul.u32 192, %s5866_s18  ;;  %s673_s2 = scalar_lea.sflag [#allocation10], %s654_s4 }
  0x5e   : > { %s5875_s1 = scalar_lea.vmem [#allocation9], %s4797_s14 }
  0x5f   : > { %5553 = dma.done.wait (%p5792_p11), %s673_s2, 3120  }
  0x60   : > { %5555 = vsyncadd (%p5792_p11), %s673_s2, 4294964176  ;;  %s4798_s24 = smul.u32 3, %s5866_s18  ;;  %s4404_s15 = sshll.u32 %s5866_s18, 6 }
  0x61   : > { %s693_s6 = scalar_lea.sflag [#allocation13], %s654_s4  ;;  %s5885_s10 = scalar_lea.vmem [#allocation12], %s4404_s15 }
  0x62   : > { %s5883_s20 = scalar_lea.vmem [#allocation11], %s4798_s24 }
  0x63   : > { %5557 = dma.done.wait (%p5792_p11), %s693_s6, 1040  }
  0x64   : > { %5559 = vsyncadd (%p5792_p11), %s693_s6, 4294966256  ;;  %s712_s25 = scalar_lea.sflag [#allocation16], %s654_s4 }
  0x65   : > { %5561 = dma.done.wait (%p5792_p11), %s712_s25, 2064  }
  0x66   : > { %5563 = vsyncadd (%p5792_p11), %s712_s25, 4294965232  ;;  %s4405_s3 = sshll.u32 %s5866_s18, 7  ;;  %s731_s27 = scalar_lea.sflag [#allocation19], %s5866_s18 }
  0x67   : > { %s5898_s21 = scalar_lea.vmem [#allocation17], %s4405_s3  ;;  %s5901_s23 = scalar_lea.vmem [#allocation18], %s4405_s3 }
  0x68   : > { %5565 = dma.done.wait (%p5792_p11), %s731_s27, 2048  }
  0x69   : > { %5567 = vsyncadd (%p5792_p11), %s731_s27, 4294965248  ;;  %p820_p1 = scmp.lt.s32.totalorder %s5586_s28, 1  ;;  %s7441_s2 = sld [smem:[#allocation36_spill]] }
  0x6a   : > { %s7442_s3 = sld [smem:[#allocation37_spill]]  ;;  %p4408_p2 = scmp.ne.s32.totalorder %s5586_s28, 0 }
  0x6b   : > { %s5909_s4 = scalar_select %p820_p1, %s5586_s28, 1 }
  0x6c   : > { %s7443_s0 = sld [smem:[#allocation38_spill]] }
  0x6d   : > { %s4407_s15 = sshll.u32 %s5909_s4, 1 }
  0x6e   : > { %835 = sbr.rel (%p4408_p2) target bundleno = 124 (0x7c), region = 116 }
  0x6f   : > { %s822_s24 = scalar_lea.vmem %s7441_s2, %s5909_s4 }
  0x70   : > { %s5919_s12 = scalar_lea.vmem %s7442_s3, %s4407_s15 }
  0x72   : > { %s829_s16 = scalar_lea.vmem %s7443_s0, %s5909_s4 }
  0x73   : > { %v836_v0 = vld [vmem:[#allocation3] sm:$0xff]  ;;  %v837_v1 = vld [vmem:[#allocation3 + $0x8] sm:$0xff]  ;;  %v838_v2 = vld [vmem:[#allocation3 + $0x10] sm:$0xff] }
  0x74   : > { %844 = vst [vmem:[#allocation2 + $0x30] sm:$0xff] %v836_v0  ;;  %v839_v3 = vld [vmem:[#allocation3 + $0x18] sm:$0xff]  ;;  %v840_v4 = vld [vmem:[#allocation3 + $0x20] sm:$0xff]  ;;  %v841_v5 = vld [vmem:[#allocation3 + $0x28] sm:$0xff] }
  0x75   : > { %845 = vst [vmem:[#allocation2] sm:$0xff] %v837_v1  ;;  %v842_v6 = vld [vmem:[#allocation3 + $0x30] sm:$0xff]  ;;  %v843_v7 = vld [vmem:[#allocation3 + $0x38] sm:$0xff] }
  0x76   : > { %846 = vst [vmem:[#allocation2 + $0x18] sm:$0xff] %v838_v2 }
  0x77   : > { %847 = vst [vmem:[#allocation2 + $0x10] sm:$0xff] %v839_v3 }
  0x78   : > { %848 = vst [vmem:[#allocation2 + $0x8] sm:$0xff] %v840_v4 }
  0x79   : > { %849 = vst [vmem:[#allocation2 + $0x20] sm:$0xff] %v841_v5 }
  0x7a   : > { %850 = vst [vmem:[#allocation2 + $0x28] sm:$0xff] %v842_v6 }
  0x7b   : > { %851 = vst [vmem:[#allocation2 + $0x38] sm:$0xff] %v843_v7 }
  0x7c PF: > { %v5926_v8 = vld [vmem:[#allocation2 + $0x30] sm:$0xff]  ;;  %v5934_v11 = vld [vmem:[#allocation2] sm:$0xff]  ;;  %v5603_v24 = vmov 128.0   ;;  %v4495_v26 = vld [vmem:[%s5875_s1 + $0xa8] sm:$0xf]  ;;  %s5606_s0 = smov 32  }
  0x7d   : > { %v5928_v9 = vld [vmem:[#allocation2 + $0x18] sm:$0xff]  ;;  %862 = vadd.xlane.f32.xlu0 %v5926_v8  ;;  %v893_v10 = vmul.f32 %v5926_v8, %v5926_v8  ;;  %v894_v13 = vmul.f32 %v5934_v11, %v5934_v11  ;;  %4990 = vrcp.f32 %v5603_v24  ;;  %v4742_v28 = vld [vmem:[%s5875_s1 + $0xac] sm:$0xf]  ;;  %v4503_v31 = vld [vmem:[%s5875_s1 + $0xb0] sm:$0xf]  ;;  %s7451_s2 = scalar_lea.vmem [#allocation15], %s5866_s18 }
  0x7e   : > { %866 = vadd.xlane.f32.xlu2 %v5928_v9  ;;  %v5936_v12 = vld [vmem:[#allocation2 + $0x10] sm:$0xff]  ;;  %v895_v14 = vmul.f32 %v5928_v9, %v5928_v9  ;;  %v4743_v27 = vld [vmem:[%s5875_s1 + $0xb0] sm:$0xf0]  ;;  %v4497_v30 = vld [vmem:[%s5875_s1 + $0xb4] sm:$0xf0]  ;;  %p4713_p3 = scmp.ne.s32.totalorder %s5586_s28, 1 }
  0x7f   : > { %901 = vadd.xlane.f32.xlu1 %v893_v10  ;;  %v5944_v15 = vld [vmem:[#allocation2 + $0x8] sm:$0xff]  ;;  %v896_v16 = vmul.f32 %v5936_v12, %v5936_v12  ;;  %v4496_v29 = vor.u32 %v4743_v27, %v4495_v26  ;;  %v4744_v32 = vld [vmem:[%s5875_s1 + $0xb8] sm:$0xf0]  ;;  %v4500_v33 = vor.u32 %v4742_v28, %v4497_v30  ;;  %v4483_v36 = vld [vmem:[%s5875_s1 + $0x90] sm:$0xf] }
  0x80   : > { %v5949_v17 = vld [vmem:[#allocation2 + $0x20] sm:$0xff]  ;;  %v897_v19 = vmul.f32 %v5944_v15, %v5944_v15  ;;  %v4504_v34 = vor.u32 %v4744_v32, %v4503_v31  ;;  %v4739_v38 = vld [vmem:[%s5875_s1 + $0x94] sm:$0xf]  ;;  %v4491_v41 = vld [vmem:[%s5875_s1 + $0x98] sm:$0xf] }
  0x81   : > { %v898_v18 = vmul.f32 %v5949_v17, %v5949_v17  ;;  %v5956_v20 = vld [vmem:[#allocation2 + $0x28] sm:$0xff]  ;;  %1239 = vmatpush.bf16.msra.mxu0 %v4496_v29  ;;  %1268 = vmatpush.bf16.msra.mxu1 %v4500_v33  ;;  %v4740_v37 = vld [vmem:[%s5875_s1 + $0x98] sm:$0xf0]  ;;  %v4485_v40 = vld [vmem:[%s5875_s1 + $0x9c] sm:$0xf0] }
  0x82   : > { %v899_v21 = vmul.f32 %v5956_v20, %v5956_v20  ;;  %v5960_v22 = vld [vmem:[#allocation2 + $0x38] sm:$0xff]  ;;  %1297 = vmatpush.bf16.msra.mxu2 %v4504_v34  ;;  %v4484_v39 = vor.u32 %v4740_v37, %v4483_v36  ;;  %v4741_v42 = vld [vmem:[%s5875_s1 + $0xa0] sm:$0xf0]  ;;  %v4488_v43 = vor.u32 %v4739_v38, %v4485_v40  ;;  %v4736_v48 = vld [vmem:[%s5875_s1 + $0x7c] sm:$0xf] }
  0x83   : > { %v900_v23 = vmul.f32 %v5960_v22, %v5960_v22  ;;  %v5966_v25 = vpop.eup %4990  ;;  %v4492_v44 = vor.u32 %v4741_v42, %v4491_v41  ;;  %v4471_v46 = vld [vmem:[%s5875_s1 + $0x78] sm:$0xf]  ;;  %v4737_v47 = vld [vmem:[%s5875_s1 + $0x80] sm:$0xf0]  ;;  %v4473_v50 = vld [vmem:[%s5875_s1 + $0x84] sm:$0xf0] }
  0x84   : > { %v879_v35 = vmul.f32 128.0, %v5966_v25  ;;  %v4472_v49 = vor.u32 %v4737_v47, %v4471_v46  ;;  %v4479_v51 = vld [vmem:[%s5875_s1 + $0x80] sm:$0xf]  ;;  %v4738_v52 = vld [vmem:[%s5875_s1 + $0x88] sm:$0xf0]  ;;  %v4476_v53 = vor.u32 %v4736_v48, %v4473_v50  ;;  %vm883_vm0 = vweird.f32 %v5966_v25 }
  0x85   : > { %864 = vadd.xlane.f32.xlu0 %v5934_v11  ;;  %1240 = vmatpush.bf16.msra.mxu0 %v4484_v39  ;;  %v4480_v54 = vor.u32 %v4738_v52, %v4479_v51  ;;  %v4459_v55 = vld [vmem:[%s5875_s1 + $0x60] sm:$0xf]  ;;  %v4734_v56 = vld [vmem:[%s5875_s1 + $0x68] sm:$0xf0]  ;;  %v4733_v57 = vld [vmem:[%s5875_s1 + $0x64] sm:$0xf] }
  0x86   : > { %868 = vadd.xlane.f32.xlu2 %v5936_v12  ;;  %v880_v45 = vsub.f32 1.0, %v879_v35  ;;  %1269 = vmatpush.bf16.msra.mxu1 %v4488_v43  ;;  %v4460_v59 = vor.u32 %v4734_v56, %v4459_v55  ;;  %v4461_v60 = vld [vmem:[%s5875_s1 + $0x6c] sm:$0xf0]  ;;  %v4467_v61 = vld [vmem:[%s5875_s1 + $0x68] sm:$0xf] }
  0x87   : > { %903 = vadd.xlane.f32.xlu1 %v894_v13  ;;  %1298 = vmatpush.bf16.msra.mxu2 %v4492_v44  ;;  %v4735_v62 = vld [vmem:[%s5875_s1 + $0x70] sm:$0xf0]  ;;  %v4464_v63 = vor.u32 %v4733_v57, %v4461_v60  ;;  %v4447_v1 = vld [vmem:[%s5875_s1 + $0x48] sm:$0xf]  ;;  %v4730_v3 = vld [vmem:[%s5875_s1 + $0x4c] sm:$0xf] }
  0x88   : > { %v881_v58 = vmul.f32 %v5966_v25, %v880_v45  ;;  %v4468_v0 = vor.u32 %v4735_v62, %v4467_v61  ;;  %v4731_v2 = vld [vmem:[%s5875_s1 + $0x50] sm:$0xf0]  ;;  %v4449_v6 = vld [vmem:[%s5875_s1 + $0x54] sm:$0xf0]  ;;  %v4455_v7 = vld [vmem:[%s5875_s1 + $0x50] sm:$0xf] }
  0x89   : > { %1241 = vmatpush.bf16.msra.mxu0 %v4472_v49  ;;  %v4448_v5 = vor.u32 %v4731_v2, %v4447_v1  ;;  %v4732_v10 = vld [vmem:[%s5875_s1 + $0x58] sm:$0xf0]  ;;  %v4452_v13 = vor.u32 %v4730_v3, %v4449_v6  ;;  %v4437_v24 = vld [vmem:[%s5875_s1 + $0x3c] sm:$0xf0]  ;;  %v4443_v26 = vld [vmem:[%s5875_s1 + $0x38] sm:$0xf] }
  0x8a   : > { %1270 = vmatpush.bf16.msra.mxu1 %v4476_v53  ;;  %v882_v4 = vadd.f32 %v5966_v25, %v881_v58  ;;  %v4729_v27 = vld [vmem:[%s5875_s1 + $0x40] sm:$0xf0]  ;;  %v4724_v34 = vld [vmem:[%s5875_s1 + $0x1c] sm:$0xf]  ;;  %v4425_v37 = vld [vmem:[%s5875_s1 + $0x24] sm:$0xf0] }
  0x8b   : > { %1299 = vmatpush.bf16.msra.mxu2 %v4480_v54  ;;  %v4444_v29 = vor.u32 %v4729_v27, %v4443_v26  ;;  %v4725_v33 = vld [vmem:[%s5875_s1 + $0x20] sm:$0xf0]  ;;  %v4431_v38 = vld [vmem:[%s5875_s1 + $0x20] sm:$0xf]  ;;  %v4726_v39 = vld [vmem:[%s5875_s1 + $0x28] sm:$0xf0]  ;;  %v4428_v42 = vor.u32 %v4724_v34, %v4425_v37 }
  0x8c   : > { %v4432_v43 = vor.u32 %v4726_v39, %v4431_v38  ;;  %v4411_v45 = vld [vmem:[%s5875_s1] sm:$0xf]  ;;  %v4722_v46 = vld [vmem:[%s5875_s1 + $0x8] sm:$0xf0]  ;;  %v4721_v47 = vld [vmem:[%s5875_s1 + $0x4] sm:$0xf] }
  0x8d   : > { %905 = vadd.xlane.f32.xlu0 %v895_v14  ;;  %1242 = vmatpush.bf16.msra.mxu0 %v4460_v59  ;;  %v4456_v14 = vor.u32 %v4732_v10, %v4455_v7  ;;  %v4412_v48 = vor.u32 %v4722_v46, %v4411_v45  ;;  %v4413_v49 = vld [vmem:[%s5875_s1 + $0xc] sm:$0xf0]  ;;  %v4419_v50 = vld [vmem:[%s5875_s1 + $0x8] sm:$0xf]  ;;  %v4723_v51 = vld [vmem:[%s5875_s1 + $0x10] sm:$0xf0] }
  0x8e   : > { %870 = vadd.xlane.f32.xlu2 %v5944_v15  ;;  %1271 = vmatpush.bf16.msra.mxu1 %v4464_v63  ;;  %v4416_v53 = vor.u32 %v4721_v47, %v4413_v49  ;;  %v4420_v54 = vor.u32 %v4723_v51, %v4419_v50 }
  0x8f   : > { %907 = vadd.xlane.f32.xlu1 %v896_v16  ;;  %1300 = vmatpush.bf16.msra.mxu2 %v4468_v0  ;;  %v4435_v16 = vld [vmem:[%s5875_s1 + $0x30] sm:$0xf] }
  0x91   : > { %1243 = vmatpush.bf16.msra.mxu0 %v4448_v5 }
  0x92   : > { %1272 = vmatpush.bf16.msra.mxu1 %v4452_v13 }
  0x93   : > { %1301 = vmatpush.bf16.msra.mxu2 %v4456_v14 }
  0x95   : > { %872 = vadd.xlane.f32.xlu0 %v5949_v17 }
  0x96   : > { %911 = vadd.xlane.f32.xlu2 %v898_v18  ;;  %v4728_v18 = vld [vmem:[%s5875_s1 + $0x38] sm:$0xf0] }
  0x97   : > { %909 = vadd.xlane.f32.xlu1 %v897_v19  ;;  %v4727_v19 = vld [vmem:[%s5875_s1 + $0x34] sm:$0xf]  ;;  %1302 = vmatpush.bf16.msra.mxu2 %v4444_v29 }
  0x98   : > { %v4440_v28 = vor.u32 %v4727_v19, %v4437_v24 }
  0x9a   : > { %1273 = vmatpush.bf16.msra.mxu1 %v4440_v28 }
  0x9b   : > { %1303 = vmatpush.bf16.msra.mxu2 %v4432_v43 }
  0x9d   : > { %874 = vadd.xlane.f32.xlu0 %v5956_v20 }
  0x9e   : > { %913 = vadd.xlane.f32.xlu2 %v899_v21  ;;  %v6006_v21 = vsel %vm883_vm0, %v5966_v25, %v882_v4  ;;  %v4423_v25 = vld [vmem:[%s5875_s1 + $0x18] sm:$0xf]  ;;  %1274 = vmatpush.bf16.msra.mxu1 %v4428_v42  ;;  %s5604_s1 = smov 96  }
  0x9f   : > { %876 = vadd.xlane.f32.xlu1 %v5960_v22  ;;  %v4424_v36 = vor.u32 %v4725_v33, %v4423_v25  ;;  %1304 = vmatpush.bf16.msra.mxu2 %v4420_v54 }
  0xa2   : > { %1275 = vmatpush.bf16.msra.mxu1 %v4416_v53 }
  0xa5   : > { %915 = vadd.xlane.f32.xlu0 %v900_v23  ;;  %v4436_v23 = vor.u32 %v4728_v18, %v4435_v16 }
  0xa7   : > { %1244 = vmatpush.bf16.msra.mxu0 %v4436_v23 }
  0xab   : > { %1245 = vmatpush.bf16.msra.mxu0 %v4424_v36 }
  0xaf   : > { %1246 = vmatpush.bf16.msra.mxu0 %v4412_v48 }
  0xf0   : > { %v863_v30 = vpop.xlane.xlu0 %862 }
  0xf1   : > { %v867_v31 = vpop.xlane.xlu2 %866  ;;  %v6012_v32 = vmul.f32 %v6006_v21, %v863_v30 }
  0xf2   : > { %v902_v35 = vpop.xlane.xlu1 %901  ;;  %v6033_v59 = vmul.f32 %v6006_v21, %v867_v31 }
  0xf3   : > { %v925_v40 = vmul.f32 %v6012_v32, %v6012_v32  ;;  %v917_v41 = vmul.f32 %v902_v35, %v6006_v21  ;;  %v941_v43 = vsub.f32 %v5926_v8, %v6012_v32 }
  0xf4   : > { %v927_v1 = vmul.f32 %v6033_v59, %v6033_v59 }
  0xf5   : > { %v933_v44 = vsub.f32 %v917_v41, %v925_v40 }
  0xf7   : > { %v949_v52 = vadd.f32 1e-05, %v933_v44 }
  0xf8   : > { %v865_v55 = vpop.xlane.xlu0 %864 }
  0xf9   : > { %v869_v56 = vpop.xlane.xlu2 %868  ;;  %4992 = vrsqrt.f32 %v949_v52  ;;  %v6030_v57 = vmul.f32 %v6006_v21, %v865_v55  ;;  %vm963_vm2 = vweird.f32 %v949_v52 }
  0xfa   : > { %v904_v58 = vpop.xlane.xlu1 %903  ;;  %v6039_v63 = vmul.f32 %v6006_v21, %v869_v56 }
  0xfb   : > { %v926_v60 = vmul.f32 %v6030_v57, %v6030_v57  ;;  %v918_v61 = vmul.f32 %v904_v58, %v6006_v21  ;;  %v942_v55 = vsub.f32 %v5934_v11, %v6030_v57 }
  0xfc   : > { %v928_v6 = vmul.f32 %v6039_v63, %v6039_v63 }
  0xfd   : > { %v934_v62 = vsub.f32 %v918_v61, %v926_v60 }
  0xff   : > { %v4993_v0 = vpop.eup %4992  ;;  %v950_v2 = vadd.f32 1e-05, %v934_v62 }
 0x100   : > { %v958_v3 = vmul.f32 %v4993_v0, %v949_v52  ;;  %v906_v4 = vpop.xlane.xlu0 %905  ;;  %vm964_vm1 = vweird.f32 %v4993_v0  ;;  %v6079_v52 = vld [vmem:[%s657_s17] ss:$0 sm:$0xff]  ;;  %s7444_s17 = scalar_lea.vmem [#allocation8], %s5866_s18 }
 0x101   : > { %v871_v5 = vpop.xlane.xlu2 %870  ;;  %4994 = vrsqrt.f32 %v950_v2  ;;  %v919_v7 = vmul.f32 %v906_v4, %v6006_v21  ;;  %vm965_vm3 = vmor %vm963_vm2, %vm964_vm1  ;;  %vm973_vm5 = vweird.f32 %v950_v2 }
 0x102   : > { %v959_v10 = vmul.f32 %v4993_v0, %v958_v3  ;;  %v908_v13 = vpop.xlane.xlu1 %907  ;;  %v6050_v24 = vmul.f32 %v6006_v21, %v871_v5  ;;  %v6095_v3 = vld [vmem:[%s7444_s17] ss:$0 sm:$0xff] }
 0x103   : > { %v935_v14 = vsub.f32 %v919_v7, %v927_v1  ;;  %v920_v16 = vmul.f32 %v908_v13, %v6006_v21 }
 0x104   : > { %v960_v18 = vmul.f32 0.5, %v959_v10  ;;  %v929_v33 = vmul.f32 %v6050_v24, %v6050_v24 }
 0x105   : > { %v6047_v19 = vadd.f32 1e-05, %v935_v14  ;;  %v936_v23 = vsub.f32 %v920_v16, %v928_v6 }
 0x106   : > { %v961_v26 = vsub.f32 1.5, %v960_v18 }
 0x107   : > { %v4995_v27 = vpop.eup %4994  ;;  %4996 = vrsqrt.f32 %v6047_v19  ;;  %v6053_v28 = vadd.f32 1e-05, %v936_v23  ;;  %vm983_vm11 = vweird.f32 %v6047_v19 }
 0x108   : > { %v962_v29 = vmul.f32 %v4993_v0, %v961_v26  ;;  %v968_v30 = vmul.f32 %v4995_v27, %v950_v2  ;;  %v873_v31 = vpop.xlane.xlu0 %872  ;;  %vm974_vm4 = vweird.f32 %v4995_v27 }
 0x109   : > { %v912_v25 = vpop.xlane.xlu2 %911  ;;  %4998 = vrsqrt.f32 %v6053_v28  ;;  %v6059_v34 = vmul.f32 %v6006_v21, %v873_v31  ;;  %vm975_vm6 = vmor %vm973_vm5, %vm974_vm4  ;;  %vm993_vm7 = vweird.f32 %v6053_v28 }
 0x10a   : > { %v922_v35 = vmul.f32 %v912_v25, %v6006_v21  ;;  %v969_v36 = vmul.f32 %v4995_v27, %v968_v30  ;;  %v910_v37 = vpop.xlane.xlu1 %909  ;;  %v966_v40 = vsel %vm965_vm3, %v4993_v0, %v962_v29 }
 0x10b   : > { %v930_v38 = vmul.f32 %v6059_v34, %v6059_v34  ;;  %v921_v39 = vmul.f32 %v910_v37, %v6006_v21  ;;  %v1037_v51 = vmul.f32 %v966_v40, %v941_v43 }
 0x10c   : > { %v970_v41 = vmul.f32 0.5, %v969_v36 }
 0x10d   : > { %v6065_v42 = vpop.eup %4996  ;;  %v938_v44 = vsub.f32 %v922_v35, %v930_v38  ;;  %v937_v45 = vsub.f32 %v921_v39, %v929_v33  ;;  %v1048_v2 = vmul.f32 %v6079_v52, %v1037_v51  ;;  %v944_v39 = vsub.f32 %v5936_v12, %v6039_v63 }
 0x10e   : > { %v971_v46 = vsub.f32 1.5, %v970_v41  ;;  %v978_v47 = vmul.f32 %v6065_v42, %v6047_v19  ;;  %vm984_vm9 = vweird.f32 %v6065_v42 }
 0x10f   : > { %v6071_v48 = vpop.eup %4998  ;;  %v6073_v49 = vadd.f32 1e-05, %v938_v44  ;;  %v6075_v50 = vadd.f32 1e-05, %v937_v45  ;;  %v1059_v16 = vadd.f32 %v6095_v3, %v1048_v2  ;;  %vm985_vm12 = vmor %vm983_vm11, %vm984_vm9  ;;  %v943_v44 = vsub.f32 %v5928_v9, %v6033_v59 }
 0x110   : > { %v972_v53 = vmul.f32 %v4995_v27, %v971_v46  ;;  %v979_v8 = vmul.f32 %v6065_v42, %v978_v47  ;;  %v988_v32 = vmul.f32 %v6071_v48, %v6053_v28  ;;  %v875_v54 = vpop.xlane.xlu0 %874  ;;  %vm994_vm8 = vweird.f32 %v6071_v48 }
 0x111   : > { %5000 = vrsqrt.f32 %v6073_v49  ;;  %v6088_v56 = vmul.f32 %v6006_v21, %v875_v54  ;;  %v914_v58 = vpop.xlane.xlu2 %913  ;;  %vm6117_vm10 = vmor %vm993_vm7, %vm994_vm8  ;;  %vm1013_vm13 = vweird.f32 %v6073_v49  ;;  %vm1003_vm15 = vweird.f32 %v6075_v50 }
 0x112   : > { %v976_v60 = vsel %vm975_vm6, %v4995_v27, %v972_v53  ;;  %v980_v61 = vmul.f32 0.5, %v979_v8  ;;  %v989_v62 = vmul.f32 %v6071_v48, %v988_v32  ;;  %5002 = vrsqrt.f32 %v6075_v50  ;;  %v877_v0 = vpop.xlane.xlu1 %876 }
 0x113   : > { %v1038_v1 = vmul.f32 %v976_v60, %v942_v55  ;;  %v931_v11 = vmul.f32 %v6088_v56, %v6088_v56  ;;  %v6100_v5 = vmul.f32 %v6006_v21, %v877_v0  ;;  %v923_v6 = vmul.f32 %v914_v58, %v6006_v21 }
 0x114   : > { %v981_v57 = vsub.f32 1.5, %v980_v61  ;;  %v990_v4 = vmul.f32 0.5, %v989_v62  ;;  %v945_v55 = vsub.f32 %v5944_v15, %v6050_v24  ;;  %vm1360_vm9 = vcmask 261120  }
 0x115   : > { %v1049_v7 = vmul.f32 %v6079_v52, %v1038_v1  ;;  %v939_v13 = vsub.f32 %v923_v6, %v931_v11  ;;  %v932_v28 = vmul.f32 %v6100_v5, %v6100_v5  ;;  %vm2692_vm11 = vcmask 523264  }
 0x116   : > { %v991_v10 = vsub.f32 1.5, %v990_v4  ;;  %v982_v26 = vmul.f32 %v6065_v42, %v981_v57 }
 0x117   : > { %v6106_v14 = vpop.eup %5000  ;;  %v1060_v18 = vadd.f32 %v6095_v3, %v1049_v7  ;;  %v6122_v35 = vadd.f32 1e-05, %v939_v13 }
 0x118   : > { %v5003_v23 = vpop.eup %5002  ;;  %v992_v27 = vmul.f32 %v6071_v48, %v991_v10  ;;  %v1008_v29 = vmul.f32 %v6106_v14, %v6073_v49  ;;  %v916_v30 = vpop.xlane.xlu0 %915  ;;  %v986_v19 = vsel %vm985_vm12, %v6065_v42, %v982_v26  ;;  %vm1014_vm14 = vweird.f32 %v6106_v14 }
 0x119   : > { %v998_v25 = vmul.f32 %v5003_v23, %v6075_v50  ;;  %v1067_v33 = vpack.c.bf16 %v1060_v18, %v1059_v16  ;;  %v924_v38 = vmul.f32 %v916_v30, %v6006_v21  ;;  %5004 = vrsqrt.f32 %v6122_v35  ;;  %vm6144_vm1 = vmor %vm1013_vm13, %vm1014_vm14 }
 0x11a   : > { %v996_v36 = vsel %vm6117_vm10, %v6071_v48, %v992_v27  ;;  %v1009_v37 = vmul.f32 %v6106_v14, %v1008_v29  ;;  %v1039_v12 = vmul.f32 %v986_v19, %v943_v44  ;;  %vm1004_vm0 = vweird.f32 %v5003_v23 }
 0x11b   : > { %v999_v40 = vmul.f32 %v5003_v23, %v998_v25  ;;  %1247 = vmatmul.bf16.vlgmr.msra.gmra.mxu0 %v1067_v33  ;;  %1276 = vmatmul.bf16.vlgmr.msra.gmra.mxu1 %v1067_v33  ;;  %v940_v43 = vsub.f32 %v924_v38, %v932_v28  ;;  %v1040_v46 = vmul.f32 %v996_v36, %v944_v39  ;;  %vm1005_vm2 = vmor %vm1003_vm15, %vm1004_vm0  ;;  %vm1023_vm3 = vweird.f32 %v6122_v35 }
 0x11c   : > { %v1010_v41 = vmul.f32 0.5, %v1009_v37  ;;  %1305 = vmatmul.bf16.vlgmr.msra.gmra.mxu2 %v1067_v33  ;;  %v1050_v53 = vmul.f32 %v6079_v52, %v1039_v12  ;;  %v946_v50 = vsub.f32 %v5949_v17, %v6059_v34  ;;  %v947_v16 = vsub.f32 %v5956_v20, %v6088_v56 }
 0x11d   : > { %v1000_v45 = vmul.f32 0.5, %v999_v40  ;;  %v956_v47 = vadd.f32 1e-05, %v940_v43  ;;  %v1051_v42 = vmul.f32 %v6079_v52, %v1040_v46  ;;  %v948_v18 = vsub.f32 %v5960_v22, %v6100_v5  ;;  %v1103_v22 = vld [vmem:[%s5883_s20] sm:$0x7]  ;;  %s5605_s20 = smov 64  }
 0x11e   : > { %v1011_v63 = vsub.f32 1.5, %v1010_v41  ;;  %v1061_v60 = vadd.f32 %v6095_v3, %v1050_v53  ;;  %vm1479_vm10 = vcmask 130048   ;;  %vm2701_vm12 = vcmask 785408  }
 0x11f   : > { %v1001_v48 = vsub.f32 1.5, %v1000_v45  ;;  %5006 = vrsqrt.f32 %v956_v47  ;;  %v5005_v51 = vpop.eup %5004  ;;  %v1062_v49 = vadd.f32 %v6095_v3, %v1051_v42  ;;  %vm1033_vm5 = vweird.f32 %v956_v47 }
 0x120   : > { %v1012_v9 = vmul.f32 %v6106_v14, %v1011_v63  ;;  %v1018_v32 = vmul.f32 %v5005_v51, %v6122_v35  ;;  %vm1024_vm4 = vweird.f32 %v5005_v51  ;;  %v6172_v35 = vperm.slane %v1103_v22, 1 }
 0x121   : > { %v1002_v8 = vmul.f32 %v5003_v23, %v1001_v48  ;;  %v1068_v2 = vpack.c.bf16 %v1062_v49, %v1061_v60  ;;  %vm1025_vm7 = vmor %vm1023_vm3, %vm1024_vm4 }
 0x122   : > { %v1016_v61 = vsel %vm6144_vm1, %v6106_v14, %v1012_v9  ;;  %v1019_v0 = vmul.f32 %v5005_v51, %v1018_v32 }
 0x123   : > { %v1006_v62 = vsel %vm1005_vm2, %v5003_v23, %v1002_v8  ;;  %v1042_v57 = vmul.f32 %v1016_v61, %v946_v50 }
 0x124   : > { %v1041_v11 = vmul.f32 %v1006_v62, %v945_v55  ;;  %v1020_v4 = vmul.f32 0.5, %v1019_v0 }
 0x125   : > { %v5007_v54 = vpop.eup %5006  ;;  %v1053_v24 = vmul.f32 %v6079_v52, %v1042_v57 }
 0x126   : > { %v1028_v58 = vmul.f32 %v5007_v54, %v956_v47  ;;  %v1052_v17 = vmul.f32 %v6079_v52, %v1041_v11  ;;  %v1021_v34 = vsub.f32 1.5, %v1020_v4  ;;  %vm1034_vm6 = vweird.f32 %v5007_v54 }
 0x127   : > { %v1064_v10 = vadd.f32 %v6095_v3, %v1053_v24  ;;  %vm1035_vm8 = vmor %vm1033_vm5, %vm1034_vm6 }
 0x128   : > { %v1029_v1 = vmul.f32 %v5007_v54, %v1028_v58  ;;  %v1063_v7 = vadd.f32 %v6095_v3, %v1052_v17  ;;  %v1022_v13 = vmul.f32 %v5005_v51, %v1021_v34 }
 0x12a   : > { %v1030_v15 = vmul.f32 0.5, %v1029_v1  ;;  %v1069_v23 = vpack.c.bf16 %v1064_v10, %v1063_v7  ;;  %v1026_v26 = vsel %vm1025_vm7, %v5005_v51, %v1022_v13 }
 0x12b   : > { %1252 = vmatmul.bf16.gmra.mxu0 %v1068_v2  ;;  %1281 = vmatmul.bf16.gmra.mxu1 %v1068_v2  ;;  %v1043_v29 = vmul.f32 %v1026_v26, %v947_v16 }
 0x12c   : > { %1310 = vmatmul.bf16.gmra.mxu2 %v1068_v2  ;;  %v1031_v6 = vsub.f32 1.5, %v1030_v15 }
 0x12d   : > { %v1054_v30 = vmul.f32 %v6079_v52, %v1043_v29 }
 0x12e   : > { %v1032_v14 = vmul.f32 %v5007_v54, %v1031_v6 }
 0x12f   : > { %v1065_v25 = vadd.f32 %v6095_v3, %v1054_v30 }
 0x130   : > { %v1036_v27 = vsel %vm1035_vm8, %v5007_v54, %v1032_v14 }
 0x131   : > { %v1044_v28 = vmul.f32 %v1036_v27, %v948_v18  ;;  %v1107_v27 = vperm.slane %v1103_v22, 2 }
 0x133   : > { %v1055_v31 = vmul.f32 %v6079_v52, %v1044_v28  ;;  %v6177_v52 = vperm.slane %v1103_v22, 0 }
 0x135   : > { %v1066_v20 = vadd.f32 %v6095_v3, %v1055_v31 }
 0x137   : > { %v1070_v56 = vpack.c.bf16 %v1066_v20, %v1065_v25 }
 0x13b   : > { %1286 = vmatmul.bf16.gmra.mxu1 %v1069_v23  ;;  %1257 = vmatmul.bf16.gmra.mxu0 %v1069_v23 }
 0x13c   : > { %1315 = vmatmul.bf16.gmra.mxu2 %v1069_v23 }
 0x14b   : > { %1291 = vmatmul.bf16.gmra.mxu1 %v1070_v56  ;;  %1262 = vmatmul.bf16.gmra.mxu0 %v1070_v56 }
 0x14c   : > { %1320 = vmatmul.bf16.gmra.mxu2 %v1070_v56 }
 0x198   : > { %v1248_v5 = vpop.f32.mrf.mxu0  ;;  %v1277_v33 = vpop.f32.mrf.mxu1 }
 0x199   : > { %v1278_v36 = vadd.f32 %v1277_v33, %v6172_v35  ;;  %v1249_v43 = vadd.f32 %v1248_v5, %v6177_v52 }
 0x19b   : > { %v1334_v40 = vpack.c.bf16 %v1278_v36, %v1278_v36  ;;  %v1326_v51 = vpack.c.bf16 %v1249_v43, %v1249_v43 }
 0x19d   : > { %v1357_v44 = vunpack.c.l.b16 %v1334_v40  ;;  %v1352_v9 = vunpack.c.l.b16 %v1326_v51 }
 0x19f   : > { %v6175_v37 = vpop.f32.mrf.mxu2 }
 0x1a0   : > { %v1250_v38 = vpop.f32.mrf.mxu0  ;;  %v1279_v39 = vpop.f32.mrf.mxu1 }
 0x1a1   : > { %v1280_v3 = vadd.f32 %v1279_v39, %v6172_v35  ;;  %v1251_v19 = vadd.f32 %v1250_v38, %v6177_v52 }
 0x1a3   : > { %v1335_v41 = vpack.c.bf16 %v1280_v3, %v1280_v3  ;;  %v1327_v46 = vpack.c.bf16 %v1251_v19, %v1251_v19 }
 0x1a5   : > { %v1358_v45 = vunpack.c.l.b16 %v1335_v41  ;;  %v1353_v53 = vunpack.c.l.b16 %v1327_v46  ;;  %v1307_v46 = vadd.f32 %v6175_v37, %v1107_v27 }
 0x1a7   : > { %v6182_v47 = vpack.c.b16 %v1358_v45, %v1357_v44  ;;  %v1308_v12 = vpop.f32.mrf.mxu2  ;;  %v6187_v8 = vpack.c.b16 %v1353_v53, %v1352_v9 }
 0x1a8   : > { %v1253_v63 = vpop.f32.mrf.mxu0  ;;  %v1282_v48 = vpop.f32.mrf.mxu1  ;;  %v1309_v41 = vadd.f32 %v1308_v12, %v1107_v27 }
 0x1a9   : > { %v1365_v42 = vsel %vm1360_vm9, %v6182_v47, 0  ;;  %v1283_v59 = vadd.f32 %v1282_v48, %v6172_v35  ;;  %v1254_v61 = vadd.f32 %v1253_v63, %v6177_v52 }
 0x1aa   : > { %1374 = vmatpush.bf16.xpose.msrb.mxu0 %v1365_v42  ;;  %v1343_v51 = vpack.c.bf16 %v1309_v41, %v1309_v41 }
 0x1ab   : > { %v1336_v55 = vpack.c.bf16 %v1283_v59, %v1283_v59  ;;  %v1328_v4 = vpack.c.bf16 %v1254_v61, %v1254_v61 }
 0x1ad   : > { %v1388_v62 = vunpack.c.l.b16 %v1336_v55  ;;  %v1383_v6 = vunpack.c.l.b16 %v1328_v4 }
 0x1af   : > { %v6189_v32 = vpop.f32.mrf.mxu2 }
 0x1b0   : > { %v1255_v49 = vpop.f32.mrf.mxu0  ;;  %v1284_v54 = vpop.f32.mrf.mxu1 }
 0x1b1   : > { %v1285_v50 = vadd.f32 %v1284_v54, %v6172_v35  ;;  %4505 = vmatmul.msk.bf16.vlgmr.msrb.gmra.mxu0 %vm1360_vm9, %v6187_v8  ;;  %v1256_v58 = vadd.f32 %v1255_v49, %v6177_v52  ;;  %v1342_v54 = vpack.c.bf16 %v1307_v46, %v1307_v46 }
 0x1b3   : > { %v1337_v60 = vpack.c.bf16 %v1285_v50, %v1285_v50  ;;  %v1329_v1 = vpack.c.bf16 %v1256_v58, %v1256_v58  ;;  %v1584_v58 = vunpack.c.l.b16 %v1343_v51 }
 0x1b5   : > { %v1389_v0 = vunpack.c.l.b16 %v1337_v60  ;;  %v1384_v24 = vunpack.c.l.b16 %v1329_v1 }
 0x1b7   : > { %v6196_v2 = vpack.c.b16 %v1389_v0, %v1388_v62  ;;  %v1313_v17 = vpop.f32.mrf.mxu2  ;;  %v6201_v7 = vpack.c.b16 %v1384_v24, %v1383_v6 }
 0x1b8   : > { %v1287_v11 = vpop.f32.mrf.mxu1  ;;  %v1258_v57 = vpop.f32.mrf.mxu0  ;;  %v1314_v60 = vadd.f32 %v1313_v17, %v1107_v27 }
 0x1b9   : > { %v1395_v15 = vsel %vm1360_vm9, %v6196_v2, 0  ;;  %v1288_v34 = vadd.f32 %v1287_v11, %v6172_v35  ;;  %v1259_v16 = vadd.f32 %v1258_v57, %v6177_v52  ;;  %v1312_v11 = vadd.f32 %v6189_v32, %v1107_v27 }
 0x1ba   : > { %1404 = vmatpush.bf16.xpose.msra.mxu3 %v1395_v15  ;;  %v1345_v4 = vpack.c.bf16 %v1314_v60, %v1314_v60 }
 0x1bb   : > { %v1338_v10 = vpack.c.bf16 %v1288_v34, %v1288_v34  ;;  %v1330_v30 = vpack.c.bf16 %v1259_v16, %v1259_v16 }
 0x1bd   : > { %v1418_v29 = vunpack.c.l.b16 %v1338_v10  ;;  %v1413_v36 = vunpack.c.l.b16 %v1330_v30  ;;  %v1344_v10 = vpack.c.bf16 %v1312_v11, %v1312_v11 }
 0x1bf   : > { %v1316_v26 = vpop.f32.mrf.mxu2 }
 0x1c0   : > { %v1289_v13 = vpop.f32.mrf.mxu1  ;;  %v1260_v14 = vpop.f32.mrf.mxu0  ;;  %v1317_v20 = vadd.f32 %v1316_v26, %v1107_v27 }
 0x1c1   : > { %v1290_v18 = vadd.f32 %v1289_v13, %v6172_v35  ;;  %4506 = vmatmul.msk.bf16.vlgmr.msra.gmra.mxu3 %vm1360_vm9, %v6201_v7  ;;  %v1261_v23 = vadd.f32 %v1260_v14, %v6177_v52  ;;  %v1612_v14 = vunpack.c.l.b16 %v1345_v4 }
 0x1c2   : > { %v1346_v40 = vpack.c.bf16 %v1317_v20, %v1317_v20 }
 0x1c3   : > { %v1339_v28 = vpack.c.bf16 %v1290_v18, %v1290_v18  ;;  %v1331_v25 = vpack.c.bf16 %v1261_v23, %v1261_v23  ;;  %v1611_v23 = vunpack.c.l.b16 %v1344_v10 }
 0x1c4   : > { %v1639_v44 = vunpack.c.l.b16 %v1346_v40 }
 0x1c5   : > { %v1419_v31 = vunpack.c.l.b16 %v1339_v28  ;;  %v1414_v38 = vunpack.c.l.b16 %v1331_v25 }
 0x1c7   : > { %v6208_v56 = vpack.c.b16 %v1419_v31, %v1418_v29  ;;  %v1318_v3 = vpop.f32.mrf.mxu2  ;;  %v6213_v43 = vpack.c.b16 %v1414_v38, %v1413_v36  ;;  %v6234_v29 = vpack.c.b16 %v1612_v14, %v1611_v23 }
 0x1c8   : > { %v1292_v5 = vpop.f32.mrf.mxu1  ;;  %v1263_v33 = vpop.f32.mrf.mxu0  ;;  %v1319_v19 = vadd.f32 %v1318_v3, %v1107_v27 }
 0x1c9   : > { %v1425_v39 = vsel %vm1360_vm9, %v6208_v56, 0  ;;  %v1293_v22 = vadd.f32 %v1292_v5, %v6172_v35  ;;  %v1264_v9 = vadd.f32 %v1263_v33, %v6177_v52 }
 0x1ca   : > { %1434 = vmatpush.bf16.xpose.msrb.mxu3 %v1425_v39  ;;  %v1347_v45 = vpack.c.bf16 %v1319_v19, %v1319_v19 }
 0x1cb   : > { %v1340_v63 = vpack.c.bf16 %v1293_v22, %v1293_v22  ;;  %v1332_v61 = vpack.c.bf16 %v1264_v9, %v1264_v9 }
 0x1cc   : > { %v1640_v48 = vunpack.c.l.b16 %v1347_v45 }
 0x1cd   : > { %v1448_v50 = vunpack.c.l.b16 %v1340_v63  ;;  %v1443_v15 = vunpack.c.l.b16 %v1332_v61 }
 0x1ce   : > { %v6221_v49 = vpack.c.b16 %v1640_v48, %v1639_v44 }
 0x1cf   : > { %v1321_v55 = vpop.f32.mrf.mxu2 }
 0x1d0   : > { %v1294_v42 = vpop.f32.mrf.mxu1  ;;  %v1265_v53 = vpop.f32.mrf.mxu0  ;;  %1653 = vmatpush.bf16.msra.mxu0 %v6221_v49  ;;  %v1322_v1 = vadd.f32 %v1321_v55, %v1107_v27 }
 0x1d1   : > { %v1295_v59 = vadd.f32 %v1294_v42, %v6172_v35  ;;  %4507 = vmatmul.msk.bf16.vlgmr.msrb.gmra.mxu3 %vm1360_vm9, %v6213_v43  ;;  %v1266_v12 = vadd.f32 %v1265_v53, %v6177_v52  ;;  %v1583_v35 = vunpack.c.l.b16 %v1342_v54 }
 0x1d2   : > { %v1348_v6 = vpack.c.bf16 %v1322_v1, %v1322_v1 }
 0x1d3   : > { %v1341_v37 = vpack.c.bf16 %v1295_v59, %v1295_v59  ;;  %v1333_v0 = vpack.c.bf16 %v1266_v12, %v1266_v12  ;;  %v6227_v52 = vpack.c.b16 %v1584_v58, %v1583_v35 }
 0x1d4   : > { %v1667_v32 = vunpack.c.l.b16 %v1348_v6 }
 0x1d5   : > { %v1449_v62 = vunpack.c.l.b16 %v1341_v37  ;;  %v1444_v24 = vunpack.c.l.b16 %v1333_v0 }
 0x1d7   : > { %v6225_v57 = vpack.c.b16 %v1449_v62, %v1448_v50  ;;  %v1323_v17 = vpop.f32.mrf.mxu2  ;;  %v6232_v16 = vpack.c.b16 %v1444_v24, %v1443_v15 }
 0x1d8   : > { %v1324_v13 = vadd.f32 %v1323_v17, %v1107_v27 }
 0x1d9   : > { %v1455_v34 = vsel %vm1360_vm9, %v6225_v57, 0 }
 0x1da   : > { %1464 = vmatpush.bf16.xpose.msra.mxu3 %v1455_v34  ;;  %v1349_v18 = vpack.c.bf16 %v1324_v13, %v1324_v13 }
 0x1dc   : > { %v1668_v26 = vunpack.c.l.b16 %v1349_v18 }
 0x1de   : > { %v6238_v28 = vpack.c.b16 %v1668_v26, %v1667_v32 }
 0x1e0   : > { %1681 = vmatpush.bf16.msrb.mxu1 %v6238_v28 }
 0x1e1   : > { %4508 = vmatmul.msk.bf16.vlgmr.msra.gmra.mxu3 %vm1360_vm9, %v6232_v16 }
 0x1e2   : > { %1597 = vmatpush.bf16.msrb.mxu3 %v6227_v52 }
 0x1e6   : > { %1625 = vmatpush.bf16.msra.mxu3 %v6234_v29 }
 0x22e   : > { %v1376_v30 = vpop.f32.mrf.mxu0 }
 0x22f   : > { %v1471_v27 = vmul.f32 0.17677669, %v1376_v30 }
 0x231   : > { %v1480_v31 = vsel %vm1479_vm10, %v1471_v27, -inf }
 0x232   : > { %1481 = vmax.xlane.f32.xlu1 %v1480_v31 }
 0x236   : > { %v1378_v25 = vpop.f32.mrf.mxu0 }
 0x237   : > { %v1472_v20 = vmul.f32 0.17677669, %v1378_v25 }
 0x239   : > { %v1483_v5 = vsel %vm1479_vm10, %v1472_v20, -inf }
 0x23a   : > { %1484 = vmax.xlane.f32.xlu2 %v1483_v5 }
 0x244   : > { %v1406_v33 = vpop.f32.mrf.mxu3 }
 0x245   : > { %v1473_v36 = vmul.f32 0.17677669, %v1406_v33 }
 0x247   : > { %v1486_v38 = vsel %vm1479_vm10, %v1473_v36, -inf }
 0x248   : > { %1487 = vmax.xlane.f32.xlu0 %v1486_v38 }
 0x24c   : > { %v1408_v39 = vpop.f32.mrf.mxu3 }
 0x24d   : > { %v1474_v40 = vmul.f32 0.17677669, %v1408_v39 }
 0x24f   : > { %v1489_v3 = vsel %vm1479_vm10, %v1474_v40, -inf }
 0x250   : > { %1490 = vmax.xlane.f32.xlu1 %v1489_v3 }
 0x254   : > { %v1436_v22 = vpop.f32.mrf.mxu3 }
 0x255   : > { %v1475_v19 = vmul.f32 0.17677669, %v1436_v22 }
 0x257   : > { %v1492_v41 = vsel %vm1479_vm10, %v1475_v19, -inf }
 0x258   : > { %1493 = vmax.xlane.f32.xlu1 %v1492_v41 }
 0x25c   : > { %v1438_v44 = vpop.f32.mrf.mxu3 }
 0x25d   : > { %v1476_v45 = vmul.f32 0.17677669, %v1438_v44 }
 0x25f   : > { %v1495_v46 = vsel %vm1479_vm10, %v1476_v45, -inf }
 0x260   : > { %1496 = vmax.xlane.f32.xlu2 %v1495_v46 }
 0x264   : > { %v1466_v63 = vpop.f32.mrf.mxu3 }
 0x265   : > { %v1477_v48 = vmul.f32 0.17677669, %v1466_v63 }
 0x267   : > { %v1498_v51 = vsel %vm1479_vm10, %v1477_v48, -inf }
 0x268   : > { %1499 = vmax.xlane.f32.xlu2 %v1498_v51 }
 0x26c   : > { %v1468_v42 = vpop.f32.mrf.mxu3 }
 0x26d   : > { %v1478_v53 = vmul.f32 0.17677669, %v1468_v42 }
 0x26f   : > { %v1501_v9 = vsel %vm1479_vm10, %v1478_v53, -inf }
 0x270   : > { %1502 = vmax.xlane.f32.xlu0 %v1501_v9 }
 0x2a5   : > { %v1482_v59 = vpop.xlane.xlu1 %1481 }
 0x2a6   : > { %v1504_v12 = vsub.f32 %v1471_v27, %v1482_v59 }
 0x2a8   : > { %v1512_v54 = vmul.f32 1.442695, %v1504_v12 }
 0x2aa   : > { %5008 = vpow2.f32 %v1512_v54 }
 0x2ad   : > { %v1485_v55 = vpop.xlane.xlu2 %1484 }
 0x2ae   : > { %v1505_v50 = vsub.f32 %v1472_v20, %v1485_v55 }
 0x2b0   : > { %v6250_v37 = vpop.eup %5008  ;;  %v1514_v58 = vmul.f32 1.442695, %v1505_v50 }
 0x2b1   : > { %v1528_v60 = vsel %vm1479_vm10, %v6250_v37, 0.0 }
 0x2b2   : > { %5010 = vpow2.f32 %v1514_v58  ;;  %1529 = vadd.xlane.f32.xlu2 %v1528_v60 }
 0x2b8   : > { %v5011_v61 = vpop.eup %5010 }
 0x2b9   : > { %v1531_v62 = vsel %vm1479_vm10, %v5011_v61, 0.0 }
 0x2ba   : > { %1532 = vadd.xlane.f32.xlu0 %v1531_v62 }
 0x2bb   : > { %v1488_v0 = vpop.xlane.xlu0 %1487 }
 0x2bc   : > { %v1506_v1 = vsub.f32 %v1473_v36, %v1488_v0 }
 0x2be   : > { %v1516_v35 = vmul.f32 1.442695, %v1506_v1 }
 0x2c0   : > { %5012 = vpow2.f32 %v1516_v35 }
 0x2c3   : > { %v1491_v11 = vpop.xlane.xlu1 %1490 }
 0x2c4   : > { %v1507_v4 = vsub.f32 %v1474_v40, %v1491_v11 }
 0x2c6   : > { %v6255_v15 = vpop.eup %5012  ;;  %v1518_v24 = vmul.f32 1.442695, %v1507_v4 }
 0x2c7   : > { %v1534_v34 = vsel %vm1479_vm10, %v6255_v15, 0.0 }
 0x2c8   : > { %5014 = vpow2.f32 %v1518_v24  ;;  %1535 = vadd.xlane.f32.xlu0 %v1534_v34 }
 0x2ca   : > { %1688 = vrot.lane.b32.xlu2 %v6187_v8, %s5604_s1 }
 0x2cb   : > { %v1494_v27 = vpop.xlane.xlu1 %1493 }
 0x2cc   : > { %v1508_v31 = vsub.f32 %v1475_v19, %v1494_v27 }
 0x2ce   : > { %v5015_v6 = vpop.eup %5014  ;;  %v1520_v20 = vmul.f32 1.442695, %v1508_v31 }
 0x2cf   : > { %v1537_v10 = vsel %vm1479_vm10, %v5015_v6, 0.0 }
 0x2d0   : > { %1538 = vadd.xlane.f32.xlu1 %v1537_v10 }
 0x2d2   : > { %1712 = vrot.lane.b32.xlu2 %v6201_v7, %s5604_s1 }
 0x2d3   : > { %v1497_v17 = vpop.xlane.xlu2 %1496 }
 0x2d4   : > { %v1509_v18 = vsub.f32 %v1476_v45, %v1497_v17 }
 0x2d6   : > { %v1522_v26 = vmul.f32 1.442695, %v1509_v18 }
 0x2db   : > { %v1500_v13 = vpop.xlane.xlu2 %1499 }
 0x2dc   : > { %1714 = vrot.lane.b32.xlu0 %v6196_v2, %s5604_s1  ;;  %v1510_v14 = vsub.f32 %v1477_v48, %v1500_v13 }
 0x2de   : > { %v1524_v32 = vmul.f32 1.442695, %v1510_v14 }
 0x2e0   : > { %5016 = vpow2.f32 %v1524_v32 }
 0x2e1   : > { %5018 = vpow2.f32 %v1522_v26 }
 0x2e2   : > { %5020 = vpow2.f32 %v1520_v20 }
 0x2e3   : > { %v1503_v33 = vpop.xlane.xlu0 %1502 }
 0x2e4   : > { %v1511_v36 = vsub.f32 %v1478_v53, %v1503_v33 }
 0x2e6   : > { %v6268_v23 = vpop.eup %5016  ;;  %v1526_v38 = vmul.f32 1.442695, %v1511_v36 }
 0x2e7   : > { %v1546_v30 = vsel %vm1479_vm10, %v6268_v23, 0.0  ;;  %v6272_v25 = vpop.eup %5018 }
 0x2e8   : > { %v1543_v5 = vsel %vm1479_vm10, %v6272_v25, 0.0  ;;  %v5021_v39 = vpop.eup %5020  ;;  %5022 = vpow2.f32 %v1526_v38 }
 0x2e9   : > { %1690 = vrot.lane.b32.xlu1 %v6182_v47, %s5604_s1  ;;  %v1540_v40 = vsel %vm1479_vm10, %v5021_v39, 0.0 }
 0x2ee   : > { %v6279_v3 = vpop.eup %5022 }
 0x2ef   : > { %v1549_v22 = vsel %vm1479_vm10, %v6279_v3, 0.0 }
 0x2fb   : > { %1547 = vadd.xlane.f32.xlu2 %v1546_v30 }
 0x306   : > { %1544 = vadd.xlane.f32.xlu0 %v1543_v5 }
 0x313   : > { %1541 = vadd.xlane.f32.xlu1 %v1540_v40  ;;  %1736 = vrot.lane.b32.xlu2 %v6213_v43, %s5604_s1 }
 0x31a   : > { %1738 = vrot.lane.b32.xlu0 %v6208_v56, %s5604_s1 }
 0x31b   : > { %1550 = vadd.xlane.f32.xlu1 %v1549_v22 }
 0x322   : > { %1760 = vrot.lane.b32.xlu0 %v6232_v16, %s5604_s1 }
 0x325   : > { %v1530_v19 = vpop.xlane.xlu2 %1529 }
 0x326   : > { %5024 = vrcp.f32 %v1530_v19 }
 0x32c   : > { %v5025_v44 = vpop.eup %5024 }
 0x32d   : > { %v1533_v41 = vpop.xlane.xlu0 %1532  ;;  %v1560_v45 = vmul.f32 %v5025_v44, %v6250_v37  ;;  %v1689_v11 = vpop.permute.xlu2 %1688 }
 0x32e   : > { %5026 = vrcp.f32 %v1533_v41 }
 0x32f   : > { %v1568_v63 = vpack.c.bf16 %v1560_v45, %v1560_v45 }
 0x331   : > { %v1578_v42 = vunpack.c.l.b16 %v1568_v63 }
 0x334   : > { %v5027_v46 = vpop.eup %5026  ;;  %1762 = vrot.lane.b32.xlu1 %v6225_v57, %s5604_s1 }
 0x335   : > { %v1561_v48 = vmul.f32 %v5027_v46, %v5011_v61  ;;  %v1713_v34 = vpop.permute.xlu2 %1712 }
 0x337   : > { %v1569_v51 = vpack.c.bf16 %v1561_v48, %v1561_v48 }
 0x339   : > { %v1579_v53 = vunpack.c.l.b16 %v1569_v51 }
 0x33b   : > { %v1580_v9 = vpack.c.b16 %v1579_v53, %v1578_v42  ;;  %v1536_v59 = vpop.xlane.xlu0 %1535 }
 0x33c   : > { %1893 = vrot.lane.b32.xlu1 %v6227_v52, %s5604_s1  ;;  %5028 = vrcp.f32 %v1536_v59 }
 0x33d   : > { %4509 = vmatmul.msk.bf16.vlgmr.msrb.gmra.mxu3 %vm1479_vm10, %v1580_v9 }
 0x342   : > { %v5029_v54 = vpop.eup %5028 }
 0x343   : > { %v1539_v12 = vpop.xlane.xlu1 %1538  ;;  %v1562_v55 = vmul.f32 %v5029_v54, %v6255_v15 }
 0x344   : > { %5030 = vrcp.f32 %v1539_v12 }
 0x345   : > { %v1570_v37 = vpack.c.bf16 %v1562_v55, %v1562_v55 }
 0x347   : > { %v1606_v62 = vunpack.c.l.b16 %v1570_v37 }
 0x34a   : > { %v5031_v50 = vpop.eup %5030 }
 0x34b   : > { %v1563_v58 = vmul.f32 %v5031_v50, %v5015_v6 }
 0x34d   : > { %v1571_v60 = vpack.c.bf16 %v1563_v58, %v1563_v58 }
 0x34e   : > { %v1715_v61 = vpop.permute.xlu0 %1714 }
 0x34f   : > { %v1607_v0 = vunpack.c.l.b16 %v1571_v60  ;;  %v1720_v1 = vsel %vm1360_vm9, %v1715_v61, 0 }
 0x350   : > { %1729 = vmatpush.bf16.xpose.msrb.mxu3 %v1720_v1 }
 0x351   : > { %v1608_v35 = vpack.c.b16 %v1607_v0, %v1606_v62 }
 0x353   : > { %4510 = vmatmul.msk.bf16.vlgmr.msra.gmra.mxu3 %vm1479_vm10, %v1608_v35 }
 0x35b   : > { %v1691_v4 = vpop.permute.xlu1 %1690 }
 0x35c   : > { %v1696_v24 = vsel %vm1360_vm9, %v1691_v4, 0 }
 0x35d   : > { %1705 = vmatpush.bf16.xpose.msrb.mxu2 %v1696_v24 }
 0x363   : > { %4514 = vmatmul.msk.bf16.vlgmr.msrb.gmra.mxu3 %vm1360_vm9, %v1713_v34 }
 0x364   : > { %4513 = vmatmul.msk.bf16.vlgmr.msrb.gmra.mxu2 %vm1360_vm9, %v1689_v11 }
 0x36e   : > { %v1548_v6 = vpop.xlane.xlu2 %1547 }
 0x376   : > { %v1737_v45 = vpop.permute.xlu2 %1736 }
 0x379   : > { %v1545_v15 = vpop.xlane.xlu0 %1544 }
 0x37a   : > { %5032 = vrcp.f32 %v1545_v15 }
 0x380   : > { %v5033_v17 = vpop.eup %5032 }
 0x381   : > { %v1565_v13 = vmul.f32 %v5033_v17, %v6272_v25 }
 0x383   : > { %v1573_v26 = vpack.c.bf16 %v1565_v13, %v1565_v13 }
 0x385   : > { %v1635_v33 = vunpack.c.l.b16 %v1573_v26 }
 0x386   : > { %v1542_v10 = vpop.xlane.xlu1 %1541 }
 0x387   : > { %5034 = vrcp.f32 %v1542_v10 }
 0x388   : > { %5036 = vrcp.f32 %v1548_v6 }
 0x38c   : > { %v1739_v14 = vpop.permute.xlu0 %1738 }
 0x38d   : > { %v5035_v32 = vpop.eup %5034  ;;  %v1744_v18 = vsel %vm1360_vm9, %v1739_v14, 0 }
 0x38e   : > { %v1564_v30 = vmul.f32 %v5035_v32, %v5021_v39  ;;  %v1551_v27 = vpop.xlane.xlu1 %1550  ;;  %1753 = vmatpush.bf16.xpose.msrb.mxu0 %v1744_v18  ;;  %v5037_v31 = vpop.eup %5036 }
 0x38f   : > { %5038 = vrcp.f32 %v1551_v27  ;;  %v1566_v5 = vmul.f32 %v5037_v31, %v6268_v23 }
 0x390   : > { %v1572_v20 = vpack.c.bf16 %v1564_v30, %v1564_v30 }
 0x391   : > { %v1574_v22 = vpack.c.bf16 %v1566_v5, %v1566_v5 }
 0x392   : > { %v1634_v36 = vunpack.c.l.b16 %v1572_v20 }
 0x393   : > { %v1662_v41 = vunpack.c.l.b16 %v1574_v22 }
 0x394   : > { %v1636_v38 = vpack.c.b16 %v1635_v33, %v1634_v36  ;;  %v1761_v63 = vpop.permute.xlu0 %1760 }
 0x395   : > { %v5039_v40 = vpop.eup %5038 }
 0x396   : > { %v1567_v25 = vmul.f32 %v5039_v40, %v6279_v3  ;;  %4511 = vmatmul.msk.bf16.vlgmr.msra.gmra.mxu0 %vm1479_vm10, %v1636_v38 }
 0x398   : > { %v1575_v19 = vpack.c.bf16 %v1567_v25, %v1567_v25 }
 0x39a   : > { %v1663_v44 = vunpack.c.l.b16 %v1575_v19 }
 0x39c   : > { %v1664_v39 = vpack.c.b16 %v1663_v44, %v1662_v41 }
 0x39e   : > { %4512 = vmatmul.msk.bf16.vlgmr.msrb.gmra.mxu1 %vm1479_vm10, %v1664_v39 }
 0x3a6   : > { %v1763_v46 = vpop.permute.xlu1 %1762  ;;  %4515 = vmatmul.msk.bf16.vlgmr.msrb.gmra.mxu0 %vm1360_vm9, %v1737_v45 }
 0x3a7   : > { %v1768_v23 = vsel %vm1360_vm9, %v1763_v46, 0 }
 0x3a8   : > { %1777 = vmatpush.bf16.xpose.msra.mxu1 %v1768_v23 }
 0x3ae   : > { %v1894_v48 = vpop.permute.xlu1 %1893 }
 0x3af   : > { %4516 = vmatmul.msk.bf16.vlgmr.msra.gmra.mxu1 %vm1360_vm9, %v1761_v63  ;;  %1906 = vmatpush.bf16.msra.mxu2 %v1894_v48 }
 0x3c0   : > { %v6308_v3 = vpop.f32.mrf.mxu3 }
 0x3c8   : > { %v6310_v51 = vpop.f32.mrf.mxu3 }
 0x3d6   : > { %v6312_v42 = vpop.f32.mrf.mxu3 }
 0x3de   : > { %v6314_v53 = vpop.f32.mrf.mxu3 }
 0x3e6   : > { %v1731_v9 = vpop.f32.mrf.mxu3 }
 0x3e7   : > { %v1786_v59 = vmul.f32 0.17677669, %v1731_v9  ;;  %v1707_v12 = vpop.f32.mrf.mxu2 }
 0x3e8   : > { %v1784_v54 = vmul.f32 0.17677669, %v1707_v12 }
 0x3e9   : > { %v1798_v55 = vsel %vm1479_vm10, %v1786_v59, -inf }
 0x3ea   : > { %1799 = vmax.xlane.f32.xlu1 %v1798_v55  ;;  %v1792_v50 = vsel %vm1479_vm10, %v1784_v54, -inf }
 0x3eb   : > { %1793 = vmax.xlane.f32.xlu2 %v1792_v50 }
 0x3ee   : > { %v1733_v14 = vpop.f32.mrf.mxu3 }
 0x3ef   : > { %v1709_v37 = vpop.f32.mrf.mxu2  ;;  %v1787_v32 = vmul.f32 0.17677669, %v1733_v14 }
 0x3f0   : > { %v1785_v58 = vmul.f32 0.17677669, %v1709_v37 }
 0x3f1   : > { %v1801_v26 = vsel %vm1479_vm10, %v1787_v32, -inf }
 0x3f2   : > { %v1795_v60 = vsel %vm1479_vm10, %v1785_v58, -inf }
 0x3f3   : > { %1796 = vmax.xlane.f32.xlu0 %v1795_v60 }
 0x403   : > { %1988 = vrot.lane.b32.xlu1 %v6187_v8, %s5605_s20 }
 0x40b   : > { %2014 = vrot.lane.b32.xlu1 %v6196_v2, %s5605_s20 }
 0x413   : > { %2012 = vrot.lane.b32.xlu1 %v6201_v7, %s5605_s20  ;;  %v6325_v61 = vpop.f32.mrf.mxu0 }
 0x41b   : > { %v6327_v62 = vpop.f32.mrf.mxu0  ;;  %v6342_v27 = vpop.f32.mrf.mxu1 }
 0x423   : > { %v1755_v0 = vpop.f32.mrf.mxu0  ;;  %v6344_v20 = vpop.f32.mrf.mxu1 }
 0x424   : > { %v1788_v38 = vmul.f32 0.17677669, %v1755_v0 }
 0x426   : > { %v1804_v19 = vsel %vm1479_vm10, %v1788_v38, -inf }
 0x42b   : > { %v1757_v1 = vpop.f32.mrf.mxu0 }
 0x42c   : > { %v6329_v35 = vmul.f32 0.17677669, %v1757_v1  ;;  %v1779_v33 = vpop.f32.mrf.mxu1 }
 0x42d   : > { %v1790_v25 = vmul.f32 0.17677669, %v1779_v33 }
 0x42e   : > { %v1807_v11 = vsel %vm1479_vm10, %v6329_v35, -inf }
 0x42f   : > { %v1810_v44 = vsel %vm1479_vm10, %v1790_v25, -inf }
 0x434   : > { %v1781_v41 = vpop.f32.mrf.mxu1 }
 0x435   : > { %v1791_v39 = vmul.f32 0.17677669, %v1781_v41 }
 0x437   : > { %v1813_v23 = vsel %vm1479_vm10, %v1791_v39, -inf }
 0x43d   : > { %1808 = vmax.xlane.f32.xlu1 %v1807_v11 }
 0x456   : > { %1943 = vrot.lane.b32.xlu1 %v6221_v49, %s5604_s1 }
 0x45d   : > { %v1800_v31 = vpop.xlane.xlu1 %1799 }
 0x45e   : > { %v1794_v4 = vpop.xlane.xlu2 %1793  ;;  %v1818_v36 = vsub.f32 %v1786_v59, %v1800_v31 }
 0x45f   : > { %v1816_v24 = vsub.f32 %v1784_v54, %v1794_v4 }
 0x460   : > { %v1828_v40 = vmul.f32 1.442695, %v1818_v36 }
 0x461   : > { %v1824_v34 = vmul.f32 1.442695, %v1816_v24 }
 0x463   : > { %5040 = vpow2.f32 %v1824_v34 }
 0x466   : > { %v1797_v15 = vpop.xlane.xlu0 %1796 }
 0x467   : > { %v1817_v6 = vsub.f32 %v1785_v58, %v1797_v15 }
 0x469   : > { %v5041_v10 = vpop.eup %5040  ;;  %v1826_v17 = vmul.f32 1.442695, %v1817_v6 }
 0x46a   : > { %v1840_v13 = vsel %vm1479_vm10, %v5041_v10, 0.0 }
 0x46b   : > { %5042 = vpow2.f32 %v1826_v17  ;;  %1841 = vadd.xlane.f32.xlu2 %v1840_v13 }
 0x46c   : > { %5044 = vpow2.f32 %v1828_v40 }
 0x471   : > { %v5043_v18 = vpop.eup %5042 }
 0x472   : > { %v1843_v30 = vsel %vm1479_vm10, %v5043_v18, 0.0  ;;  %v6348_v45 = vpop.eup %5044 }
 0x473   : > { %1802 = vmax.xlane.f32.xlu2 %v1801_v26  ;;  %1844 = vadd.xlane.f32.xlu0 %v1843_v30  ;;  %v1846_v63 = vsel %vm1479_vm10, %v6348_v45, 0.0 }
 0x475   : > { %v1989_v5 = vpop.permute.xlu1 %1988 }
 0x47d   : > { %v2015_v22 = vpop.permute.xlu1 %2014 }
 0x485   : > { %v6350_v46 = vpop.permute.xlu1 %2012 }
 0x487   : > { %1918 = vrot.lane.b32.xlu0 %v6234_v29, %s5604_s1 }
 0x48b   : > { %1990 = vrot.lane.b32.xlu2 %v6182_v47, %s5605_s20 }
 0x4b0   : > { %v1809_v48 = vpop.xlane.xlu1 %1808 }
 0x4b1   : > { %1805 = vmax.xlane.f32.xlu0 %v1804_v19  ;;  %v1821_v60 = vsub.f32 %v6329_v35, %v1809_v48 }
 0x4b3   : > { %v1834_v24 = vmul.f32 1.442695, %v1821_v60 }
 0x4b4   : > { %1811 = vmax.xlane.f32.xlu2 %v1810_v44 }
 0x4b9   : > { %1814 = vmax.xlane.f32.xlu0 %v1813_v23 }
 0x4bc   : > { %1847 = vadd.xlane.f32.xlu2 %v1846_v63 }
 0x4c8   : > { %v1944_v9 = vpop.permute.xlu1 %1943 }
 0x4c9   : > { %1956 = vmatpush.bf16.msra.mxu0 %v1944_v9 }
 0x4d4   : > { %2038 = vrot.lane.b32.xlu2 %v6208_v56, %s5605_s20 }
 0x4de   : > { %v1842_v59 = vpop.xlane.xlu2 %1841 }
 0x4df   : > { %5046 = vrcp.f32 %v1842_v59 }
 0x4e5   : > { %v5047_v55 = vpop.eup %5046 }
 0x4e6   : > { %v1803_v12 = vpop.xlane.xlu2 %1802  ;;  %v1845_v54 = vpop.xlane.xlu0 %1844  ;;  %v1872_v58 = vmul.f32 %v5047_v55, %v5041_v10 }
 0x4e7   : > { %v1819_v50 = vsub.f32 %v1787_v32, %v1803_v12  ;;  %5048 = vrcp.f32 %v1845_v54 }
 0x4e8   : > { %v1880_v1 = vpack.c.bf16 %v1872_v58, %v1872_v58 }
 0x4e9   : > { %v1830_v37 = vmul.f32 1.442695, %v1819_v50 }
 0x4ea   : > { %v1890_v17 = vunpack.c.l.b16 %v1880_v1 }
 0x4eb   : > { %5050 = vpow2.f32 %v1830_v37 }
 0x4ec   : > { %5052 = vpow2.f32 %v1834_v24 }
 0x4ed   : > { %v5049_v0 = vpop.eup %5048 }
 0x4ee   : > { %v1873_v11 = vmul.f32 %v5049_v0, %v5043_v18  ;;  %v1991_v4 = vpop.permute.xlu2 %1990  ;;  %v2020_v18 = vsel %vm1360_vm9, %v2015_v22, 0 }
 0x4ef   : > { %v1996_v34 = vsel %vm1360_vm9, %v1991_v4, 0 }
 0x4f0   : > { %v1881_v15 = vpack.c.bf16 %v1873_v11, %v1873_v11  ;;  %2005 = vmatpush.bf16.xpose.msrb.mxu2 %v1996_v34 }
 0x4f1   : > { %v5051_v6 = vpop.eup %5050 }
 0x4f2   : > { %v1891_v13 = vunpack.c.l.b16 %v1881_v15  ;;  %v1849_v14 = vsel %vm1479_vm10, %v5051_v6, 0.0  ;;  %v6361_v35 = vpop.eup %5052 }
 0x4f3   : > { %1850 = vadd.xlane.f32.xlu0 %v1849_v14  ;;  %v1855_v26 = vsel %vm1479_vm10, %v6361_v35, 0.0 }
 0x4f4   : > { %v1892_v10 = vpack.c.b16 %v1891_v13, %v1890_v17 }
 0x4f6   : > { %4517 = vmatmul.msk.bf16.vlgmr.msra.gmra.mxu2 %vm1479_vm10, %v1892_v10 }
 0x4f9   : > { %v1919_v32 = vpop.permute.xlu0 %1918 }
 0x4fa   : > { %1931 = vmatpush.bf16.msra.mxu3 %v1919_v32 }
 0x4fd   : > { %1856 = vadd.xlane.f32.xlu2 %v1855_v26 }
 0x4fe   : > { %2029 = vmatpush.bf16.xpose.msrb.mxu3 %v2020_v18 }
 0x506   : > { %4521 = vmatmul.msk.bf16.vlgmr.msrb.gmra.mxu2 %vm1360_vm9, %v1989_v5 }
 0x507   : > { %1968 = vrot.lane.b32.xlu0 %v6238_v28, %s5604_s1 }
 0x515   : > { %2062 = vrot.lane.b32.xlu2 %v6225_v57, %s5605_s20 }
 0x524   : > { %v1806_v30 = vpop.xlane.xlu0 %1805 }
 0x525   : > { %v1820_v31 = vsub.f32 %v1788_v38, %v1806_v30 }
 0x527   : > { %v1832_v33 = vmul.f32 1.442695, %v1820_v31  ;;  %v1812_v36 = vpop.xlane.xlu2 %1811 }
 0x528   : > { %v1822_v40 = vsub.f32 %v1790_v25, %v1812_v36 }
 0x529   : > { %5054 = vpow2.f32 %v1832_v33 }
 0x52a   : > { %v1836_v22 = vmul.f32 1.442695, %v1822_v40 }
 0x52c   : > { %5056 = vpow2.f32 %v1836_v22  ;;  %v1815_v19 = vpop.xlane.xlu0 %1814 }
 0x52d   : > { %v1823_v41 = vsub.f32 %v1791_v39, %v1815_v19 }
 0x52f   : > { %v5055_v44 = vpop.eup %5054  ;;  %v1838_v23 = vmul.f32 1.442695, %v1823_v41  ;;  %v1848_v63 = vpop.xlane.xlu2 %1847 }
 0x530   : > { %v1852_v5 = vsel %vm1479_vm10, %v5055_v44, 0.0 }
 0x531   : > { %5058 = vpow2.f32 %v1838_v23  ;;  %1853 = vadd.xlane.f32.xlu0 %v1852_v5 }
 0x532   : > { %v5057_v48 = vpop.eup %5056  ;;  %5060 = vrcp.f32 %v1848_v63 }
 0x533   : > { %v1858_v9 = vsel %vm1479_vm10, %v5057_v48, 0.0 }
 0x534   : > { %1859 = vadd.xlane.f32.xlu1 %v1858_v9 }
 0x537   : > { %v5059_v38 = vpop.eup %5058  ;;  %v2039_v59 = vpop.permute.xlu2 %2038 }
 0x538   : > { %v2044_v25 = vsel %vm1360_vm9, %v2039_v59, 0  ;;  %v1861_v12 = vsel %vm1479_vm10, %v5059_v38, 0.0  ;;  %v5061_v54 = vpop.eup %5060 }
 0x539   : > { %2053 = vmatpush.bf16.xpose.msrb.mxu0 %v2044_v25  ;;  %1862 = vadd.xlane.f32.xlu0 %v1861_v12  ;;  %v1874_v55 = vmul.f32 %v5061_v54, %v6348_v45 }
 0x53b   : > { %v1882_v37 = vpack.c.bf16 %v1874_v55, %v1874_v55 }
 0x53d   : > { %v1915_v1 = vunpack.c.l.b16 %v1882_v37 }
 0x54d   : > { %2036 = vrot.lane.b32.xlu1 %v6213_v43, %s5605_s20  ;;  %2060 = vrot.lane.b32.xlu0 %v6232_v16, %s5605_s20 }
 0x555   : > { %2290 = vrot.lane.b32.xlu1 %v6182_v47, %s5606_s0 }
 0x566   : > { %v1851_v39 = vpop.xlane.xlu0 %1850 }
 0x567   : > { %5062 = vrcp.f32 %v1851_v39 }
 0x56d   : > { %v5063_v50 = vpop.eup %5062 }
 0x56e   : > { %v1875_v58 = vmul.f32 %v5063_v50, %v5051_v6 }
 0x570   : > { %v1883_v60 = vpack.c.bf16 %v1875_v58, %v1875_v58  ;;  %v1857_v0 = vpop.xlane.xlu2 %1856 }
 0x571   : > { %5064 = vrcp.f32 %v1857_v0 }
 0x572   : > { %v1916_v11 = vunpack.c.l.b16 %v1883_v60 }
 0x574   : > { %v1917_v4 = vpack.c.b16 %v1916_v11, %v1915_v1 }
 0x576   : > { %4518 = vmatmul.msk.bf16.vlgmr.msra.gmra.mxu3 %vm1479_vm10, %v1917_v4 }
 0x577   : > { %v5065_v30 = vpop.eup %5064 }
 0x578   : > { %v2063_v24 = vpop.permute.xlu2 %2062  ;;  %v1877_v33 = vmul.f32 %v5065_v30, %v6361_v35 }
 0x579   : > { %v2068_v34 = vsel %vm1360_vm9, %v2063_v24, 0  ;;  %v6384_v47 = vpop.f32.mrf.mxu2  ;;  %v1969_v15 = vpop.permute.xlu0 %1968 }
 0x57a   : > { %1981 = vmatpush.bf16.msrb.mxu1 %v1969_v15  ;;  %v1885_v36 = vpack.c.bf16 %v1877_v33, %v1877_v33 }
 0x57c   : > { %v1941_v23 = vunpack.c.l.b16 %v1885_v36 }
 0x57e   : > { %2077 = vmatpush.bf16.xpose.msra.mxu1 %v2068_v34 }
 0x581   : > { %v6386_v17 = vpop.f32.mrf.mxu2 }
 0x582   : > { %v4924_v45 = vpack.i.bf16 %v6386_v17, %v6384_v47 }
 0x586   : > { %4522 = vmatmul.msk.bf16.vlgmr.msrb.gmra.mxu3 %vm1360_vm9, %v6350_v46 }
 0x589   : > { %v2007_v6 = vpop.f32.mrf.mxu2 }
 0x58a   : > { %v2084_v13 = vmul.f32 0.17677669, %v2007_v6 }
 0x58c   : > { %v2092_v14 = vsel %vm1479_vm10, %v2084_v13, -inf }
 0x58d   : > { %2093 = vmax.xlane.f32.xlu2 %v2092_v14 }
 0x591   : > { %v2009_v10 = vpop.f32.mrf.mxu2 }
 0x592   : > { %v2085_v32 = vmul.f32 0.17677669, %v2009_v10 }
 0x594   : > { %v2095_v18 = vsel %vm1479_vm10, %v2085_v32, -inf }
 0x595   : > { %2096 = vmax.xlane.f32.xlu0 %v2095_v18 }
 0x5a4   : > { %v1854_v26 = vpop.xlane.xlu0 %1853 }
 0x5a5   : > { %5066 = vrcp.f32 %v1854_v26 }
 0x5a7   : > { %v1860_v31 = vpop.xlane.xlu1 %1859 }
 0x5a8   : > { %5068 = vrcp.f32 %v1860_v31 }
 0x5a9   : > { %2193 = vrot.lane.b32.xlu0 %v6227_v52, %s5605_s20 }
 0x5ab   : > { %v5067_v46 = vpop.eup %5066 }
 0x5ac   : > { %v1876_v40 = vmul.f32 %v5067_v46, %v5055_v44  ;;  %v1863_v22 = vpop.xlane.xlu0 %1862 }
 0x5ad   : > { %5070 = vrcp.f32 %v1863_v22 }
 0x5ae   : > { %v5069_v19 = vpop.eup %5068  ;;  %v1884_v41 = vpack.c.bf16 %v1876_v40, %v1876_v40 }
 0x5af   : > { %v1878_v5 = vmul.f32 %v5069_v19, %v5057_v48 }
 0x5b0   : > { %v1940_v63 = vunpack.c.l.b16 %v1884_v41 }
 0x5b1   : > { %v1886_v25 = vpack.c.bf16 %v1878_v5, %v1878_v5 }
 0x5b2   : > { %v1942_v9 = vpack.c.b16 %v1941_v23, %v1940_v63 }
 0x5b3   : > { %v5071_v59 = vpop.eup %5070  ;;  %v1965_v39 = vunpack.c.l.b16 %v1886_v25 }
 0x5b4   : > { %v1879_v12 = vmul.f32 %v5071_v59, %v5059_v38  ;;  %4519 = vmatmul.msk.bf16.vlgmr.msra.gmra.mxu0 %vm1479_vm10, %v1942_v9 }
 0x5b6   : > { %v1887_v35 = vpack.c.bf16 %v1879_v12, %v1879_v12 }
 0x5b8   : > { %v1966_v54 = vunpack.c.l.b16 %v1887_v35 }
 0x5ba   : > { %v1967_v55 = vpack.c.b16 %v1966_v54, %v1965_v39 }
 0x5bc   : > { %4520 = vmatmul.msk.bf16.vlgmr.msrb.gmra.mxu1 %vm1479_vm10, %v1967_v55 }
 0x5bf   : > { %v2037_v44 = vpop.permute.xlu1 %2036  ;;  %v2061_v50 = vpop.permute.xlu0 %2060 }
 0x5c4   : > { %4523 = vmatmul.msk.bf16.vlgmr.msrb.gmra.mxu0 %vm1360_vm9, %v2037_v44 }
 0x5cc   : > { %4524 = vmatmul.msk.bf16.vlgmr.msra.gmra.mxu1 %vm1360_vm9, %v2061_v50 }
 0x5f9   : > { %v6401_v37 = vpop.f32.mrf.mxu3 }
 0x600   : > { %v2094_v48 = vpop.xlane.xlu2 %2093 }
 0x601   : > { %v2116_v58 = vsub.f32 %v2084_v13, %v2094_v48  ;;  %v6403_v60 = vpop.f32.mrf.mxu3 }
 0x602   : > { %v4939_v38 = vpack.i.bf16 %v6403_v60, %v6401_v37 }
 0x603   : > { %v2124_v0 = vmul.f32 1.442695, %v2116_v58 }
 0x605   : > { %5072 = vpow2.f32 %v2124_v0 }
 0x608   : > { %v2097_v1 = vpop.xlane.xlu0 %2096 }
 0x609   : > { %v2117_v11 = vsub.f32 %v2085_v32, %v2097_v1  ;;  %v2031_v4 = vpop.f32.mrf.mxu3  ;;  %v2291_v32 = vpop.permute.xlu1 %2290 }
 0x60a   : > { %v2086_v24 = vmul.f32 0.17677669, %v2031_v4  ;;  %v2296_v33 = vsel %vm1360_vm9, %v2291_v32, 0 }
 0x60b   : > { %v5073_v34 = vpop.eup %5072  ;;  %v2126_v15 = vmul.f32 1.442695, %v2117_v11 }
 0x60c   : > { %v2140_v6 = vsel %vm1479_vm10, %v5073_v34, 0.0  ;;  %v2098_v14 = vsel %vm1479_vm10, %v2086_v24, -inf }
 0x60d   : > { %5074 = vpow2.f32 %v2126_v15  ;;  %2141 = vadd.xlane.f32.xlu2 %v2140_v6  ;;  %2099 = vmax.xlane.f32.xlu1 %v2098_v14 }
 0x611   : > { %v2033_v13 = vpop.f32.mrf.mxu3 }
 0x612   : > { %v2087_v10 = vmul.f32 0.17677669, %v2033_v13 }
 0x613   : > { %v5075_v18 = vpop.eup %5074 }
 0x614   : > { %v2101_v26 = vsel %vm1479_vm10, %v2087_v10, -inf  ;;  %v2143_v30 = vsel %vm1479_vm10, %v5075_v18, 0.0 }
 0x615   : > { %2102 = vmax.xlane.f32.xlu2 %v2101_v26  ;;  %2144 = vadd.xlane.f32.xlu0 %v2143_v30 }
 0x61b   : > { %v2194_v31 = vpop.permute.xlu0 %2193 }
 0x61c   : > { %2206 = vmatpush.bf16.msra.mxu2 %v2194_v31 }
 0x620   : > { %2305 = vmatpush.bf16.xpose.msrb.mxu2 %v2296_v33 }
 0x626   : > { %2312 = vrot.lane.b32.xlu1 %v6201_v7, %s5606_s0 }
 0x62d   : > { %2218 = vrot.lane.b32.xlu2 %v6234_v29, %s5605_s20 }
 0x631   : > { %v6416_v46 = vpop.f32.mrf.mxu0 }
 0x639   : > { %v6418_v36 = vpop.f32.mrf.mxu0  ;;  %v6420_v40 = vpop.f32.mrf.mxu1 }
 0x63a   : > { %v4954_v22 = vpack.i.bf16 %v6418_v36, %v6416_v46 }
 0x641   : > { %v6424_v19 = vpop.f32.mrf.mxu1  ;;  %v2055_v41 = vpop.f32.mrf.mxu0 }
 0x642   : > { %v4969_v23 = vpack.i.bf16 %v6424_v19, %v6420_v40  ;;  %v2088_v63 = vmul.f32 0.17677669, %v2055_v41  ;;  %v4747_v40 = vld [vmem:[%s5885_s10 + $0x10] sm:$0xff] }
 0x644   : > { %v2104_v7 = vsel %vm1479_vm10, %v2088_v63, -inf }
 0x645   : > { %2105 = vmax.xlane.f32.xlu0 %v2104_v7 }
 0x649   : > { %v2057_v5 = vpop.f32.mrf.mxu0  ;;  %v2079_v9 = vpop.f32.mrf.mxu1 }
 0x64a   : > { %v2089_v59 = vmul.f32 0.17677669, %v2057_v5  ;;  %v2090_v39 = vmul.f32 0.17677669, %v2079_v9 }
 0x64c   : > { %v2107_v25 = vsel %vm1479_vm10, %v2089_v59, -inf  ;;  %v2110_v55 = vsel %vm1479_vm10, %v2090_v39, -inf }
 0x650   : > { %2108 = vmax.xlane.f32.xlu1 %v2107_v25 }
 0x651   : > { %v2081_v12 = vpop.f32.mrf.mxu1 }
 0x652   : > { %v2091_v35 = vmul.f32 0.17677669, %v2081_v12 }
 0x654   : > { %v2113_v54 = vsel %vm1479_vm10, %v2091_v35, -inf }
 0x656   : > { %2114 = vmax.xlane.f32.xlu2 %v2113_v54 }
 0x658   : > { %2111 = vmax.xlane.f32.xlu1 %v2110_v55 }
 0x659   : > { %2288 = vrot.lane.b32.xlu0 %v6187_v8, %s5606_s0 }
 0x661   : > { %2314 = vrot.lane.b32.xlu0 %v6196_v2, %s5606_s0 }
 0x669   : > { %2338 = vrot.lane.b32.xlu0 %v6208_v56, %s5606_s0 }
 0x680   : > { %v2142_v44 = vpop.xlane.xlu2 %2141  ;;  %v2100_v50 = vpop.xlane.xlu1 %2099 }
 0x681   : > { %v2118_v48 = vsub.f32 %v2086_v24, %v2100_v50  ;;  %5076 = vrcp.f32 %v2142_v44 }
 0x683   : > { %v2128_v58 = vmul.f32 1.442695, %v2118_v48 }
 0x685   : > { %5078 = vpow2.f32 %v2128_v58 }
 0x687   : > { %v5077_v11 = vpop.eup %5076 }
 0x688   : > { %v2103_v0 = vpop.xlane.xlu2 %2102  ;;  %v2145_v1 = vpop.xlane.xlu0 %2144  ;;  %v2172_v6 = vmul.f32 %v5077_v11, %v5073_v34 }
 0x689   : > { %v2119_v4 = vsub.f32 %v2087_v10, %v2103_v0  ;;  %5080 = vrcp.f32 %v2145_v1 }
 0x68a   : > { %v2180_v14 = vpack.c.bf16 %v2172_v6, %v2172_v6 }
 0x68b   : > { %v6438_v15 = vpop.eup %5078  ;;  %v2130_v8 = vmul.f32 1.442695, %v2119_v4 }
 0x68c   : > { %v2146_v2 = vsel %vm1479_vm10, %v6438_v15, 0.0  ;;  %v2190_v32 = vunpack.c.l.b16 %v2180_v14 }
 0x68d   : > { %5082 = vpow2.f32 %v2130_v8  ;;  %2147 = vadd.xlane.f32.xlu1 %v2146_v2 }
 0x68f   : > { %v5081_v56 = vpop.eup %5080 }
 0x690   : > { %v2173_v24 = vmul.f32 %v5081_v56, %v5075_v18  ;;  %v2219_v13 = vpop.permute.xlu2 %2218 }
 0x691   : > { %2231 = vmatpush.bf16.msra.mxu3 %v2219_v13 }
 0x692   : > { %v2181_v26 = vpack.c.bf16 %v2173_v24, %v2173_v24 }
 0x693   : > { %v5083_v30 = vpop.eup %5082 }
 0x694   : > { %v2191_v31 = vunpack.c.l.b16 %v2181_v26  ;;  %v2149_v10 = vsel %vm1479_vm10, %v5083_v30, 0.0 }
 0x695   : > { %2150 = vadd.xlane.f32.xlu2 %v2149_v10 }
 0x696   : > { %v2192_v33 = vpack.c.b16 %v2191_v31, %v2190_v32 }
 0x698   : > { %4525 = vmatmul.msk.bf16.vlgmr.msra.gmra.mxu2 %vm1479_vm10, %v2192_v33  ;;  %v2313_v7 = vpop.permute.xlu1 %2312 }
 0x6a6   : > { %2243 = vrot.lane.b32.xlu1 %v6221_v49, %s5605_s20 }
 0x6b8   : > { %v2106_v34 = vpop.xlane.xlu0 %2105 }
 0x6b9   : > { %v2120_v41 = vsub.f32 %v2088_v63, %v2106_v34 }
 0x6bb   : > { %v2132_v5 = vmul.f32 1.442695, %v2120_v41 }
 0x6bd   : > { %5084 = vpow2.f32 %v2132_v5 }
 0x6c3   : > { %v5085_v18 = vpop.eup %5084  ;;  %v2109_v9 = vpop.xlane.xlu1 %2108 }
 0x6c4   : > { %v2121_v25 = vsub.f32 %v2089_v59, %v2109_v9  ;;  %v2152_v12 = vsel %vm1479_vm10, %v5085_v18, 0.0 }
 0x6c5   : > { %2153 = vadd.xlane.f32.xlu0 %v2152_v12 }
 0x6c6   : > { %v2134_v54 = vmul.f32 1.442695, %v2121_v25 }
 0x6c8   : > { %5086 = vpow2.f32 %v2134_v54 }
 0x6c9   : > { %v2115_v55 = vpop.xlane.xlu2 %2114 }
 0x6ca   : > { %v2123_v44 = vsub.f32 %v2091_v35, %v2115_v55 }
 0x6cb   : > { %v2112_v50 = vpop.xlane.xlu1 %2111  ;;  %v2289_v48 = vpop.permute.xlu0 %2288 }
 0x6cc   : > { %v2138_v58 = vmul.f32 1.442695, %v2123_v44  ;;  %v2122_v0 = vsub.f32 %v2090_v39, %v2112_v50  ;;  %4529 = vmatmul.msk.bf16.vlgmr.msrb.gmra.mxu2 %vm1360_vm9, %v2289_v48 }
 0x6ce   : > { %v5087_v63 = vpop.eup %5086  ;;  %5088 = vpow2.f32 %v2138_v58  ;;  %v2136_v1 = vmul.f32 1.442695, %v2122_v0 }
 0x6cf   : > { %v2155_v11 = vsel %vm1479_vm10, %v5087_v63, 0.0 }
 0x6d0   : > { %5090 = vpow2.f32 %v2136_v1  ;;  %2156 = vadd.xlane.f32.xlu2 %v2155_v11 }
 0x6d3   : > { %v2315_v59 = vpop.permute.xlu0 %2314 }
 0x6d4   : > { %v5089_v4 = vpop.eup %5088  ;;  %v2320_v8 = vsel %vm1360_vm9, %v2315_v59, 0 }
 0x6d5   : > { %2329 = vmatpush.bf16.xpose.msrb.mxu3 %v2320_v8  ;;  %v2161_v2 = vsel %vm1479_vm10, %v5089_v4, 0.0 }
 0x6d6   : > { %v5091_v6 = vpop.eup %5090 }
 0x6d7   : > { %v2158_v35 = vsel %vm1479_vm10, %v5091_v6, 0.0 }
 0x6d8   : > { %2159 = vadd.xlane.f32.xlu1 %v2158_v35  ;;  %2162 = vadd.xlane.f32.xlu2 %v2161_v2 }
 0x6d9   : > { %2362 = vrot.lane.b32.xlu0 %v6225_v57, %s5606_s0 }
 0x6e1   : > { %2360 = vrot.lane.b32.xlu0 %v6232_v16, %s5606_s0  ;;  %v2339_v16 = vpop.permute.xlu0 %2338 }
 0x6f0   : > { %2268 = vrot.lane.b32.xlu2 %v6238_v28, %s5605_s20 }
 0x6f1   : > { %2336 = vrot.lane.b32.xlu1 %v6213_v43, %s5606_s0  ;;  %v2344_v43 = vsel %vm1360_vm9, %v2339_v16, 0 }
 0x700   : > { %v2148_v39 = vpop.xlane.xlu1 %2147 }
 0x701   : > { %5092 = vrcp.f32 %v2148_v39 }
 0x707   : > { %v5093_v14 = vpop.eup %5092 }
 0x708   : > { %v2151_v56 = vpop.xlane.xlu2 %2150  ;;  %v2174_v24 = vmul.f32 %v5093_v14, %v6438_v15 }
 0x709   : > { %5094 = vrcp.f32 %v2151_v56 }
 0x70a   : > { %v2182_v26 = vpack.c.bf16 %v2174_v24, %v2174_v24 }
 0x70c   : > { %v2215_v31 = vunpack.c.l.b16 %v2182_v26 }
 0x70f   : > { %v5095_v13 = vpop.eup %5094 }
 0x710   : > { %v2175_v32 = vmul.f32 %v5095_v13, %v5083_v30 }
 0x712   : > { %v2183_v57 = vpack.c.bf16 %v2175_v32, %v2175_v32 }
 0x714   : > { %v2216_v10 = vunpack.c.l.b16 %v2183_v57 }
 0x716   : > { %v2217_v33 = vpack.c.b16 %v2216_v10, %v2215_v31 }
 0x718   : > { %v2244_v34 = vpop.permute.xlu1 %2243  ;;  %4526 = vmatmul.msk.bf16.vlgmr.msra.gmra.mxu3 %vm1479_vm10, %v2217_v33 }
 0x719   : > { %2256 = vmatpush.bf16.msra.mxu0 %v2244_v34 }
 0x71b   : > { %v6463_v41 = vpop.f32.mrf.mxu2 }
 0x71d   : > { %2353 = vmatpush.bf16.xpose.msrb.mxu0 %v2344_v43 }
 0x723   : > { %v6465_v5 = vpop.f32.mrf.mxu2 }
 0x724   : > { %v4929_v15 = vpack.i.bf16 %v6465_v5, %v6463_v41 }
 0x728   : > { %4530 = vmatmul.msk.bf16.vlgmr.msrb.gmra.mxu3 %vm1360_vm9, %v2313_v7 }
 0x738   : > { %v2154_v30 = vpop.xlane.xlu0 %2153 }
 0x739   : > { %5096 = vrcp.f32 %v2154_v30 }
 0x73f   : > { %v5097_v25 = vpop.eup %5096 }
 0x740   : > { %v2176_v12 = vmul.f32 %v5097_v25, %v5085_v18 }
 0x742   : > { %v2184_v55 = vpack.c.bf16 %v2176_v12, %v2176_v12 }
 0x743   : > { %v2157_v9 = vpop.xlane.xlu2 %2156 }
 0x744   : > { %5098 = vrcp.f32 %v2157_v9  ;;  %v2240_v0 = vunpack.c.l.b16 %v2184_v55 }
 0x74a   : > { %v5099_v54 = vpop.eup %5098 }
 0x74b   : > { %v2177_v44 = vmul.f32 %v5099_v54, %v5087_v63  ;;  %v2160_v50 = vpop.xlane.xlu1 %2159  ;;  %v2163_v48 = vpop.xlane.xlu2 %2162 }
 0x74c   : > { %5100 = vrcp.f32 %v2160_v50  ;;  %v2363_v7 = vpop.permute.xlu0 %2362 }
 0x74d   : > { %v2185_v58 = vpack.c.bf16 %v2177_v44, %v2177_v44  ;;  %5102 = vrcp.f32 %v2163_v48  ;;  %v2368_v14 = vsel %vm1360_vm9, %v2363_v7, 0 }
 0x74f   : > { %v2241_v1 = vunpack.c.l.b16 %v2185_v58  ;;  %v2307_v11 = vpop.f32.mrf.mxu2 }
 0x750   : > { %v2384_v59 = vmul.f32 0.17677669, %v2307_v11 }
 0x751   : > { %v2242_v8 = vpack.c.b16 %v2241_v1, %v2240_v0 }
 0x752   : > { %v5101_v35 = vpop.eup %5100  ;;  %v2392_v2 = vsel %vm1479_vm10, %v2384_v59, -inf }
 0x753   : > { %v5103_v39 = vpop.eup %5102  ;;  %v2178_v56 = vmul.f32 %v5101_v35, %v5091_v6  ;;  %v2269_v18 = vpop.permute.xlu2 %2268  ;;  %2393 = vmax.xlane.f32.xlu2 %v2392_v2  ;;  %4527 = vmatmul.msk.bf16.vlgmr.msra.gmra.mxu0 %vm1479_vm10, %v2242_v8 }
 0x754   : > { %v2179_v63 = vmul.f32 %v5103_v39, %v5089_v4  ;;  %2281 = vmatpush.bf16.msrb.mxu1 %v2269_v18  ;;  %v2361_v4 = vpop.permute.xlu0 %2360 }
 0x755   : > { %v2186_v24 = vpack.c.bf16 %v2178_v56, %v2178_v56 }
 0x756   : > { %v2187_v13 = vpack.c.bf16 %v2179_v63, %v2179_v63 }
 0x757   : > { %v2265_v26 = vunpack.c.l.b16 %v2186_v24  ;;  %v2309_v32 = vpop.f32.mrf.mxu2 }
 0x758   : > { %2377 = vmatpush.bf16.xpose.msra.mxu1 %v2368_v14  ;;  %v2266_v57 = vunpack.c.l.b16 %v2187_v13  ;;  %v2385_v31 = vmul.f32 0.17677669, %v2309_v32 }
 0x75a   : > { %v2267_v10 = vpack.c.b16 %v2266_v57, %v2265_v26  ;;  %v2395_v16 = vsel %vm1479_vm10, %v2385_v31, -inf }
 0x75b   : > { %2396 = vmax.xlane.f32.xlu0 %v2395_v16 }
 0x75c   : > { %4528 = vmatmul.msk.bf16.vlgmr.msrb.gmra.mxu1 %vm1479_vm10, %v2267_v10 }
 0x763   : > { %v2337_v6 = vpop.permute.xlu1 %2336 }
 0x764   : > { %4531 = vmatmul.msk.bf16.vlgmr.msrb.gmra.mxu0 %vm1360_vm9, %v2337_v6 }
 0x76c   : > { %4532 = vmatmul.msk.bf16.vlgmr.msra.gmra.mxu1 %vm1360_vm9, %v2361_v4 }
 0x79b   : > { %v6477_v33 = vpop.f32.mrf.mxu3 }
 0x7a3   : > { %v6479_v34 = vpop.f32.mrf.mxu3 }
 0x7a4   : > { %v4944_v43 = vpack.i.bf16 %v6479_v34, %v6477_v33 }
 0x7ab   : > { %v2331_v30 = vpop.f32.mrf.mxu3 }
 0x7ac   : > { %v2386_v9 = vmul.f32 0.17677669, %v2331_v30 }
 0x7ae   : > { %v2398_v25 = vsel %vm1479_vm10, %v2386_v9, -inf }
 0x7af   : > { %2399 = vmax.xlane.f32.xlu1 %v2398_v25 }
 0x7b3   : > { %v2333_v12 = vpop.f32.mrf.mxu3 }
 0x7b4   : > { %v2387_v54 = vmul.f32 0.17677669, %v2333_v12 }
 0x7b6   : > { %v2401_v55 = vsel %vm1479_vm10, %v2387_v54, -inf }
 0x7b7   : > { %2402 = vmax.xlane.f32.xlu2 %v2401_v55 }
 0x7c6   : > { %v2394_v44 = vpop.xlane.xlu2 %2393 }
 0x7c7   : > { %v2416_v50 = vsub.f32 %v2384_v59, %v2394_v44 }
 0x7c9   : > { %v2424_v48 = vmul.f32 1.442695, %v2416_v50 }
 0x7cb   : > { %5104 = vpow2.f32 %v2424_v48 }
 0x7ce   : > { %v2397_v11 = vpop.xlane.xlu0 %2396 }
 0x7cf   : > { %v2417_v2 = vsub.f32 %v2385_v31, %v2397_v11 }
 0x7d0   : > { %v6485_v58 = vpop.f32.mrf.mxu0 }
 0x7d1   : > { %v6487_v0 = vpop.eup %5104  ;;  %v2426_v59 = vmul.f32 1.442695, %v2417_v2 }
 0x7d2   : > { %v2440_v1 = vsel %vm1479_vm10, %v6487_v0, 0.0 }
 0x7d3   : > { %2441 = vadd.xlane.f32.xlu1 %v2440_v1  ;;  %5106 = vpow2.f32 %v2426_v59 }
 0x7d8   : > { %v6491_v8 = vpop.f32.mrf.mxu0 }
 0x7d9   : > { %v4959_v7 = vpack.i.bf16 %v6491_v8, %v6485_v58  ;;  %v6495_v35 = vpop.f32.mrf.mxu1  ;;  %v5107_v24 = vpop.eup %5106 }
 0x7da   : > { %v2443_v31 = vsel %vm1479_vm10, %v5107_v24, 0.0 }
 0x7e1   : > { %v6497_v39 = vpop.f32.mrf.mxu1  ;;  %v2355_v56 = vpop.f32.mrf.mxu0 }
 0x7e2   : > { %v4974_v18 = vpack.i.bf16 %v6497_v39, %v6495_v35  ;;  %v2388_v63 = vmul.f32 0.17677669, %v2355_v56 }
 0x7e4   : > { %v2404_v14 = vsel %vm1479_vm10, %v2388_v63, -inf }
 0x7e5   : > { %2405 = vmax.xlane.f32.xlu0 %v2404_v14 }
 0x7e9   : > { %v2379_v13 = vpop.f32.mrf.mxu1  ;;  %v2357_v26 = vpop.f32.mrf.mxu0 }
 0x7ea   : > { %v2389_v32 = vmul.f32 0.17677669, %v2357_v26  ;;  %v2390_v10 = vmul.f32 0.17677669, %v2379_v13 }
 0x7ec   : > { %v2407_v57 = vsel %vm1479_vm10, %v2389_v32, -inf  ;;  %v2410_v30 = vsel %vm1479_vm10, %v2390_v10, -inf }
 0x7ed   : > { %2408 = vmax.xlane.f32.xlu2 %v2407_v57  ;;  %2444 = vadd.xlane.f32.xlu0 %v2443_v31 }
 0x7f1   : > { %v2381_v16 = vpop.f32.mrf.mxu1 }
 0x7f2   : > { %v6504_v6 = vmul.f32 0.17677669, %v2381_v16 }
 0x7f4   : > { %v2413_v4 = vsel %vm1479_vm10, %v6504_v6, -inf }
 0x7f5   : > { %2414 = vmax.xlane.f32.xlu1 %v2413_v4  ;;  %2411 = vmax.xlane.f32.xlu2 %v2410_v30 }
 0x801   : > { %2493 = vrot.lane.b32.xlu0 %v6227_v52, %s5606_s0 }
 0x822   : > { %v2400_v25 = vpop.xlane.xlu1 %2399 }
 0x823   : > { %v2418_v12 = vsub.f32 %v2386_v9, %v2400_v25 }
 0x825   : > { %v2428_v55 = vmul.f32 1.442695, %v2418_v12 }
 0x827   : > { %5108 = vpow2.f32 %v2428_v55 }
 0x82a   : > { %v2403_v48 = vpop.xlane.xlu2 %2402 }
 0x82b   : > { %v2419_v2 = vsub.f32 %v2387_v54, %v2403_v48 }
 0x82d   : > { %v6511_v44 = vpop.eup %5108  ;;  %v2430_v52 = vmul.f32 1.442695, %v2419_v2 }
 0x82e   : > { %v2446_v50 = vsel %vm1479_vm10, %v6511_v44, 0.0 }
 0x82f   : > { %2447 = vadd.xlane.f32.xlu2 %v2446_v50 }
 0x846   : > { %v2442_v56 = vpop.xlane.xlu1 %2441 }
 0x847   : > { %2518 = vrot.lane.b32.xlu2 %v6234_v29, %s5606_s0 }
 0x858   : > { %v2406_v1 = vpop.xlane.xlu0 %2405 }
 0x859   : > { %v2420_v11 = vsub.f32 %v2388_v63, %v2406_v1 }
 0x85b   : > { %v2432_v59 = vmul.f32 1.442695, %v2420_v11 }
 0x85d   : > { %5110 = vpow2.f32 %v2432_v59 }
 0x860   : > { %v2409_v9 = vpop.xlane.xlu2 %2408  ;;  %v2445_v14 = vpop.xlane.xlu0 %2444 }
 0x861   : > { %v2421_v13 = vsub.f32 %v2389_v32, %v2409_v9  ;;  %5112 = vrcp.f32 %v2445_v14 }
 0x862   : > { %5114 = vrcp.f32 %v2442_v56 }
 0x863   : > { %v6517_v26 = vpop.eup %5110  ;;  %5116 = vpow2.f32 %v2430_v52  ;;  %v2434_v57 = vmul.f32 1.442695, %v2421_v13 }
 0x864   : > { %v2452_v29 = vsel %vm1479_vm10, %v6517_v26, 0.0 }
 0x865   : > { %5118 = vpow2.f32 %v2434_v57  ;;  %2453 = vadd.xlane.f32.xlu1 %v2452_v29 }
 0x867   : > { %v5113_v63 = vpop.eup %5112 }
 0x868   : > { %v5115_v54 = vpop.eup %5114  ;;  %v2412_v31 = vpop.xlane.xlu2 %2411  ;;  %v2473_v4 = vmul.f32 %v5113_v63, %v5107_v24 }
 0x869   : > { %v5117_v16 = vpop.eup %5116  ;;  %v2422_v30 = vsub.f32 %v2390_v10, %v2412_v31  ;;  %v2472_v32 = vmul.f32 %v5115_v54, %v6487_v0 }
 0x86a   : > { %v2449_v50 = vsel %vm1479_vm10, %v5117_v16, 0.0  ;;  %v2481_v48 = vpack.c.bf16 %v2473_v4, %v2473_v4 }
 0x86b   : > { %v5119_v25 = vpop.eup %5118  ;;  %v2436_v12 = vmul.f32 1.442695, %v2422_v30  ;;  %v2480_v1 = vpack.c.bf16 %v2472_v32, %v2472_v32  ;;  %v4751_v32 = vld [vmem:[%s5885_s10 + $0x30] sm:$0xff] }
 0x86c   : > { %v2455_v55 = vsel %vm1479_vm10, %v5119_v25, 0.0  ;;  %v2491_v11 = vunpack.c.l.b16 %v2481_v48  ;;  %v4748_v48 = vld [vmem:[%s5885_s10 + $0x18] sm:$0xff] }
 0x86d   : > { %2456 = vadd.xlane.f32.xlu0 %v2455_v55  ;;  %2450 = vadd.xlane.f32.xlu1 %v2449_v50  ;;  %5120 = vpow2.f32 %v2436_v12  ;;  %v2490_v2 = vunpack.c.l.b16 %v2480_v1  ;;  %v4750_v12 = vld [vmem:[%s5885_s10 + $0x28] sm:$0xff]  ;;  %v4749_v50 = vld [vmem:[%s5885_s10 + $0x20] sm:$0xff] }
 0x86f   : > { %v2492_v24 = vpack.c.b16 %v2491_v11, %v2490_v2 }
 0x873   : > { %v2494_v59 = vpop.permute.xlu0 %2493  ;;  %v6524_v52 = vpop.eup %5120 }
 0x874   : > { %2506 = vmatpush.bf16.msra.mxu2 %v2494_v59  ;;  %v2458_v0 = vsel %vm1479_vm10, %v6524_v52, 0.0 }
 0x875   : > { %2459 = vadd.xlane.f32.xlu2 %v2458_v0 }
 0x877   : > { %4533 = vmatmul.msk.bf16.vlgmr.msra.gmra.mxu2 %vm1479_vm10, %v2492_v24 }
 0x881   : > { %2568 = vrot.lane.b32.xlu0 %v6238_v28, %s5606_s0 }
 0x886   : > { %2543 = vrot.lane.b32.xlu1 %v6221_v49, %s5606_s0  ;;  %v2415_v49 = vpop.xlane.xlu1 %2414 }
 0x887   : > { %v2423_v28 = vsub.f32 %v6504_v6, %v2415_v49 }
 0x889   : > { %4930 = vrot.lane.b32.xlu0 %v4929_v15, %s5605_s20  ;;  %v2438_v47 = vmul.f32 1.442695, %v2423_v28 }
 0x88b   : > { %5122 = vpow2.f32 %v2438_v47  ;;  %v4746_v47 = vld [vmem:[%s5885_s10 + $0x8] sm:$0xff] }
 0x88d   : > { %4925 = vrot.lane.b32.xlu2 %v4924_v45, %s5606_s0 }
 0x891   : > { %4940 = vrot.lane.b32.xlu0 %v4939_v38, %s5606_s0  ;;  %v6554_v37 = vpop.eup %5122 }
 0x892   : > { %v2461_v60 = vsel %vm1479_vm10, %v6554_v37, 0.0 }
 0x899   : > { %4945 = vrot.lane.b32.xlu0 %v4944_v43, %s5605_s20 }
 0x8a1   : > { %4955 = vrot.lane.b32.xlu0 %v4954_v22, %s5606_s0 }
 0x8a2   : > { %v2448_v17 = vpop.xlane.xlu2 %2447 }
 0x8a3   : > { %5124 = vrcp.f32 %v2448_v17  ;;  %v4745_v17 = vld [vmem:[%s5885_s10] sm:$0xff] }
 0x8a9   : > { %v5125_v5 = vpop.eup %5124 }
 0x8aa   : > { %v2519_v45 = vpop.permute.xlu2 %2518  ;;  %v2474_v46 = vmul.f32 %v5125_v5, %v6511_v44 }
 0x8ab   : > { %2531 = vmatpush.bf16.msra.mxu3 %v2519_v45 }
 0x8ac   : > { %v2482_v22 = vpack.c.bf16 %v2474_v46, %v2474_v46 }
 0x8ae   : > { %v2515_v10 = vunpack.c.l.b16 %v2482_v22 }
 0x8b0   : > { %2462 = vadd.xlane.f32.xlu1 %v2461_v60 }
 0x8d8   : > { %v2454_v38 = vpop.xlane.xlu1 %2453 }
 0x8e0   : > { %v2451_v41 = vpop.xlane.xlu1 %2450  ;;  %v2457_v15 = vpop.xlane.xlu0 %2456 }
 0x8e1   : > { %5126 = vrcp.f32 %v2451_v41 }
 0x8e2   : > { %5128 = vrcp.f32 %v2457_v15 }
 0x8e3   : > { %5130 = vrcp.f32 %v2454_v38 }
 0x8e7   : > { %v5127_v36 = vpop.eup %5126 }
 0x8e8   : > { %v2475_v33 = vmul.f32 %v5127_v36, %v5117_v16  ;;  %v5129_v43 = vpop.eup %5128  ;;  %v2460_v55 = vpop.xlane.xlu2 %2459 }
 0x8e9   : > { %v5131_v56 = vpop.eup %5130  ;;  %v2477_v14 = vmul.f32 %v5129_v43, %v5119_v25  ;;  %v4752_v25 = vld [vmem:[%s5885_s10 + $0x38] sm:$0xff]  ;;  %5132 = vrcp.f32 %v2460_v55 }
 0x8ea   : > { %v2483_v34 = vpack.c.bf16 %v2475_v33, %v2475_v33  ;;  %v2476_v13 = vmul.f32 %v5131_v56, %v6517_v26  ;;  %2782 = vmatpush.bf16.msrb.mxu2 %v4752_v25  ;;  %4785 = vmatpush.bf16.msrb.mxu3 %v4752_v25 }
 0x8eb   : > { %v2485_v57 = vpack.c.bf16 %v2477_v14, %v2477_v14 }
 0x8ec   : > { %v2516_v6 = vunpack.c.l.b16 %v2483_v34  ;;  %v2484_v44 = vpack.c.bf16 %v2476_v13, %v2476_v13 }
 0x8ed   : > { %v2541_v63 = vunpack.c.l.b16 %v2485_v57 }
 0x8ee   : > { %v2517_v9 = vpack.c.b16 %v2516_v6, %v2515_v10  ;;  %v2540_v54 = vunpack.c.l.b16 %v2484_v44  ;;  %2783 = vmatpush.bf16.msrb.mxu2 %v4751_v32  ;;  %4786 = vmatpush.bf16.msrb.mxu3 %v4751_v32 }
 0x8ef   : > { %v5133_v11 = vpop.eup %5132 }
 0x8f0   : > { %4534 = vmatmul.msk.bf16.vlgmr.msra.gmra.mxu3 %vm1479_vm10, %v2517_v9  ;;  %v2542_v16 = vpack.c.b16 %v2541_v63, %v2540_v54  ;;  %v2478_v19 = vmul.f32 %v5133_v11, %v6524_v52  ;;  %v4926_v45 = vpop.permute.xlu2 %4925 }
 0x8f1   : > { %v4928_v38 = vunpack.i.h.bf16 %v4926_v45  ;;  %v4927_v41 = vunpack.i.l.bf16 %v4926_v45 }
 0x8f2   : > { %2784 = vmatpush.bf16.msrb.mxu2 %v4750_v12  ;;  %4787 = vmatpush.bf16.msrb.mxu3 %v4750_v12  ;;  %v2486_v2 = vpack.c.bf16 %v2478_v19, %v2478_v19 }
 0x8f3   : > { %v2569_v29 = vpop.permute.xlu0 %2568  ;;  %v2685_v46 = vsel %vm1360_vm9, %v6310_v51, %v4928_v38  ;;  %v2684_v36 = vsel %vm1360_vm9, %v6308_v3, %v4927_v41  ;;  %v5185_v41 = vld [vmem:[#allocation2] sm:$0xff] }
 0x8f4   : > { %2581 = vmatpush.bf16.msrb.mxu1 %v2569_v29  ;;  %v2565_v0 = vunpack.c.l.b16 %v2486_v2 }
 0x8f6   : > { %2785 = vmatpush.bf16.msrb.mxu2 %v4749_v50  ;;  %4788 = vmatpush.bf16.msrb.mxu3 %v4749_v50 }
 0x8f8   : > { %v2544_v31 = vpop.permute.xlu1 %2543 }
 0x8f9   : > { %2556 = vmatpush.bf16.msra.mxu0 %v2544_v31 }
 0x8fa   : > { %v2508_v4 = vpop.f32.mrf.mxu2  ;;  %2786 = vmatpush.bf16.msrb.mxu2 %v4748_v48  ;;  %4789 = vmatpush.bf16.msrb.mxu3 %v4748_v48 }
 0x8fb   : > { %v4931_v52 = vpop.permute.xlu0 %4930 }
 0x8fc   : > { %4535 = vmatmul.msk.bf16.vlgmr.msra.gmra.mxu0 %vm1479_vm10, %v2542_v16  ;;  %v4933_v5 = vunpack.i.h.bf16 %v4931_v52  ;;  %v4932_v15 = vunpack.i.l.bf16 %v4931_v52 }
 0x8fe   : > { %2787 = vmatpush.bf16.msrb.mxu2 %v4747_v40  ;;  %4790 = vmatpush.bf16.msrb.mxu3 %v4747_v40  ;;  %v2694_v34 = vsel %vm2692_vm11, %v2685_v46, %v4933_v5  ;;  %v2693_v43 = vsel %vm2692_vm11, %v2684_v36, %v4932_v15 }
 0x902   : > { %v2510_v30 = vpop.f32.mrf.mxu2  ;;  %2788 = vmatpush.bf16.msrb.mxu2 %v4746_v47  ;;  %4791 = vmatpush.bf16.msrb.mxu3 %v4746_v47 }
 0x903   : > { %v4934_v26 = vpack.i.bf16 %v2510_v30, %v2508_v4  ;;  %v4941_v63 = vpop.permute.xlu0 %4940 }
 0x904   : > { %v4943_v31 = vunpack.i.h.bf16 %v4941_v63  ;;  %v4942_v16 = vunpack.i.l.bf16 %v4941_v63  ;;  %v4767_v63 = vld [vmem:[%s5898_s21 + $0x74] sm:$0xf] }
 0x905   : > { %4935 = vrot.lane.b32.xlu1 %v4934_v26, %s5604_s1 }
 0x906   : > { %2789 = vmatpush.bf16.msrb.mxu2 %v4745_v17  ;;  %4792 = vmatpush.bf16.msrb.mxu3 %v4745_v17  ;;  %v2687_v58 = vsel %vm1360_vm9, %v6314_v53, %v4943_v31  ;;  %v2686_v8 = vsel %vm1360_vm9, %v6312_v42, %v4942_v16  ;;  %v5184_v17 = vld [vmem:[#allocation2 + $0x30] sm:$0xff]  ;;  %v4629_v31 = vld [vmem:[%s5898_s21 + $0x78] sm:$0xf0]  ;;  %v5186_v16 = vld [vmem:[#allocation2 + $0x18] sm:$0xff] }
 0x90b   : > { %v4946_v54 = vpop.permute.xlu0 %4945 }
 0x90c   : > { %v4948_v4 = vunpack.i.h.bf16 %v4946_v54  ;;  %v4947_v30 = vunpack.i.l.bf16 %v4946_v54 }
 0x90d   : > { %4970 = vrot.lane.b32.xlu1 %v4969_v23, %s5606_s0 }
 0x90e   : > { %v2695_v39 = vsel %vm2692_vm11, %v2686_v8, %v4947_v30  ;;  %v4632_v30 = vor.u32 %v4767_v63, %v4629_v31  ;;  %v4766_v8 = vld [vmem:[%s5898_s21 + $0x64] sm:$0xf0] }
 0x910   : > { %3154 = vmatpush.bf16.msrb.mxu0 %v4632_v30 }
 0x913   : > { %v4956_v55 = vpop.permute.xlu0 %4955 }
 0x914   : > { %v4958_v48 = vunpack.i.h.bf16 %v4956_v55  ;;  %v4957_v53 = vunpack.i.l.bf16 %v4956_v55  ;;  %v4764_v55 = vld [vmem:[%s5898_s21 + $0x54] sm:$0xf0] }
 0x916   : > { %v2689_v40 = vsel %vm1360_vm9, %v6327_v62, %v4958_v48  ;;  %v2688_v19 = vsel %vm1360_vm9, %v6325_v61, %v4957_v53  ;;  %v6618_v62 = vld [vmem:[%s822_s24] ss:$0 sm:$0xff]  ;;  %v4613_v53 = vld [vmem:[%s5898_s21 + $0x58] sm:$0xf0] }
 0x923   : > { %v2463_v1 = vpop.xlane.xlu1 %2462 }
 0x924   : > { %5134 = vrcp.f32 %v2463_v1 }
 0x92a   : > { %v5135_v23 = vpop.eup %5134 }
 0x92b   : > { %v2479_v59 = vmul.f32 %v5135_v23, %v6554_v37 }
 0x92d   : > { %v2487_v24 = vpack.c.bf16 %v2479_v59, %v2479_v59 }
 0x92f   : > { %v2566_v49 = vunpack.c.l.b16 %v2487_v24 }
 0x931   : > { %v2567_v28 = vpack.c.b16 %v2566_v49, %v2565_v0 }
 0x933   : > { %4536 = vmatmul.msk.bf16.vlgmr.msrb.gmra.mxu1 %vm1479_vm10, %v2567_v28 }
 0x973   : > { %v2533_v60 = vpop.f32.mrf.mxu3 }
 0x977   : > { %v4936_v37 = vpop.permute.xlu1 %4935 }
 0x978   : > { %v4938_v22 = vunpack.i.h.bf16 %v4936_v37  ;;  %v4937_v33 = vunpack.i.l.bf16 %v4936_v37 }
 0x979   : > { %v2558_v10 = vpop.f32.mrf.mxu0 }
 0x97a   : > { %v2702_v6 = vsel %vm2701_vm12, %v2693_v43, %v4937_v33  ;;  %v2703_v56 = vsel %vm2701_vm12, %v2694_v34, %v4938_v22 }
 0x97b   : > { %v2710_v9 = vpack.c.bf16 %v2703_v56, %v2702_v6  ;;  %v2535_v14 = vpop.f32.mrf.mxu3 }
 0x97c   : > { %v4949_v13 = vpack.i.bf16 %v2535_v14, %v2533_v60 }
 0x97d   : > { %2790 = vmatmul.bf16.vlgmr.msrb.gmra.mxu2 %v2710_v9 }
 0x97e   : > { %4950 = vrot.lane.b32.xlu2 %v4949_v13, %s5604_s1 }
 0x97f   : > { %v4971_v37 = vpop.permute.xlu1 %4970 }
 0x980   : > { %v4973_v36 = vunpack.i.h.bf16 %v4971_v37  ;;  %v4972_v22 = vunpack.i.l.bf16 %v4971_v37  ;;  %v4589_v37 = vld [vmem:[%s5898_s21 + $0x28] sm:$0xf0] }
 0x981   : > { %v2560_v51 = vpop.f32.mrf.mxu0 }
 0x982   : > { %v4964_v57 = vpack.i.bf16 %v2560_v51, %v2558_v10  ;;  %v2691_v10 = vsel %vm1360_vm9, %v6344_v20, %v4973_v36  ;;  %v2690_v6 = vsel %vm1360_vm9, %v6342_v27, %v4972_v22  ;;  %v4768_v27 = vld [vmem:[%s5898_s21 + $0x74] sm:$0xf0] }
 0x984   : > { %4965 = vrot.lane.b32.xlu0 %v4964_v57, %s5604_s1 }
 0x986   : > { %4960 = vrot.lane.b32.xlu2 %v4959_v7, %s5605_s20 }
 0x98e   : > { %4975 = vrot.lane.b32.xlu2 %v4974_v18, %s5605_s20  ;;  %v2696_v18 = vsel %vm2692_vm11, %v2687_v58, %v4948_v4  ;;  %v4619_v58 = vld [vmem:[%s5898_s21 + $0x60] sm:$0xf] }
 0x9b0   : > { %v2583_v3 = vpop.f32.mrf.mxu1 }
 0x9b8   : > { %v2585_v29 = vpop.f32.mrf.mxu1 }
 0x9b9   : > { %v4979_v44 = vpack.i.bf16 %v2585_v29, %v2583_v3 }
 0x9bb   : > { %4980 = vrot.lane.b32.xlu0 %v4979_v44, %s5604_s1  ;;  %v4627_v44 = vld [vmem:[%s5898_s21 + $0x70] sm:$0xf] }
 0x9bc   : > { %v4628_v54 = vor.u32 %v4768_v27, %v4627_v44  ;;  %v4573_v44 = vld [vmem:[%s5898_s21 + $0x8] sm:$0xf0] }
 0x9be   : > { %3125 = vmatpush.bf16.msra.mxu3 %v4628_v54 }
 0x9d8   : > { %v4951_v26 = vpop.permute.xlu2 %4950 }
 0x9d9   : > { %v4953_v7 = vunpack.i.h.bf16 %v4951_v26  ;;  %v4952_v35 = vunpack.i.l.bf16 %v4951_v26 }
 0x9db   : > { %v2704_v25 = vsel %vm2701_vm12, %v2695_v39, %v4952_v35  ;;  %v2705_v32 = vsel %vm2701_vm12, %v2696_v18, %v4953_v7  ;;  %v4765_v7 = vld [vmem:[%s5898_s21 + $0x64] sm:$0xf]  ;;  %v4620_v35 = vor.u32 %v4766_v8, %v4619_v58  ;;  %v4621_v39 = vld [vmem:[%s5898_s21 + $0x68] sm:$0xf0] }
 0x9dc   : > { %v2711_v12 = vpack.c.bf16 %v2705_v32, %v2704_v25  ;;  %v4624_v18 = vor.u32 %v4765_v7, %v4621_v39 }
 0x9dd   : > { %3126 = vmatpush.bf16.msra.mxu3 %v4620_v35 }
 0x9de   : > { %2795 = vmatmul.bf16.gmra.mxu2 %v2711_v12  ;;  %3155 = vmatpush.bf16.msrb.mxu0 %v4624_v18  ;;  %v4611_v12 = vld [vmem:[%s5898_s21 + $0x50] sm:$0xf] }
 0x9df   : > { %v4612_v48 = vor.u32 %v4764_v55, %v4611_v12 }
 0x9e0   : > { %v4961_v50 = vpop.permute.xlu2 %4960 }
 0x9e1   : > { %v4963_v1 = vunpack.i.h.bf16 %v4961_v50  ;;  %v4962_v11 = vunpack.i.l.bf16 %v4961_v50  ;;  %v4763_v50 = vld [vmem:[%s5898_s21 + $0x54] sm:$0xf]  ;;  %3127 = vmatpush.bf16.msra.mxu3 %v4612_v48 }
 0x9e3   : > { %v2697_v59 = vsel %vm2692_vm11, %v2688_v19, %v4962_v11  ;;  %v2698_v24 = vsel %vm2692_vm11, %v2689_v40, %v4963_v1  ;;  %v5187_v1 = vld [vmem:[#allocation2 + $0x10] sm:$0xff] }
 0x9e4   : > { %v4603_v19 = vld [vmem:[%s5898_s21 + $0x40] sm:$0xf] }
 0x9e8   : > { %v4976_v46 = vpop.permute.xlu2 %4975 }
 0x9e9   : > { %v4978_v33 = vunpack.i.h.bf16 %v4976_v46  ;;  %v4977_v34 = vunpack.i.l.bf16 %v4976_v46 }
 0x9eb   : > { %v2699_v14 = vsel %vm2692_vm11, %v2690_v6, %v4977_v34  ;;  %v2700_v13 = vsel %vm2692_vm11, %v2691_v10, %v4978_v33  ;;  %v4579_v34 = vld [vmem:[%s5898_s21 + $0x10] sm:$0xf]  ;;  %v4755_v10 = vld [vmem:[%s5898_s21 + $0x14] sm:$0xf] }
 0x9f6   : > { %v4966_v42 = vpop.permute.xlu0 %4965 }
 0x9f7   : > { %v4968_v23 = vunpack.i.h.bf16 %v4966_v42  ;;  %v4967_v2 = vunpack.i.l.bf16 %v4966_v42  ;;  %v4616_v42 = vor.u32 %v4763_v50, %v4613_v53  ;;  %v5189_v53 = vld [vmem:[#allocation2 + $0x20] sm:$0xff] }
 0x9f9   : > { %v2706_v0 = vsel %vm2701_vm12, %v2697_v59, %v4967_v2  ;;  %v2707_v49 = vsel %vm2701_vm12, %v2698_v24, %v4968_v23  ;;  %3156 = vmatpush.bf16.msrb.mxu0 %v4616_v42  ;;  %v4762_v23 = vld [vmem:[%s5898_s21 + $0x44] sm:$0xf0]  ;;  %v4761_v2 = vld [vmem:[%s5898_s21 + $0x44] sm:$0xf]  ;;  %v4605_v24 = vld [vmem:[%s5898_s21 + $0x48] sm:$0xf0] }
 0x9fa   : > { %v2712_v28 = vpack.c.bf16 %v2707_v49, %v2706_v0  ;;  %v4604_v59 = vor.u32 %v4762_v23, %v4603_v19  ;;  %v4608_v0 = vor.u32 %v4761_v2, %v4605_v24  ;;  %v4595_v49 = vld [vmem:[%s5898_s21 + $0x30] sm:$0xf] }
 0x9fc   : > { %2800 = vmatmul.bf16.vlgmr.msrb.gmra.mxu3 %v2712_v28  ;;  %v4760_v28 = vld [vmem:[%s5898_s21 + $0x34] sm:$0xf0] }
 0x9fd   : > { %3128 = vmatpush.bf16.msra.mxu3 %v4604_v59  ;;  %3157 = vmatpush.bf16.msrb.mxu0 %v4608_v0 }
 0xa00   : > { %v2791_v47 = vpop.f32.mrf.mxu2 }
 0xa01   : > { %v2792_v61 = vadd.f32 %v6618_v62, %v2791_v47  ;;  %v4759_v47 = vld [vmem:[%s5898_s21 + $0x34] sm:$0xf] }
 0xa03   : > { %v6621_v45 = vadd.f32 %v5184_v17, %v2792_v61  ;;  %v4596_v61 = vor.u32 %v4760_v28, %v4595_v49  ;;  %v4597_v17 = vld [vmem:[%s5898_s21 + $0x38] sm:$0xf0] }
 0xa05   : > { %2821 = vadd.xlane.f32.xlu1 %v6621_v45  ;;  %v2845_v52 = vmul.f32 %v6621_v45, %v6621_v45  ;;  %3129 = vmatpush.bf16.msra.mxu3 %v4596_v61 }
 0xa07   : > { %2853 = vadd.xlane.f32.xlu0 %v2845_v52  ;;  %v4600_v52 = vor.u32 %v4759_v47, %v4597_v17 }
 0xa08   : > { %v2793_v60 = vpop.f32.mrf.mxu2 }
 0xa09   : > { %v2794_v38 = vadd.f32 %v6618_v62, %v2793_v60  ;;  %3158 = vmatpush.bf16.msrb.mxu0 %v4600_v52  ;;  %v4587_v60 = vld [vmem:[%s5898_s21 + $0x20] sm:$0xf] }
 0xa0b   : > { %v6627_v5 = vadd.f32 %v5185_v41, %v2794_v38  ;;  %v4758_v38 = vld [vmem:[%s5898_s21 + $0x24] sm:$0xf0]  ;;  %v4757_v41 = vld [vmem:[%s5898_s21 + $0x24] sm:$0xf] }
 0xa0c   : > { %v4592_v36 = vor.u32 %v4757_v41, %v4589_v37  ;;  %v6714_v37 = vld [vmem:[%s7451_s2] ss:$0 sm:$0xff] }
 0xa0d   : > { %2823 = vadd.xlane.f32.xlu2 %v6627_v5  ;;  %v2846_v15 = vmul.f32 %v6627_v5, %v6627_v5 }
 0xa0e   : > { %3159 = vmatpush.bf16.msrb.mxu0 %v4592_v36 }
 0xa0f   : > { %2855 = vadd.xlane.f32.xlu1 %v2846_v15  ;;  %v4588_v15 = vor.u32 %v4758_v38, %v4587_v60 }
 0xa11   : > { %3130 = vmatpush.bf16.msra.mxu3 %v4588_v15 }
 0xa2d   : > { %v4981_v43 = vpop.permute.xlu0 %4980 }
 0xa2e   : > { %v4983_v56 = vunpack.i.h.bf16 %v4981_v43  ;;  %v4982_v9 = vunpack.i.l.bf16 %v4981_v43  ;;  %v4756_v43 = vld [vmem:[%s5898_s21 + $0x14] sm:$0xf0] }
 0xa30   : > { %v2708_v51 = vsel %vm2701_vm12, %v2699_v14, %v4982_v9  ;;  %v2709_v57 = vsel %vm2701_vm12, %v2700_v13, %v4983_v56  ;;  %v4580_v9 = vor.u32 %v4756_v43, %v4579_v34  ;;  %v4581_v14 = vld [vmem:[%s5898_s21 + $0x18] sm:$0xf0] }
 0xa31   : > { %v2713_v3 = vpack.c.bf16 %v2709_v57, %v2708_v51  ;;  %v4584_v13 = vor.u32 %v4755_v10, %v4581_v14  ;;  %v4571_v57 = vld [vmem:[%s5898_s21] sm:$0xf] }
 0xa32   : > { %3131 = vmatpush.bf16.msra.mxu3 %v4580_v9  ;;  %v5190_v10 = vld [vmem:[#allocation2 + $0x28] sm:$0xff] }
 0xa33   : > { %2805 = vmatmul.bf16.gmra.mxu3 %v2713_v3  ;;  %v4754_v3 = vld [vmem:[%s5898_s21 + $0x4] sm:$0xf0]  ;;  %3160 = vmatpush.bf16.msrb.mxu0 %v4584_v13 }
 0xa34   : > { %v5191_v13 = vld [vmem:[#allocation2 + $0x38] sm:$0xff] }
 0xa61   : > { %v2796_v29 = vpop.f32.mrf.mxu2 }
 0xa62   : > { %v2797_v20 = vadd.f32 %v6618_v62, %v2796_v29  ;;  %v4753_v29 = vld [vmem:[%s5898_s21 + $0x4] sm:$0xf]  ;;  %s7450_s21 = scalar_lea.vmem [#allocation14], %s5866_s18 }
 0xa63   : > { %v4576_v54 = vor.u32 %v4753_v29, %v4573_v44  ;;  %v6708_v61 = vld [vmem:[%s7450_s21] ss:$0 sm:$0xff] }
 0xa64   : > { %v6645_v4 = vadd.f32 %v5186_v16, %v2797_v20  ;;  %v4572_v20 = vor.u32 %v4754_v3, %v4571_v57 }
 0xa65   : > { %3161 = vmatpush.bf16.msrb.mxu0 %v4576_v54 }
 0xa66   : > { %2825 = vadd.xlane.f32.xlu2 %v6645_v4  ;;  %v2847_v26 = vmul.f32 %v6645_v4, %v6645_v4  ;;  %3132 = vmatpush.bf16.msra.mxu3 %v4572_v20 }
 0xa68   : > { %2857 = vadd.xlane.f32.xlu1 %v2847_v26  ;;  %v5188_v26 = vld [vmem:[#allocation2 + $0x8] sm:$0xff] }
 0xa69   : > { %v2798_v25 = vpop.f32.mrf.mxu2 }
 0xa6a   : > { %v2799_v32 = vadd.f32 %v6618_v62, %v2798_v25 }
 0xa6c   : > { %v6659_v11 = vadd.f32 %v5187_v1, %v2799_v32 }
 0xa6e   : > { %2827 = vadd.xlane.f32.xlu0 %v6659_v11  ;;  %v2848_v40 = vmul.f32 %v6659_v11, %v6659_v11 }
 0xa70   : > { %2859 = vadd.xlane.f32.xlu2 %v2848_v40 }
 0xa78   : > { %v2822_v46 = vpop.xlane.xlu1 %2821 }
 0xa79   : > { %v6677_v22 = vmul.f32 %v2822_v46, %v6006_v21 }
 0xa7a   : > { %v2854_v33 = vpop.xlane.xlu0 %2853 }
 0xa7b   : > { %v2877_v6 = vmul.f32 %v6677_v22, %v6677_v22  ;;  %v2869_v56 = vmul.f32 %v2854_v33, %v6006_v21  ;;  %v2893_v28 = vsub.f32 %v6621_v45, %v6677_v22 }
 0xa7d   : > { %v2885_v51 = vsub.f32 %v2869_v56, %v2877_v6 }
 0xa7f   : > { %v2901_v27 = vadd.f32 1e-05, %v2885_v51  ;;  %v2801_v63 = vpop.f32.mrf.mxu3 }
 0xa80   : > { %v2802_v31 = vadd.f32 %v6618_v62, %v2801_v63  ;;  %v2824_v16 = vpop.xlane.xlu2 %2823 }
 0xa81   : > { %5136 = vrsqrt.f32 %v2901_v27  ;;  %v2838_v30 = vmul.f32 %v2824_v16, %v6006_v21  ;;  %vm2915_vm14 = vweird.f32 %v2901_v27 }
 0xa82   : > { %v6692_v58 = vadd.f32 %v5188_v26, %v2802_v31  ;;  %v2856_v8 = vpop.xlane.xlu1 %2855 }
 0xa83   : > { %v2878_v7 = vmul.f32 %v2838_v30, %v2838_v30  ;;  %v2870_v35 = vmul.f32 %v2856_v8, %v6006_v21  ;;  %v2894_v60 = vsub.f32 %v6627_v5, %v2838_v30 }
 0xa84   : > { %2829 = vadd.xlane.f32.xlu0 %v6692_v58  ;;  %v2849_v39 = vmul.f32 %v6692_v58, %v6692_v58 }
 0xa85   : > { %v2886_v18 = vsub.f32 %v2870_v35, %v2878_v7 }
 0xa86   : > { %2861 = vadd.xlane.f32.xlu2 %v2849_v39 }
 0xa87   : > { %v5137_v25 = vpop.eup %5136  ;;  %v2902_v32 = vadd.f32 1e-05, %v2886_v18  ;;  %v2803_v12 = vpop.f32.mrf.mxu3 }
 0xa88   : > { %v2910_v55 = vmul.f32 %v5137_v25, %v2901_v27  ;;  %v2804_v50 = vadd.f32 %v6618_v62, %v2803_v12  ;;  %vm2916_vm13 = vweird.f32 %v5137_v25 }
 0xa89   : > { %5138 = vrsqrt.f32 %v2902_v32  ;;  %vm2917_vm15 = vmor %vm2915_vm14, %vm2916_vm13  ;;  %vm2925_vm1 = vweird.f32 %v2902_v32 }
 0xa8a   : > { %v2911_v48 = vmul.f32 %v5137_v25, %v2910_v55  ;;  %v6699_v1 = vadd.f32 %v5189_v53, %v2804_v50 }
 0xa8c   : > { %v2912_v42 = vmul.f32 0.5, %v2911_v48  ;;  %2831 = vadd.xlane.f32.xlu1 %v6699_v1  ;;  %v2850_v40 = vmul.f32 %v6699_v1, %v6699_v1 }
 0xa8e   : > { %v2913_v19 = vsub.f32 1.5, %v2912_v42  ;;  %2863 = vadd.xlane.f32.xlu0 %v2850_v40 }
 0xa8f   : > { %v5139_v23 = vpop.eup %5138 }
 0xa90   : > { %v2914_v2 = vmul.f32 %v5137_v25, %v2913_v19  ;;  %v2920_v59 = vmul.f32 %v5139_v23, %v2902_v32  ;;  %vm2926_vm0 = vweird.f32 %v5139_v23 }
 0xa91   : > { %vm2927_vm2 = vmor %vm2925_vm1, %vm2926_vm0 }
 0xa92   : > { %v2921_v24 = vmul.f32 %v5139_v23, %v2920_v59  ;;  %v2918_v0 = vsel %vm2917_vm15, %v5137_v25, %v2914_v2 }
 0xa93   : > { %v2989_v17 = vmul.f32 %v2918_v0, %v2893_v28 }
 0xa94   : > { %v2922_v49 = vmul.f32 0.5, %v2921_v24 }
 0xa95   : > { %v3000_v41 = vmul.f32 %v6708_v61, %v2989_v17 }
 0xa96   : > { %v2923_v47 = vsub.f32 1.5, %v2922_v49 }
 0xa97   : > { %v3011_v36 = vadd.f32 %v6714_v37, %v3000_v41 }
 0xa98   : > { %v2924_v52 = vmul.f32 %v5139_v23, %v2923_v47 }
 0xa9a   : > { %v2928_v38 = vsel %vm2927_vm2, %v5139_v23, %v2924_v52 }
 0xa9b   : > { %v2990_v15 = vmul.f32 %v2928_v38, %v2894_v60 }
 0xa9d   : > { %v3001_v46 = vmul.f32 %v6708_v61, %v2990_v15 }
 0xa9f   : > { %v3012_v22 = vadd.f32 %v6714_v37, %v3001_v46 }
 0xaa1   : > { %v3019_v33 = vpack.c.bf16 %v3012_v22, %v3011_v36 }
 0xaa3   : > { %3133 = vmatmul.bf16.vlgmr.msra.gmra.mxu3 %v3019_v33  ;;  %3162 = vmatmul.bf16.vlgmr.msrb.gmra.mxu0 %v3019_v33 }
 0xab6   : > { %v2806_v34 = vpop.f32.mrf.mxu3 }
 0xab7   : > { %v2807_v43 = vadd.f32 %v6618_v62, %v2806_v34 }
 0xab9   : > { %v6720_v6 = vadd.f32 %v5190_v10, %v2807_v43 }
 0xabb   : > { %2833 = vadd.xlane.f32.xlu1 %v6720_v6  ;;  %v2851_v56 = vmul.f32 %v6720_v6, %v6720_v6 }
 0xabd   : > { %2865 = vadd.xlane.f32.xlu0 %v2851_v56 }
 0xabe   : > { %v2808_v9 = vpop.f32.mrf.mxu3 }
 0xabf   : > { %v2809_v14 = vadd.f32 %v6618_v62, %v2808_v9 }
 0xac1   : > { %v6726_v51 = vadd.f32 %v5191_v13, %v2809_v14 }
 0xac3   : > { %2835 = vadd.xlane.f32.xlu2 %v6726_v51  ;;  %v2852_v57 = vmul.f32 %v6726_v51, %v6726_v51 }
 0xac5   : > { %2867 = vadd.xlane.f32.xlu1 %v2852_v57 }
 0xad9   : > { %v2826_v3 = vpop.xlane.xlu2 %2825 }
 0xada   : > { %v2839_v29 = vmul.f32 %v2826_v3, %v6006_v21 }
 0xadb   : > { %v2858_v20 = vpop.xlane.xlu1 %2857 }
 0xadc   : > { %v2879_v44 = vmul.f32 %v2839_v29, %v2839_v29  ;;  %v2871_v27 = vmul.f32 %v2858_v20, %v6006_v21  ;;  %v2895_v40 = vsub.f32 %v6645_v4, %v2839_v29 }
 0xade   : > { %v2887_v63 = vsub.f32 %v2871_v27, %v2879_v44 }
 0xae0   : > { %v2903_v54 = vadd.f32 1e-05, %v2887_v63 }
 0xae1   : > { %v2828_v31 = vpop.xlane.xlu0 %2827 }
 0xae2   : > { %5140 = vrsqrt.f32 %v2903_v54  ;;  %v2840_v62 = vmul.f32 %v2828_v31, %v6006_v21  ;;  %vm2935_vm4 = vweird.f32 %v2903_v54 }
 0xae3   : > { %v2860_v16 = vpop.xlane.xlu2 %2859 }
 0xae4   : > { %v2880_v30 = vmul.f32 %v2840_v62, %v2840_v62  ;;  %v2872_v26 = vmul.f32 %v2860_v16, %v6006_v21  ;;  %v2896_v49 = vsub.f32 %v6659_v11, %v2840_v62 }
 0xae6   : > { %v2888_v8 = vsub.f32 %v2872_v26, %v2880_v30 }
 0xae8   : > { %v5141_v7 = vpop.eup %5140  ;;  %v2904_v35 = vadd.f32 1e-05, %v2888_v8 }
 0xae9   : > { %v2930_v39 = vmul.f32 %v5141_v7, %v2903_v54  ;;  %vm2936_vm3 = vweird.f32 %v5141_v7 }
 0xaea   : > { %5142 = vrsqrt.f32 %v2904_v35  ;;  %vm2937_vm5 = vmor %vm2935_vm4, %vm2936_vm3  ;;  %vm2945_vm7 = vweird.f32 %v2904_v35 }
 0xaeb   : > { %v2931_v18 = vmul.f32 %v5141_v7, %v2930_v39  ;;  %v3039_v39 = vld [vmem:[%s5919_s12] sm:$0x3] }
 0xaed   : > { %v2932_v25 = vmul.f32 0.5, %v2931_v18 }
 0xaef   : > { %v2933_v32 = vsub.f32 1.5, %v2932_v25 }
 0xaf0   : > { %v5143_v12 = vpop.eup %5142 }
 0xaf1   : > { %v2934_v55 = vmul.f32 %v5141_v7, %v2933_v32  ;;  %v2940_v50 = vmul.f32 %v5143_v12, %v2904_v35  ;;  %vm2946_vm6 = vweird.f32 %v5143_v12 }
 0xaf2   : > { %vm2947_vm8 = vmor %vm2945_vm7, %vm2946_vm6 }
 0xaf3   : > { %v2941_v48 = vmul.f32 %v5143_v12, %v2940_v50  ;;  %v2938_v53 = vsel %vm2937_vm5, %v5141_v7, %v2934_v55 }
 0xaf4   : > { %v2991_v59 = vmul.f32 %v2938_v53, %v2895_v40 }
 0xaf5   : > { %v2942_v42 = vmul.f32 0.5, %v2941_v48 }
 0xaf6   : > { %v3002_v38 = vmul.f32 %v6708_v61, %v2991_v59 }
 0xaf7   : > { %v2943_v19 = vsub.f32 1.5, %v2942_v42  ;;  %v2830_v23 = vpop.xlane.xlu0 %2829 }
 0xaf8   : > { %v2841_v2 = vmul.f32 %v2830_v23, %v6006_v21  ;;  %v3013_v22 = vadd.f32 %v6714_v37, %v3002_v38 }
 0xaf9   : > { %v2944_v24 = vmul.f32 %v5143_v12, %v2943_v19  ;;  %v2862_v0 = vpop.xlane.xlu2 %2861  ;;  %v6760_v19 = vperm.slane %v3039_v39, 0 }
 0xafa   : > { %v2881_v28 = vmul.f32 %v2841_v2, %v2841_v2  ;;  %v2873_v47 = vmul.f32 %v2862_v0, %v6006_v21  ;;  %v2897_v16 = vsub.f32 %v6692_v58, %v2841_v2 }
 0xafb   : > { %v2948_v17 = vsel %vm2947_vm8, %v5143_v12, %v2944_v24  ;;  %v6750_v12 = vperm.slane %v3039_v39, 1 }
 0xafc   : > { %v2889_v52 = vsub.f32 %v2873_v47, %v2881_v28  ;;  %v2992_v60 = vmul.f32 %v2948_v17, %v2896_v49 }
 0xafe   : > { %v2905_v41 = vadd.f32 1e-05, %v2889_v52  ;;  %v3003_v15 = vmul.f32 %v6708_v61, %v2992_v60 }
 0xaff   : > { %v2832_v46 = vpop.xlane.xlu1 %2831 }
 0xb00   : > { %5144 = vrsqrt.f32 %v2905_v41  ;;  %v2842_v36 = vmul.f32 %v2832_v46, %v6006_v21  ;;  %v3014_v33 = vadd.f32 %v6714_v37, %v3003_v15  ;;  %vm2955_vm10 = vweird.f32 %v2905_v41 }
 0xb01   : > { %v2864_v34 = vpop.xlane.xlu0 %2863 }
 0xb02   : > { %v2882_v43 = vmul.f32 %v2842_v36, %v2842_v36  ;;  %v2874_v10 = vmul.f32 %v2864_v34, %v6006_v21  ;;  %v3020_v56 = vpack.c.bf16 %v3014_v33, %v3013_v22  ;;  %v2898_v7 = vsub.f32 %v6699_v1, %v2842_v36 }
 0xb04   : > { %v2890_v9 = vsub.f32 %v2874_v10, %v2882_v43  ;;  %3138 = vmatmul.bf16.gmra.mxu3 %v3020_v56  ;;  %3167 = vmatmul.bf16.gmra.mxu0 %v3020_v56 }
 0xb06   : > { %v5145_v14 = vpop.eup %5144  ;;  %v2906_v13 = vadd.f32 1e-05, %v2890_v9 }
 0xb07   : > { %v2950_v57 = vmul.f32 %v5145_v14, %v2905_v41  ;;  %vm2956_vm9 = vweird.f32 %v5145_v14 }
 0xb08   : > { %5146 = vrsqrt.f32 %v2906_v13  ;;  %vm2957_vm11 = vmor %vm2955_vm10, %vm2956_vm9  ;;  %vm2965_vm13 = vweird.f32 %v2906_v13 }
 0xb09   : > { %v2951_v3 = vmul.f32 %v5145_v14, %v2950_v57 }
 0xb0b   : > { %v2952_v29 = vmul.f32 0.5, %v2951_v3 }
 0xb0d   : > { %v2953_v20 = vsub.f32 1.5, %v2952_v29 }
 0xb0e   : > { %v5147_v44 = vpop.eup %5146 }
 0xb0f   : > { %v2954_v27 = vmul.f32 %v5145_v14, %v2953_v20  ;;  %v2960_v63 = vmul.f32 %v5147_v44, %v2906_v13  ;;  %vm2966_vm12 = vweird.f32 %v5147_v44 }
 0xb10   : > { %vm2967_vm14 = vmor %vm2965_vm13, %vm2966_vm12 }
 0xb11   : > { %v2961_v54 = vmul.f32 %v5147_v44, %v2960_v63  ;;  %v2958_v31 = vsel %vm2957_vm11, %v5145_v14, %v2954_v27 }
 0xb12   : > { %v2993_v26 = vmul.f32 %v2958_v31, %v2897_v16 }
 0xb13   : > { %v2962_v62 = vmul.f32 0.5, %v2961_v54 }
 0xb14   : > { %v3004_v25 = vmul.f32 %v6708_v61, %v2993_v26 }
 0xb15   : > { %v2963_v30 = vsub.f32 1.5, %v2962_v62 }
 0xb16   : > { %v3015_v55 = vadd.f32 %v6714_v37, %v3004_v25 }
 0xb17   : > { %v2964_v8 = vmul.f32 %v5147_v44, %v2963_v30 }
 0xb19   : > { %v2968_v35 = vsel %vm2967_vm14, %v5147_v44, %v2964_v8 }
 0xb1a   : > { %v2994_v18 = vmul.f32 %v2968_v35, %v2898_v7  ;;  %v4784_v7 = vld [vmem:[%s5901_s23 + $0x78] sm:$0xff] }
 0xb1b   : > { %4056 = vmatpush.bf16.msra.mxu2 %v4784_v7 }
 0xb1c   : > { %v3005_v32 = vmul.f32 %v6708_v61, %v2994_v18 }
 0xb1e   : > { %v3016_v50 = vadd.f32 %v6714_v37, %v3005_v32 }
 0xb20   : > { %v3163_v48 = vpop.f32.mrf.mxu0  ;;  %v3021_v53 = vpack.c.bf16 %v3016_v50, %v3015_v55 }
 0xb21   : > { %v6755_v42 = vadd.f32 %v3163_v48, %v6750_v12 }
 0xb22   : > { %3143 = vmatmul.bf16.gmra.mxu3 %v3021_v53  ;;  %3172 = vmatmul.bf16.gmra.mxu0 %v3021_v53 }
 0xb23   : > { %v6758_v40 = vmul.f32 0.70710677, %v6755_v42 }
 0xb25   : > { %v3255_v23 = vmul.f32 %v6758_v40, %v6758_v40 }
 0xb26   : > { %v3134_v2 = vpop.f32.mrf.mxu3 }
 0xb27   : > { %v6764_v59 = vmin.f32 %v3255_v23, 16.0  ;;  %v6767_v24 = vadd.f32 %v3134_v2, %v6760_v19 }
 0xb28   : > { %v3165_v0 = vpop.f32.mrf.mxu0 }
 0xb29   : > { %v3257_v49 = vmul.f32 2.1237322e-06, %v6764_v59  ;;  %v3268_v28 = vmul.f32 3.8918573e-05, %v6764_v59  ;;  %v6772_v47 = vadd.f32 %v3165_v0, %v6750_v12  ;;  %v6775_v17 = vmul.f32 0.70710677, %v6767_v24 }
 0xb2b   : > { %v3258_v52 = vadd.f32 0.00028619796, %v3257_v49  ;;  %v3269_v60 = vadd.f32 0.001143296, %v3268_v28  ;;  %v3215_v38 = vmul.f32 %v6775_v17, %v6775_v17  ;;  %v6780_v41 = vmul.f32 0.70710677, %v6772_v47 }
 0xb2c   : > { %v4783_v49 = vld [vmem:[%s5901_s23 + $0x70] sm:$0xff] }
 0xb2d   : > { %v3270_v15 = vmul.f32 %v3269_v60, %v6764_v59  ;;  %v6783_v46 = vmin.f32 %v3215_v38, 16.0  ;;  %v3335_v36 = vmul.f32 %v6780_v41, %v6780_v41  ;;  %v3259_v34 = vmul.f32 %v3258_v52, %v6764_v59  ;;  %4057 = vmatpush.bf16.msra.mxu2 %v4783_v49 }
 0xb2e   : > { %v2834_v22 = vpop.xlane.xlu1 %2833  ;;  %v3136_v33 = vpop.f32.mrf.mxu3 }
 0xb2f   : > { %v3271_v43 = vadd.f32 0.014752088, %v3270_v15  ;;  %v3228_v10 = vmul.f32 3.8918573e-05, %v6783_v46  ;;  %v6789_v56 = vmin.f32 %v3335_v36, 16.0  ;;  %v6792_v9 = vmul.f32 %v2834_v22, %v6006_v21  ;;  %v4776_v36 = vld [vmem:[%s5901_s23 + $0x38] sm:$0xff] }
 0xb30   : > { %v6796_v13 = vadd.f32 %v3136_v33, %v6760_v19  ;;  %v2866_v57 = vpop.xlane.xlu0 %2865  ;;  %v3217_v3 = vmul.f32 2.1237322e-06, %v6783_v46  ;;  %v3260_v44 = vadd.f32 0.0036580483, %v3259_v34  ;;  %4027 = vmatpush.bf16.msra.mxu1 %v4776_v36 }
 0xb31   : > { %v3272_v14 = vmul.f32 %v3271_v43, %v6764_v59  ;;  %v3229_v29 = vadd.f32 0.001143296, %v3228_v10  ;;  %v3337_v20 = vmul.f32 2.1237322e-06, %v6789_v56  ;;  %v3348_v63 = vmul.f32 3.8918573e-05, %v6789_v56 }
 0xb32   : > { %v2883_v62 = vmul.f32 %v6792_v9, %v6792_v9  ;;  %v2875_v16 = vmul.f32 %v2866_v57, %v6006_v21  ;;  %v6807_v8 = vmul.f32 0.70710677, %v6796_v13  ;;  %v3218_v35 = vadd.f32 0.00028619796, %v3217_v3 }
 0xb33   : > { %v3273_v27 = vadd.f32 0.112945676, %v3272_v14  ;;  %v3230_v54 = vmul.f32 %v3229_v29, %v6783_v46  ;;  %v3338_v31 = vadd.f32 0.00028619796, %v3337_v20  ;;  %v3349_v26 = vadd.f32 0.001143296, %v3348_v63 }
 0xb34   : > { %v3295_v32 = vmul.f32 %v6807_v8, %v6807_v8  ;;  %v2891_v48 = vsub.f32 %v2875_v16, %v2883_v62  ;;  %v3261_v53 = vmul.f32 %v3260_v44, %v6764_v59  ;;  %v3219_v28 = vmul.f32 %v3218_v35, %v6783_v46  ;;  %v4782_v14 = vld [vmem:[%s5901_s23 + $0x68] sm:$0xff]  ;;  %v4775_v44 = vld [vmem:[%s5901_s23 + $0x30] sm:$0xff]  ;;  %v4781_v16 = vld [vmem:[%s5901_s23 + $0x60] sm:$0xff] }
 0xb35   : > { %v3274_v30 = vmul.f32 %v3273_v27, %v6764_v59  ;;  %v3231_v39 = vadd.f32 0.014752088, %v3230_v54  ;;  %v3350_v25 = vmul.f32 %v3349_v26, %v6789_v56  ;;  %v3339_v50 = vmul.f32 %v3338_v31, %v6789_v56  ;;  %4058 = vmatpush.bf16.msra.mxu2 %v4782_v14  ;;  %4028 = vmatpush.bf16.msra.mxu1 %v4775_v44 }
 0xb36   : > { %v6817_v0 = vmin.f32 %v3295_v32, 16.0  ;;  %v6827_v34 = vadd.f32 1e-05, %v2891_v48  ;;  %v3262_v43 = vadd.f32 0.05243302, %v3261_v53  ;;  %v4780_v48 = vld [vmem:[%s5901_s23 + $0x58] sm:$0xff] }
 0xb37   : > { %v3275_v18 = vadd.f32 0.4994258, %v3274_v30  ;;  %v3232_v55 = vmul.f32 %v3231_v39, %v6783_v46  ;;  %v3351_v2 = vadd.f32 0.014752088, %v3350_v25  ;;  %v3340_v33 = vadd.f32 0.0036580483, %v3339_v50 }
 0xb38   : > { %v3297_v15 = vmul.f32 2.1237322e-06, %v6817_v0  ;;  %v3308_v10 = vmul.f32 3.8918573e-05, %v6817_v0  ;;  %v3220_v57 = vadd.f32 0.0036580483, %v3219_v28  ;;  %v3263_v54 = vmul.f32 %v3262_v43, %v6764_v59 }
 0xb39   : > { %v3276_v23 = vmul.f32 %v3275_v18, %v6764_v59  ;;  %v3233_v52 = vadd.f32 0.112945676, %v3232_v55  ;;  %v3352_v38 = vmul.f32 %v3351_v2, %v6789_v56  ;;  %v3341_v63 = vmul.f32 %v3340_v33, %v6789_v56  ;;  %4059 = vmatpush.bf16.msra.mxu2 %v4781_v16  ;;  %v4774_v25 = vld [vmem:[%s5901_s23 + $0x28] sm:$0xff] }
 0xb3a   : > { %v3298_v20 = vadd.f32 0.00028619796, %v3297_v15  ;;  %v3309_v62 = vadd.f32 0.001143296, %v3308_v10  ;;  %v3221_v35 = vmul.f32 %v3220_v57, %v6783_v46  ;;  %v3264_v50 = vadd.f32 0.18741608, %v3263_v54  ;;  %4029 = vmatpush.bf16.msra.mxu1 %v4774_v25 }
 0xb3b   : > { %v6821_v60 = vadd.f32 1.0, %v3276_v23  ;;  %v3234_v22 = vmul.f32 %v3233_v52, %v6783_v46  ;;  %v3353_v29 = vadd.f32 0.112945676, %v3352_v38  ;;  %v3342_v55 = vadd.f32 0.05243302, %v3341_v63  ;;  %v2836_v38 = vpop.xlane.xlu2 %2835  ;;  %v4773_v15 = vld [vmem:[%s5901_s23 + $0x20] sm:$0xff] }
 0xb3c   : > { %v3299_v26 = vmul.f32 %v3298_v20, %v6817_v0  ;;  %v3310_v18 = vmul.f32 %v3309_v62, %v6817_v0  ;;  %v3222_v52 = vadd.f32 0.05243302, %v3221_v35  ;;  %v3265_v10 = vmul.f32 %v3264_v50, %v6764_v59  ;;  %v4772_v62 = vld [vmem:[%s5901_s23 + $0x18] sm:$0xff] }
 0xb3d   : > { %5148 = vrcp.f32 %v6821_v60  ;;  %v3235_v3 = vadd.f32 0.4994258, %v3234_v22  ;;  %v3354_v31 = vmul.f32 %v3353_v29, %v6789_v56  ;;  %4060 = vmatpush.bf16.msra.mxu2 %v4780_v48  ;;  %v3343_v22 = vmul.f32 %v3342_v55, %v6789_v56  ;;  %v4779_v29 = vld [vmem:[%s5901_s23 + $0x50] sm:$0xff]  ;;  %v4778_v55 = vld [vmem:[%s5901_s23 + $0x48] sm:$0xff] }
 0xb3e   : > { %5150 = vrsqrt.f32 %v6827_v34  ;;  %v3300_v49 = vadd.f32 0.0036580483, %v3299_v26  ;;  %v3311_v28 = vadd.f32 0.014752088, %v3310_v18  ;;  %v3289_v14 = vand.u32 2147483648, %v6821_v60  ;;  %4030 = vmatpush.bf16.msra.mxu1 %v4773_v15 }
 0xb3f   : > { %v3236_v27 = vmul.f32 %v3235_v3, %v6783_v46  ;;  %v3355_v39 = vadd.f32 0.4994258, %v3354_v31  ;;  %v2868_v3 = vpop.xlane.xlu1 %2867  ;;  %v6872_v59 = vmul.f32 %v2836_v38, %v6006_v21  ;;  %vm3283_vm0 = vweird.f32 %v6821_v60 }
 0xb40   : > { %v3312_v43 = vmul.f32 %v3311_v28, %v6817_v0  ;;  %v3287_v63 = vand.u32 2147483647, %v6821_v60  ;;  %v3223_v54 = vmul.f32 %v3222_v52, %v6783_v46  ;;  %v3344_v26 = vadd.f32 0.18741608, %v3343_v22  ;;  %v4777_v28 = vld [vmem:[%s5901_s23 + $0x40] sm:$0xff] }
 0xb41   : > { %v6839_v30 = vadd.f32 1.0, %v3236_v27  ;;  %v3356_v2 = vmul.f32 %v3355_v39, %v6789_v56  ;;  %v3301_v27 = vmul.f32 %v3300_v49, %v6817_v0  ;;  %4061 = vmatpush.bf16.msra.mxu2 %v4779_v29  ;;  %v2876_v39 = vmul.f32 %v2868_v3, %v6006_v21  ;;  %v4771_v49 = vld [vmem:[%s5901_s23 + $0x10] sm:$0xff] }
 0xb42   : > { %v3313_v35 = vadd.f32 0.112945676, %v3312_v43  ;;  %v3290_v25 = vor.u32 1.1754944e-38, %v3289_v14  ;;  %4031 = vmatpush.bf16.msra.mxu1 %v4772_v62  ;;  %vm3288_vm2 = vcmp.eq.f32.partialorder %v3287_v63, 8.507059e+37  ;;  %v3224_v21 = vadd.f32 0.18741608, %v3223_v54 }
 0xb43   : > { %v6842_v7 = vpop.eup %5148  ;;  %5152 = vrcp.f32 %v6839_v30  ;;  %v6857_v33 = vadd.f32 1.0, %v3356_v2  ;;  %v3302_v48 = vadd.f32 0.05243302, %v3301_v27  ;;  %v2884_v2 = vmul.f32 %v6872_v59, %v6872_v59  ;;  %v4770_v14 = vld [vmem:[%s5901_s23 + $0x8] sm:$0xff] }
 0xb44   : > { %v3279_v32 = vmul.f32 %v6842_v7, %v6821_v60  ;;  %v6851_v53 = vpop.eup %5150  ;;  %vm3284_vm15 = vweird.f32 %v6842_v7  ;;  %v3266_v60 = vadd.f32 1.1283791, %v3265_v10  ;;  %v3345_v38 = vmul.f32 %v3344_v26, %v6789_v56 }
 0xb45   : > { %v2970_v57 = vmul.f32 %v6851_v53, %v6827_v34  ;;  %5154 = vrcp.f32 %v6857_v33  ;;  %vm6882_vm1 = vmor %vm3283_vm0, %vm3284_vm15  ;;  %4062 = vmatpush.bf16.msra.mxu2 %v4778_v55  ;;  %v3303_v3 = vmul.f32 %v3302_v48, %v6817_v0  ;;  %v3225_v56 = vmul.f32 %v3224_v21, %v6783_v46 }
 0xb46   : > { %v3280_v23 = vsub.f32 1.0, %v3279_v32  ;;  %v3267_v22 = vmul.f32 %v3266_v60, %v6758_v40  ;;  %4032 = vmatpush.bf16.msra.mxu1 %v4771_v49  ;;  %v3346_v40 = vadd.f32 1.1283791, %v3345_v38  ;;  %v3369_v54 = vand.u32 2147483648, %v6857_v33 }
 0xb47   : > { %v2971_v32 = vmul.f32 %v6851_v53, %v2970_v57  ;;  %v3367_v16 = vand.u32 2147483647, %v6857_v33  ;;  %v3304_v46 = vadd.f32 0.18741608, %v3303_v3  ;;  %vm3363_vm5 = vweird.f32 %v6857_v33 }
 0xb48   : > { %v3281_v36 = vmul.f32 %v6842_v7, %v3280_v23  ;;  %v3314_v23 = vmul.f32 %v3313_v35, %v6817_v0  ;;  %v4769_v35 = vld [vmem:[%s5901_s23] sm:$0xff]  ;;  %vm3243_vm6 = vweird.f32 %v6839_v30  ;;  %v3247_v55 = vand.u32 2147483647, %v6839_v30 }
 0xb49   : > { %v6866_v20 = vpop.eup %5152  ;;  %v2972_v10 = vmul.f32 0.5, %v2971_v32  ;;  %4063 = vmatpush.bf16.msra.mxu2 %v4777_v28  ;;  %v3226_v32 = vadd.f32 1.1283791, %v3225_v56  ;;  %vm3368_vm9 = vcmp.eq.f32.partialorder %v3367_v16, 8.507059e+37  ;;  %vm2976_vm10 = vweird.f32 %v6851_v53 }
 0xb4a   : > { %v3282_v44 = vadd.f32 %v6842_v7, %v3281_v36  ;;  %v3239_v31 = vmul.f32 %v6866_v20, %v6839_v30  ;;  %v3315_v15 = vadd.f32 0.4994258, %v3314_v23  ;;  %v2892_v36 = vsub.f32 %v2876_v39, %v2884_v2  ;;  %4033 = vmatpush.bf16.msra.mxu1 %v4770_v14 }
 0xb4b   : > { %v5155_v52 = vpop.eup %5154  ;;  %v2973_v26 = vsub.f32 1.5, %v2972_v10  ;;  %vm3244_vm4 = vweird.f32 %v6866_v20  ;;  %v3347_v23 = vmul.f32 %v3346_v40, %v6780_v41  ;;  %v3305_v49 = vmul.f32 %v3304_v46, %v6817_v0 }
 0xb4c   : > { %v3286_v18 = vsel %vm6882_vm1, %v6842_v7, %v3282_v44  ;;  %v3240_v50 = vsub.f32 1.0, %v3239_v31  ;;  %v3359_v43 = vmul.f32 %v5155_v52, %v6857_v33  ;;  %v3316_v29 = vmul.f32 %v3315_v15, %v6817_v0  ;;  %vm6921_vm8 = vmor %vm3243_vm6, %vm3244_vm4 }
 0xb4d   : > { %v3291_v7 = vsel %vm3288_vm2, %v3290_v25, %v3286_v18  ;;  %v6904_v44 = vadd.f32 1e-05, %v2892_v36  ;;  %vm3364_vm3 = vweird.f32 %v5155_v52  ;;  %v3249_v18 = vand.u32 2147483648, %v6839_v30 }
 0xb4e   : > { %v3241_v57 = vmul.f32 %v6866_v20, %v3240_v50  ;;  %v3292_v27 = vmul.f32 %v3291_v7, %v3267_v22  ;;  %v3360_v63 = vsub.f32 1.0, %v3359_v43  ;;  %v6908_v31 = vadd.f32 1.0, %v3316_v29  ;;  %vm3365_vm7 = vmor %vm3363_vm5, %vm3364_vm3  ;;  %4034 = vmatpush.bf16.msra.mxu1 %v4769_v35 }
 0xb4f   : > { %5156 = vrsqrt.f32 %v6904_v44  ;;  %v3370_v50 = vor.u32 1.1754944e-38, %v3369_v54  ;;  %v2974_v28 = vmul.f32 %v6851_v53, %v2973_v26  ;;  %v3250_v38 = vor.u32 1.1754944e-38, %v3249_v18 }
 0xb50   : > { %v3361_v62 = vmul.f32 %v5155_v52, %v3360_v63  ;;  %v3242_v39 = vadd.f32 %v6866_v20, %v3241_v57  ;;  %5158 = vrcp.f32 %v6908_v31  ;;  %v4634_v60 = vclamps-f32 %v3292_v27, 1.0 }
 0xb51   : > { %v3184_v36 = vmul.f32 0.5, %v6755_v42  ;;  %vm3248_vm11 = vcmp.eq.f32.partialorder %v3247_v55, 8.507059e+37  ;;  %v3186_v22 = vmul.f32 0.5, %v6772_v47  ;;  %vm2975_vm12 = vweird.f32 %v6827_v34 }
 0xb52   : > { %v3362_v25 = vadd.f32 %v5155_v52, %v3361_v62  ;;  %v3246_v21 = vsel %vm6921_vm8, %v6866_v20, %v3242_v39  ;;  %v3856_v7 = vadd.f32 1.0, %v4634_v60  ;;  %vm6939_vm13 = vmor %vm2975_vm12, %vm2976_vm10  ;;  %v3227_v57 = vmul.f32 %v3226_v32, %v6775_v17 }
 0xb53   : > { %v3251_v43 = vsel %vm3248_vm11, %v3250_v38, %v3246_v21  ;;  %v2899_v42 = vsub.f32 %v6720_v6, %v6792_v9  ;;  %v3306_v3 = vadd.f32 1.1283791, %v3305_v49  ;;  %v2978_v47 = vsel %vm6939_vm13, %v6851_v53, %v2974_v28 }
 0xb54   : > { %v3366_v2 = vsel %vm3365_vm7, %v5155_v52, %v3362_v25  ;;  %v3872_v34 = vmul.f32 %v3856_v7, %v3184_v36  ;;  %v3252_v63 = vmul.f32 %v3251_v43, %v3227_v57  ;;  %v3327_v40 = vand.u32 2147483647, %v6908_v31 }
 0xb55   : > { %v5157_v33 = vpop.eup %5156  ;;  %v3371_v30 = vsel %vm3368_vm9, %v3370_v50, %v3366_v2  ;;  %v3329_v54 = vand.u32 2147483648, %v6908_v31  ;;  %vm2985_vm0 = vweird.f32 %v6904_v44  ;;  %v2995_v9 = vmul.f32 %v2978_v47, %v2899_v42 }
 0xb56   : > { %v3372_v15 = vmul.f32 %v3371_v30, %v3347_v23  ;;  %v2980_v41 = vmul.f32 %v5157_v33, %v6904_v44  ;;  %v5159_v52 = vpop.eup %5158  ;;  %vm2986_vm14 = vweird.f32 %v5157_v33  ;;  %vm3323_vm1 = vweird.f32 %v6908_v31 }
 0xb57   : > { %v3319_v10 = vmul.f32 %v5159_v52, %v6908_v31  ;;  %vm3324_vm15 = vweird.f32 %v5159_v52  ;;  %vm2987_vm2 = vmor %vm2985_vm0, %vm2986_vm14  ;;  %v3307_v39 = vmul.f32 %v3306_v3, %v6807_v8  ;;  %v3330_v46 = vor.u32 1.1754944e-38, %v3329_v54 }
 0xb58   : > { %v4636_v20 = vclamps-f32 %v3372_v15, 1.0  ;;  %v2981_v14 = vmul.f32 %v5157_v33, %v2980_v41  ;;  %vm3325_vm3 = vmor %vm3323_vm1, %vm3324_vm15  ;;  %v2900_v60 = vsub.f32 %v6726_v51, %v6872_v59  ;;  %v4633_v18 = vclamps-f32 %v3252_v63, 1.0 }
 0xb59   : > { %v3320_v27 = vsub.f32 1.0, %v3319_v10  ;;  %vm3328_vm4 = vcmp.eq.f32.partialorder %v3327_v40, 8.507059e+37  ;;  %v3006_v50 = vmul.f32 %v6708_v61, %v2995_v9  ;;  %v3183_v59 = vmul.f32 0.5, %v6767_v24 }
 0xb5a   : > { %v3858_v29 = vadd.f32 1.0, %v4636_v20  ;;  %v2982_v56 = vmul.f32 0.5, %v2981_v14  ;;  %v3855_v23 = vadd.f32 1.0, %v4633_v18  ;;  %v3185_v30 = vmul.f32 0.5, %v6796_v13 }
 0xb5b   : > { %v3321_v17 = vmul.f32 %v5159_v52, %v3320_v27  ;;  %v3017_v8 = vadd.f32 %v6714_v37, %v3006_v50 }
 0xb5c   : > { %v3874_v62 = vmul.f32 %v3858_v29, %v3186_v22  ;;  %v2983_v16 = vsub.f32 1.5, %v2982_v56  ;;  %v3871_v28 = vmul.f32 %v3855_v23, %v3183_v59 }
 0xb5d   : > { %v3322_v35 = vadd.f32 %v5159_v52, %v3321_v17 }
 0xb5e   : > { %v3888_v26 = vpack.c.bf16 %v3874_v62, %v3872_v34  ;;  %v2984_v53 = vmul.f32 %v5157_v33, %v2983_v16 }
 0xb5f   : > { %v3326_v25 = vsel %vm3325_vm3, %v5159_v52, %v3322_v35 }
 0xb60   : > { %v2988_v32 = vsel %vm2987_vm2, %v5157_v33, %v2984_v53  ;;  %4064 = vmatmul.bf16.vlgmr.msra.gmra.mxu2 %v3888_v26  ;;  %v3331_v44 = vsel %vm3328_vm4, %v3330_v46, %v3326_v25 }
 0xb61   : > { %v2996_v55 = vmul.f32 %v2988_v32, %v2900_v60  ;;  %v3332_v48 = vmul.f32 %v3331_v44, %v3307_v39 }
 0xb63   : > { %v3007_v31 = vmul.f32 %v6708_v61, %v2996_v55  ;;  %v4635_v2 = vclamps-f32 %v3332_v48, 1.0 }
 0xb65   : > { %v3018_v21 = vadd.f32 %v6714_v37, %v3007_v31  ;;  %v3857_v49 = vadd.f32 1.0, %v4635_v2 }
 0xb67   : > { %v3022_v33 = vpack.c.bf16 %v3018_v21, %v3017_v8  ;;  %v3873_v7 = vmul.f32 %v3857_v49, %v3185_v30 }
 0xb69   : > { %3148 = vmatmul.bf16.gmra.mxu3 %v3022_v33  ;;  %3177 = vmatmul.bf16.gmra.mxu0 %v3022_v33  ;;  %v3887_v38 = vpack.c.bf16 %v3873_v7, %v3871_v28 }
 0xb6b   : > { %4035 = vmatmul.bf16.vlgmr.msra.gmra.mxu1 %v3887_v38 }
 0xb81   : > { %v3168_v15 = vpop.f32.mrf.mxu0 }
 0xb82   : > { %v6963_v61 = vadd.f32 %v3168_v15, %v6750_v12 }
 0xb84   : > { %v6966_v41 = vmul.f32 0.70710677, %v6963_v61 }
 0xb86   : > { %v3415_v37 = vmul.f32 %v6966_v41, %v6966_v41 }
 0xb87   : > { %v3139_v24 = vpop.f32.mrf.mxu3 }
 0xb88   : > { %v6970_v13 = vmin.f32 %v3415_v37, 16.0  ;;  %v6973_v52 = vadd.f32 %v3139_v24, %v6760_v19 }
 0xb89   : > { %v3170_v36 = vpop.f32.mrf.mxu0 }
 0xb8a   : > { %v3417_v22 = vmul.f32 2.1237322e-06, %v6970_v13  ;;  %v3428_v43 = vmul.f32 3.8918573e-05, %v6970_v13  ;;  %v6978_v20 = vadd.f32 %v3170_v36, %v6750_v12  ;;  %v6981_v10 = vmul.f32 0.70710677, %v6973_v52 }
 0xb8c   : > { %v3418_v0 = vadd.f32 0.00028619796, %v3417_v22  ;;  %v3429_v14 = vadd.f32 0.001143296, %v3428_v43  ;;  %v3375_v57 = vmul.f32 %v6981_v10, %v6981_v10  ;;  %v6986_v42 = vmul.f32 0.70710677, %v6978_v20 }
 0xb8e   : > { %v3419_v3 = vmul.f32 %v3418_v0, %v6970_v13  ;;  %v3430_v47 = vmul.f32 %v3429_v14, %v6970_v13  ;;  %v6990_v34 = vmin.f32 %v3375_v57, 16.0  ;;  %v3495_v29 = vmul.f32 %v6986_v42, %v6986_v42 }
 0xb8f   : > { %v3141_v27 = vpop.f32.mrf.mxu3 }
 0xb90   : > { %v3431_v56 = vadd.f32 0.014752088, %v3430_v47  ;;  %v6995_v63 = vadd.f32 %v3141_v27, %v6760_v19  ;;  %v3377_v40 = vmul.f32 2.1237322e-06, %v6990_v34  ;;  %v3388_v54 = vmul.f32 3.8918573e-05, %v6990_v34 }
 0xb91   : > { %v6999_v62 = vmin.f32 %v3495_v29, 16.0  ;;  %v3420_v17 = vadd.f32 0.0036580483, %v3419_v3 }
 0xb92   : > { %v3432_v16 = vmul.f32 %v3431_v56, %v6970_v13  ;;  %v7003_v9 = vmul.f32 0.70710677, %v6995_v63  ;;  %v3378_v26 = vadd.f32 0.00028619796, %v3377_v40  ;;  %v3389_v35 = vadd.f32 0.001143296, %v3388_v54 }
 0xb93   : > { %v3497_v53 = vmul.f32 2.1237322e-06, %v6999_v62  ;;  %v3508_v46 = vmul.f32 3.8918573e-05, %v6999_v62  ;;  %v3421_v44 = vmul.f32 %v3420_v17, %v6970_v13 }
 0xb94   : > { %v3433_v39 = vadd.f32 0.112945676, %v3432_v16  ;;  %v3455_v60 = vmul.f32 %v7003_v9, %v7003_v9  ;;  %v3379_v18 = vmul.f32 %v3378_v26, %v6990_v34  ;;  %v3390_v25 = vmul.f32 %v3389_v35, %v6990_v34 }
 0xb95   : > { %v3498_v32 = vadd.f32 0.00028619796, %v3497_v53  ;;  %v3509_v50 = vadd.f32 0.001143296, %v3508_v46  ;;  %v3422_v7 = vadd.f32 0.05243302, %v3421_v44 }
 0xb96   : > { %v3434_v55 = vmul.f32 %v3433_v39, %v6970_v13  ;;  %v7013_v48 = vmin.f32 %v3455_v60, 16.0  ;;  %v3380_v31 = vadd.f32 0.0036580483, %v3379_v18  ;;  %v3391_v23 = vadd.f32 0.014752088, %v3390_v25 }
 0xb97   : > { %v3499_v2 = vmul.f32 %v3498_v32, %v6999_v62  ;;  %v3510_v21 = vmul.f32 %v3509_v50, %v6999_v62  ;;  %v3423_v29 = vmul.f32 %v3422_v7, %v6970_v13 }
 0xb98   : > { %v3435_v8 = vadd.f32 0.4994258, %v3434_v55  ;;  %v3457_v59 = vmul.f32 2.1237322e-06, %v7013_v48  ;;  %v3381_v30 = vmul.f32 %v3380_v31, %v6990_v34  ;;  %v3392_v49 = vmul.f32 %v3391_v23, %v6990_v34 }
 0xb99   : > { %v3500_v33 = vadd.f32 0.0036580483, %v3499_v2  ;;  %v3468_v28 = vmul.f32 3.8918573e-05, %v7013_v48  ;;  %v3511_v15 = vadd.f32 0.014752088, %v3510_v21 }
 0xb9a   : > { %v3436_v38 = vmul.f32 %v3435_v8, %v6970_v13  ;;  %v3458_v37 = vadd.f32 0.00028619796, %v3457_v59  ;;  %v3382_v24 = vadd.f32 0.05243302, %v3381_v30  ;;  %v3393_v36 = vadd.f32 0.112945676, %v3392_v49 }
 0xb9b   : > { %v3469_v22 = vadd.f32 0.001143296, %v3468_v28  ;;  %v3501_v0 = vmul.f32 %v3500_v33, %v6999_v62  ;;  %v3512_v14 = vmul.f32 %v3511_v15, %v6999_v62  ;;  %v3424_v60 = vadd.f32 0.18741608, %v3423_v29 }
 0xb9c   : > { %v3437_v43 = vadd.f32 1.0, %v3436_v38  ;;  %v3459_v57 = vmul.f32 %v3458_v37, %v7013_v48  ;;  %v3394_v3 = vmul.f32 %v3393_v36, %v6990_v34  ;;  %v3383_v27 = vmul.f32 %v3382_v24, %v6990_v34 }
 0xb9d   : > { %v3470_v47 = vmul.f32 %v3469_v22, %v7013_v48  ;;  %v3502_v54 = vadd.f32 0.05243302, %v3501_v0  ;;  %v3513_v17 = vadd.f32 0.112945676, %v3512_v14  ;;  %v3425_v8 = vmul.f32 %v3424_v60, %v6970_v13 }
 0xb9e   : > { %5160 = vrcp.f32 %v3437_v43  ;;  %v3395_v56 = vadd.f32 0.4994258, %v3394_v3  ;;  %v3460_v16 = vadd.f32 0.0036580483, %v3459_v57  ;;  %v3384_v18 = vadd.f32 0.18741608, %v3383_v27 }
 0xb9f   : > { %v3173_v40 = vpop.f32.mrf.mxu0  ;;  %v3514_v53 = vmul.f32 %v3513_v17, %v6999_v62  ;;  %v3471_v46 = vadd.f32 0.014752088, %v3470_v47  ;;  %v3503_v44 = vmul.f32 %v3502_v54, %v6999_v62  ;;  %v3449_v49 = vand.u32 2147483648, %v3437_v43 }
 0xba0   : > { %v7030_v26 = vadd.f32 %v3173_v40, %v6750_v12  ;;  %v3396_v35 = vmul.f32 %v3395_v56, %v6990_v34  ;;  %v3461_v39 = vmul.f32 %v3460_v16, %v7013_v48  ;;  %v3385_v33 = vmul.f32 %v3384_v18, %v6990_v34 }
 0xba1   : > { %v3515_v55 = vadd.f32 0.4994258, %v3514_v53  ;;  %v3472_v50 = vmul.f32 %v3471_v46, %v7013_v48  ;;  %v3504_v28 = vadd.f32 0.18741608, %v3503_v44  ;;  %v3447_v36 = vand.u32 2147483647, %v3437_v43 }
 0xba2   : > { %v7035_v25 = vadd.f32 1.0, %v3396_v35  ;;  %v7040_v31 = vmul.f32 0.70710677, %v7030_v26  ;;  %v3462_v2 = vadd.f32 0.05243302, %v3461_v39  ;;  %v7052_v13 = vmul.f32 0.5, %v6978_v20 }
 0xba3   : > { %v3516_v59 = vmul.f32 %v3515_v55, %v6999_v62  ;;  %v3473_v30 = vadd.f32 0.112945676, %v3472_v50  ;;  %vm3443_vm6 = vweird.f32 %v3437_v43  ;;  %v3426_v57 = vadd.f32 1.1283791, %v3425_v8 }
 0xba4   : > { %v5161_v32 = vpop.eup %5160  ;;  %5162 = vrcp.f32 %v7035_v25  ;;  %v3575_v7 = vmul.f32 %v7040_v31, %v7040_v31  ;;  %v3463_v22 = vmul.f32 %v3462_v2, %v7013_v48  ;;  %v3386_v3 = vadd.f32 1.1283791, %v3385_v33 }
 0xba5   : > { %v3439_v23 = vmul.f32 %v5161_v32, %v3437_v43  ;;  %vm3444_vm5 = vweird.f32 %v5161_v32  ;;  %v7048_v15 = vadd.f32 1.0, %v3516_v59  ;;  %v3474_v37 = vmul.f32 %v3473_v30, %v7013_v48  ;;  %v3144_v24 = vpop.f32.mrf.mxu3 }
 0xba6   : > { %v7058_v14 = vmin.f32 %v3575_v7, 16.0  ;;  %vm3445_vm7 = vmor %vm3443_vm6, %vm3444_vm5  ;;  %v7063_v29 = vadd.f32 %v3144_v24, %v6760_v19  ;;  %v3450_v27 = vor.u32 1.1754944e-38, %v3449_v49  ;;  %v3505_v56 = vmul.f32 %v3504_v28, %v6999_v62 }
 0xba7   : > { %v3440_v21 = vsub.f32 1.0, %v3439_v23  ;;  %5164 = vrcp.f32 %v7048_v15  ;;  %v3475_v40 = vadd.f32 0.4994258, %v3474_v37  ;;  %vm3448_vm8 = vcmp.eq.f32.partialorder %v3447_v36, 8.507059e+37 }
 0xba8   : > { %v3407_v54 = vand.u32 2147483647, %v7035_v25  ;;  %v3464_v17 = vadd.f32 0.18741608, %v3463_v22  ;;  %v3409_v35 = vand.u32 2147483648, %v7035_v25  ;;  %v3427_v46 = vmul.f32 %v3426_v57, %v6966_v41 }
 0xba9   : > { %v3441_v38 = vmul.f32 %v5161_v32, %v3440_v21  ;;  %v3476_v53 = vmul.f32 %v3475_v40, %v7013_v48  ;;  %v3588_v39 = vmul.f32 3.8918573e-05, %v7058_v14  ;;  %v7072_v60 = vmul.f32 %v3386_v3, %v6981_v10 }
 0xbaa   : > { %v7055_v0 = vpop.eup %5162  ;;  %v3577_v62 = vmul.f32 2.1237322e-06, %v7058_v14  ;;  %v7076_v18 = vmul.f32 0.70710677, %v7063_v29  ;;  %v3506_v50 = vadd.f32 1.1283791, %v3505_v56  ;;  %vm3403_vm9 = vweird.f32 %v7035_v25 }
 0xbab   : > { %v3442_v34 = vadd.f32 %v5161_v32, %v3441_v38  ;;  %v3399_v47 = vmul.f32 %v7055_v0, %v7035_v25  ;;  %v7079_v23 = vadd.f32 1.0, %v3476_v53  ;;  %v3589_v2 = vadd.f32 0.001143296, %v3588_v39 }
 0xbac   : > { %v3465_v10 = vmul.f32 %v3464_v17, %v7013_v48  ;;  %vm7084_vm10 = vcmp.eq.f32.partialorder %v3407_v54, 8.507059e+37  ;;  %v3410_v59 = vor.u32 1.1754944e-38, %v3409_v35  ;;  %v3535_v30 = vmul.f32 %v7076_v18, %v7076_v18 }
 0xbad   : > { %v3446_v20 = vsel %vm3445_vm7, %v5161_v32, %v3442_v34  ;;  %v3400_v43 = vsub.f32 1.0, %v3399_v47  ;;  %v3175_v32 = vpop.f32.mrf.mxu0  ;;  %v5165_v44 = vpop.eup %5164  ;;  %5166 = vrcp.f32 %v7079_v23  ;;  %v3527_v28 = vand.u32 2147483647, %v7048_v15 }
 0xbae   : > { %v3451_v16 = vsel %vm3448_vm8, %v3450_v27, %v3446_v20  ;;  %v3519_v41 = vmul.f32 %v5165_v44, %v7048_v15  ;;  %v7092_v49 = vadd.f32 %v3175_v32, %v6750_v12  ;;  %v3529_v7 = vand.u32 2147483648, %v7048_v15 }
 0xbaf   : > { %v3401_v55 = vmul.f32 %v7055_v0, %v3400_v43  ;;  %v3452_v8 = vmul.f32 %v3451_v16, %v3427_v46  ;;  %v3578_v38 = vadd.f32 0.00028619796, %v3577_v62  ;;  %vm3404_vm11 = vweird.f32 %v7055_v0 }
 0xbb0   : > { %v3520_v33 = vsub.f32 1.0, %v3519_v41  ;;  %v3507_v37 = vmul.f32 %v3506_v50, %v6986_v42  ;;  %v3590_v24 = vmul.f32 %v3589_v2, %v7058_v14  ;;  %vm3524_vm12 = vweird.f32 %v5165_v44  ;;  %vm7108_vm14 = vmor %vm3403_vm9, %vm3404_vm11 }
 0xbb1   : > { %v3402_v48 = vadd.f32 %v7055_v0, %v3401_v55  ;;  %v4638_v36 = vclamps-f32 %v3452_v8, 1.0  ;;  %v3466_v34 = vadd.f32 1.1283791, %v3465_v10  ;;  %vm3523_vm13 = vweird.f32 %v7048_v15 }
 0xbb2   : > { %v3521_v22 = vmul.f32 %v5165_v44, %v3520_v33  ;;  %v3591_v57 = vadd.f32 0.014752088, %v3590_v24  ;;  %v7101_v3 = vmin.f32 %v3535_v30, 16.0  ;;  %v7104_v47 = vmul.f32 0.70710677, %v7092_v49  ;;  %vm3525_vm0 = vmor %vm3523_vm13, %vm3524_vm12  ;;  %v3146_v24 = vpop.f32.mrf.mxu3 }
 0xbb3   : > { %vm3528_vm15 = vcmp.eq.f32.partialorder %v3527_v28, 8.507059e+37  ;;  %v3530_v27 = vor.u32 1.1754944e-38, %v3529_v7  ;;  %v3579_v56 = vmul.f32 %v3578_v38, %v7058_v14  ;;  %v5167_v40 = vpop.eup %5166  ;;  %v3406_v15 = vsel %vm7108_vm14, %v7055_v0, %v3402_v48 }
 0xbb4   : > { %v3522_v42 = vadd.f32 %v5165_v44, %v3521_v22  ;;  %v3592_v43 = vmul.f32 %v3591_v57, %v7058_v14  ;;  %v3548_v54 = vmul.f32 3.8918573e-05, %v7101_v3  ;;  %v3655_v25 = vmul.f32 %v7104_v47, %v7104_v47 }
 0xbb5   : > { %v3860_v17 = vadd.f32 1.0, %v4638_v36  ;;  %v3467_v35 = vmul.f32 %v3466_v34, %v7003_v9  ;;  %v3479_v53 = vmul.f32 %v5167_v40, %v7079_v23  ;;  %v3487_v46 = vand.u32 2147483647, %v7079_v23 }
 0xbb6   : > { %v3526_v16 = vsel %vm3525_vm0, %v5165_v44, %v3522_v42  ;;  %v3489_v62 = vand.u32 2147483648, %v7079_v23  ;;  %v3593_v0 = vadd.f32 0.112945676, %v3592_v43  ;;  %v3411_v32 = vsel %vm7084_vm10, %v3410_v59, %v3406_v15 }
 0xbb7   : > { %v3531_v39 = vsel %vm3528_vm15, %v3530_v27, %v3526_v16  ;;  %v3480_v50 = vsub.f32 1.0, %v3479_v53  ;;  %v3549_v2 = vadd.f32 0.001143296, %v3548_v54  ;;  %vm3483_vm1 = vweird.f32 %v7079_v23 }
 0xbb8   : > { %v3532_v55 = vmul.f32 %v3531_v39, %v3507_v37  ;;  %v3580_v8 = vadd.f32 0.0036580483, %v3579_v56  ;;  %v3594_v44 = vmul.f32 %v3593_v0, %v7058_v14  ;;  %v7128_v9 = vmin.f32 %v3655_v25, 16.0 }
 0xbb9   : > { %v3481_v10 = vmul.f32 %v5167_v40, %v3480_v50  ;;  %vm3484_vm2 = vweird.f32 %v5167_v40  ;;  %v3550_v30 = vmul.f32 %v3549_v2, %v7101_v3  ;;  %v3412_v33 = vmul.f32 %v3411_v32, %v7072_v60 }
 0xbba   : > { %v4640_v41 = vclamps-f32 %v3532_v55, 1.0  ;;  %vm7132_vm3 = vcmp.eq.f32.partialorder %v3487_v46, 8.507059e+37  ;;  %v3595_v59 = vadd.f32 0.4994258, %v3594_v44  ;;  %v3657_v28 = vmul.f32 2.1237322e-06, %v7128_v9  ;;  %vm3485_vm4 = vmor %vm3483_vm1, %vm3484_vm2 }
 0xbbb   : > { %v3482_v7 = vadd.f32 %v5167_v40, %v3481_v10  ;;  %v3490_v38 = vor.u32 1.1754944e-38, %v3489_v62  ;;  %v3551_v48 = vadd.f32 0.014752088, %v3550_v30  ;;  %v3668_v37 = vmul.f32 3.8918573e-05, %v7128_v9 }
 0xbbc   : > { %v3862_v36 = vadd.f32 1.0, %v4640_v41  ;;  %v3596_v22 = vmul.f32 %v3595_v59, %v7058_v14  ;;  %v3537_v60 = vmul.f32 2.1237322e-06, %v7101_v3  ;;  %v3658_v34 = vadd.f32 0.00028619796, %v3657_v28 }
 0xbbd   : > { %v3486_v57 = vsel %vm3485_vm4, %v5167_v40, %v3482_v7  ;;  %v3581_v20 = vmul.f32 %v3580_v8, %v7058_v14  ;;  %v3552_v42 = vmul.f32 %v3551_v48, %v7101_v3  ;;  %v3669_v27 = vadd.f32 0.001143296, %v3668_v37 }
 0xbbe   : > { %v4637_v56 = vclamps-f32 %v3412_v33, 1.0  ;;  %v3491_v15 = vsel %vm7132_vm3, %v3490_v38, %v3486_v57  ;;  %v7146_v43 = vadd.f32 1.0, %v3596_v22  ;;  %v7149_v23 = vadd.f32 %v3146_v24, %v6760_v19 }
 0xbbf   : > { %v3492_v54 = vmul.f32 %v3491_v15, %v3467_v35  ;;  %v3553_v25 = vadd.f32 0.112945676, %v3552_v42  ;;  %v3659_v16 = vmul.f32 %v3658_v34, %v7128_v9  ;;  %v3670_v40 = vmul.f32 %v3669_v27, %v7128_v9 }
 0xbc0   : > { %v3188_v53 = vmul.f32 0.5, %v6963_v61  ;;  %v3878_v39 = vmul.f32 %v3862_v36, %v7052_v13  ;;  %5168 = vrcp.f32 %v7146_v43  ;;  %v3538_v46 = vadd.f32 0.00028619796, %v3537_v60 }
 0xbc1   : > { %v3189_v62 = vmul.f32 0.5, %v6995_v63  ;;  %v4639_v0 = vclamps-f32 %v3492_v54, 1.0  ;;  %v3554_v32 = vmul.f32 %v3553_v25, %v7101_v3  ;;  %v3660_v50 = vadd.f32 0.0036580483, %v3659_v16 }
 0xbc2   : > { %v3876_v55 = vmul.f32 %v3860_v17, %v3188_v53  ;;  %v3671_v35 = vadd.f32 0.014752088, %v3670_v40  ;;  %v7159_v2 = vmul.f32 0.70710677, %v7149_v23  ;;  %v3859_v8 = vadd.f32 1.0, %v4637_v56 }
 0xbc3   : > { %v3861_v44 = vadd.f32 1.0, %v4639_v0  ;;  %v3582_v41 = vadd.f32 0.05243302, %v3581_v20  ;;  %v3555_v61 = vadd.f32 0.4994258, %v3554_v32  ;;  %v3539_v13 = vmul.f32 %v3538_v46, %v7101_v3 }
 0xbc4   : > { %v3672_v10 = vmul.f32 %v3671_v35, %v7128_v9  ;;  %v3615_v63 = vmul.f32 %v7159_v2, %v7159_v2  ;;  %v3890_v30 = vpack.c.bf16 %v3878_v39, %v3876_v55  ;;  %v3187_v33 = vmul.f32 0.5, %v6973_v52 }
 0xbc5   : > { %v3556_v17 = vmul.f32 %v3555_v61, %v7101_v3  ;;  %v3877_v59 = vmul.f32 %v3861_v44, %v3189_v62  ;;  %v3661_v28 = vmul.f32 %v3660_v50, %v7128_v9  ;;  %v3583_v37 = vmul.f32 %v3582_v41, %v7058_v14 }
 0xbc6   : > { %v5169_v21 = vpop.eup %5168  ;;  %v3673_v7 = vadd.f32 0.112945676, %v3672_v10  ;;  %v7168_v38 = vmin.f32 %v3615_v63, 16.0  ;;  %4069 = vmatmul.bf16.gmra.mxu2 %v3890_v30  ;;  %v3875_v48 = vmul.f32 %v3859_v8, %v3187_v33  ;;  %v3540_v22 = vadd.f32 0.0036580483, %v3539_v13 }
 0xbc7   : > { %v3599_v24 = vmul.f32 %v5169_v21, %v7146_v43  ;;  %v7172_v36 = vadd.f32 1.0, %v3556_v17  ;;  %v3662_v20 = vadd.f32 0.05243302, %v3661_v28  ;;  %v3584_v54 = vadd.f32 0.18741608, %v3583_v37 }
 0xbc8   : > { %v3674_v52 = vmul.f32 %v3673_v7, %v7128_v9  ;;  %v3617_v60 = vmul.f32 2.1237322e-06, %v7168_v38  ;;  %v3628_v34 = vmul.f32 3.8918573e-05, %v7168_v38  ;;  %v3889_v42 = vpack.c.bf16 %v3877_v59, %v3875_v48 }
 0xbc9   : > { %v3600_v57 = vsub.f32 1.0, %v3599_v24  ;;  %5170 = vrcp.f32 %v7172_v36  ;;  %v3541_v25 = vmul.f32 %v3540_v22, %v7101_v3  ;;  %v3663_v46 = vmul.f32 %v3662_v20, %v7128_v9 }
 0xbca   : > { %v3675_v27 = vadd.f32 0.4994258, %v3674_v52  ;;  %v3618_v56 = vadd.f32 0.00028619796, %v3617_v60  ;;  %v3629_v15 = vadd.f32 0.001143296, %v3628_v34  ;;  %4040 = vmatmul.bf16.gmra.mxu1 %v3889_v42  ;;  %v3585_v55 = vmul.f32 %v3584_v54, %v7058_v14 }
 0xbcb   : > { %v3601_v16 = vmul.f32 %v5169_v21, %v3600_v57  ;;  %vm3604_vm5 = vweird.f32 %v5169_v21  ;;  %v3542_v8 = vadd.f32 0.05243302, %v3541_v25  ;;  %v3609_v44 = vand.u32 2147483648, %v7146_v43 }
 0xbcc   : > { %v3676_v40 = vmul.f32 %v3675_v27, %v7128_v9  ;;  %v3619_v53 = vmul.f32 %v3618_v56, %v7168_v38  ;;  %v3630_v39 = vmul.f32 %v3629_v15, %v7168_v38  ;;  %v3664_v41 = vadd.f32 0.18741608, %v3663_v46 }
 0xbcd   : > { %v3602_v35 = vadd.f32 %v5169_v21, %v3601_v16  ;;  %vm3603_vm6 = vweird.f32 %v7146_v43  ;;  %v3607_v13 = vand.u32 2147483647, %v7146_v43  ;;  %v3586_v30 = vadd.f32 1.1283791, %v3585_v55 }
 0xbce   : > { %v3677_v62 = vadd.f32 1.0, %v3676_v40  ;;  %v3631_v0 = vadd.f32 0.014752088, %v3630_v39  ;;  %v3620_v50 = vadd.f32 0.0036580483, %v3619_v53  ;;  %vm3605_vm7 = vmor %vm3603_vm6, %vm3604_vm5  ;;  %v3543_v17 = vmul.f32 %v3542_v8, %v7101_v3 }
 0xbcf   : > { %v7183_v32 = vpop.eup %5170  ;;  %v3606_v33 = vsel %vm3605_vm7, %v5169_v21, %v3602_v35  ;;  %v3610_v59 = vor.u32 1.1754944e-38, %v3609_v44  ;;  %v3665_v28 = vmul.f32 %v3664_v41, %v7128_v9  ;;  %vm3608_vm8 = vcmp.eq.f32.partialorder %v3607_v13, 8.507059e+37 }
 0xbd0   : > { %5172 = vrcp.f32 %v3677_v62  ;;  %v3632_v61 = vmul.f32 %v3631_v0, %v7168_v38  ;;  %v3559_v10 = vmul.f32 %v7183_v32, %v7172_v36  ;;  %v3621_v14 = vmul.f32 %v3620_v50, %v7168_v38 }
 0xbd1   : > { %v3611_v43 = vsel %vm3608_vm8, %v3610_v59, %v3606_v33  ;;  %v3587_v52 = vmul.f32 %v3586_v30, %v7040_v31  ;;  %v3544_v60 = vadd.f32 0.18741608, %v3543_v17  ;;  %v3666_v57 = vadd.f32 1.1283791, %v3665_v28 }
 0xbd2   : > { %v3633_v63 = vadd.f32 0.112945676, %v3632_v61  ;;  %v3560_v37 = vsub.f32 1.0, %v3559_v10  ;;  %v3622_v22 = vadd.f32 0.05243302, %v3621_v14  ;;  %v3689_v27 = vand.u32 2147483648, %v3677_v62 }
 0xbd3   : > { %v3612_v21 = vmul.f32 %v3611_v43, %v3587_v52  ;;  %v3687_v15 = vand.u32 2147483647, %v3677_v62  ;;  %v3545_v25 = vmul.f32 %v3544_v60, %v7101_v3  ;;  %vm3564_vm10 = vweird.f32 %v7183_v32 }
 0xbd4   : > { %v3634_v7 = vmul.f32 %v3633_v63, %v7168_v38  ;;  %v3561_v42 = vmul.f32 %v7183_v32, %v3560_v37  ;;  %v3623_v54 = vmul.f32 %v3622_v22, %v7168_v38  ;;  %v3569_v31 = vand.u32 2147483648, %v7172_v36 }
 0xbd5   : > { %vm3683_vm11 = vweird.f32 %v3677_v62  ;;  %v3667_v39 = vmul.f32 %v3666_v57, %v7104_v47  ;;  %v3690_v46 = vor.u32 1.1754944e-38, %v3689_v27  ;;  %v4642_v0 = vclamps-f32 %v3612_v21, 1.0 }
 0xbd6   : > { %v5173_v48 = vpop.eup %5172  ;;  %v3635_v34 = vadd.f32 0.4994258, %v3634_v7  ;;  %v3562_v53 = vadd.f32 %v7183_v32, %v3561_v42  ;;  %vm3688_vm13 = vcmp.eq.f32.partialorder %v3687_v15, 8.507059e+37  ;;  %v3624_v3 = vadd.f32 0.18741608, %v3623_v54 }
 0xbd7   : > { %v3679_v24 = vmul.f32 %v5173_v48, %v3677_v62  ;;  %vm3684_vm9 = vweird.f32 %v5173_v48  ;;  %vm3563_vm14 = vweird.f32 %v7172_v36  ;;  %v3567_v50 = vand.u32 2147483647, %v7172_v36 }
 0xbd8   : > { %v3636_v9 = vmul.f32 %v3635_v34, %v7168_v38  ;;  %vm3685_vm12 = vmor %vm3683_vm11, %vm3684_vm9  ;;  %v3546_v8 = vadd.f32 1.1283791, %v3545_v25  ;;  %v3864_v44 = vadd.f32 1.0, %v4642_v0  ;;  %v3570_v41 = vor.u32 1.1754944e-38, %v3569_v31 }
 0xbd9   : > { %v3680_v20 = vsub.f32 1.0, %v3679_v24  ;;  %vm3565_vm15 = vmor %vm3563_vm14, %vm3564_vm10  ;;  %v3625_v13 = vmul.f32 %v3624_v3, %v7168_v38  ;;  %v3192_v14 = vmul.f32 0.5, %v7030_v26  ;;  %vm3568_vm0 = vcmp.eq.f32.partialorder %v3567_v50, 8.507059e+37 }
 0xbda   : > { %v7201_v16 = vadd.f32 1.0, %v3636_v9  ;;  %v3566_v47 = vsel %vm3565_vm15, %v7183_v32, %v3562_v53  ;;  %v3194_v36 = vmul.f32 0.5, %v7092_v49  ;;  %v7222_v32 = vld [vmem:[%s829_s16] ss:$0 sm:$0xff]  ;;  %v3547_v59 = vmul.f32 %v3546_v8, %v7076_v18 }
 0xbdb   : > { %v3681_v56 = vmul.f32 %v5173_v48, %v3680_v20  ;;  %v3571_v63 = vsel %vm3568_vm0, %v3570_v41, %v3566_v47  ;;  %v3880_v26 = vmul.f32 %v3864_v44, %v3192_v14  ;;  %v3626_v7 = vadd.f32 1.1283791, %v3625_v13 }
 0xbdc   : > { %5174 = vrcp.f32 %v7201_v16  ;;  %v3572_v49 = vmul.f32 %v3571_v63, %v3547_v59  ;;  %v3647_v37 = vand.u32 2147483647, %v7201_v16  ;;  %v3649_v43 = vand.u32 2147483648, %v7201_v16 }
 0xbdd   : > { %v3682_v40 = vadd.f32 %v5173_v48, %v3681_v56  ;;  %vm3643_vm2 = vweird.f32 %v7201_v16  ;;  %v3627_v54 = vmul.f32 %v3626_v7, %v7159_v2  ;;  %v3191_v47 = vmul.f32 0.5, %v7063_v29 }
 0xbde   : > { %v4641_v27 = vclamps-f32 %v3572_v49, 1.0  ;;  %v3650_v9 = vor.u32 1.1754944e-38, %v3649_v43  ;;  %vm3648_vm4 = vcmp.eq.f32.partialorder %v3647_v37, 8.507059e+37  ;;  %v3193_v41 = vmul.f32 0.5, %v7149_v23 }
 0xbdf   : > { %v3686_v55 = vsel %vm3685_vm12, %v5173_v48, %v3682_v40 }
 0xbe0   : > { %v3691_v35 = vsel %vm3688_vm13, %v3690_v46, %v3686_v55  ;;  %v3863_v2 = vadd.f32 1.0, %v4641_v27 }
 0xbe1   : > { %v3692_v62 = vmul.f32 %v3691_v35, %v3667_v39 }
 0xbe2   : > { %v5175_v10 = vpop.eup %5174  ;;  %v3879_v63 = vmul.f32 %v3863_v2, %v3191_v47 }
 0xbe3   : > { %v4644_v61 = vclamps-f32 %v3692_v62, 1.0  ;;  %v3639_v33 = vmul.f32 %v5175_v10, %v7201_v16  ;;  %vm3644_vm1 = vweird.f32 %v5175_v10  ;;  %v4065_v57 = vpop.f32.mrf.mxu2 }
 0xbe4   : > { %vm3645_vm3 = vmor %vm3643_vm2, %vm3644_vm1 }
 0xbe5   : > { %v3866_v30 = vadd.f32 1.0, %v4644_v61  ;;  %v3640_v48 = vsub.f32 1.0, %v3639_v33 }
 0xbe6   : > { %v3178_v17 = vpop.f32.mrf.mxu0 }
 0xbe7   : > { %v7226_v38 = vadd.f32 %v3178_v17, %v6750_v12  ;;  %v3882_v28 = vmul.f32 %v3866_v30, %v3194_v36  ;;  %v3641_v52 = vmul.f32 %v5175_v10, %v3640_v48 }
 0xbe8   : > { %v4036_v22 = vpop.f32.mrf.mxu1 }
 0xbe9   : > { %v7231_v24 = vmul.f32 0.70710677, %v7226_v38  ;;  %v3892_v60 = vpack.c.bf16 %v3882_v28, %v3880_v26  ;;  %v4037_v18 = vadd.f32 %v7222_v32, %v4036_v22  ;;  %v3642_v20 = vadd.f32 %v5175_v10, %v3641_v52 }
 0xbeb   : > { %v3735_v34 = vmul.f32 %v7231_v24, %v7231_v24  ;;  %4074 = vmatmul.bf16.gmra.mxu2 %v3892_v60  ;;  %v4066_v42 = vadd.f32 %v4065_v57, %v4037_v18  ;;  %v3646_v25 = vsel %vm3645_vm3, %v5175_v10, %v3642_v20  ;;  %v4067_v29 = vpop.f32.mrf.mxu2 }
 0xbec   : > { %v3149_v21 = vpop.f32.mrf.mxu3  ;;  %v3651_v16 = vsel %vm3648_vm4, %v3650_v9, %v3646_v25 }
 0xbed   : > { %v7237_v56 = vmin.f32 %v3735_v34, 16.0  ;;  %v7240_v15 = vadd.f32 %v3149_v21, %v6760_v19  ;;  %v7244_v40 = vadd.f32 %v4066_v42, %v6621_v45  ;;  %v3652_v46 = vmul.f32 %v3651_v16, %v3627_v54 }
 0xbee   : > { %v3180_v31 = vpop.f32.mrf.mxu0 }
 0xbef   : > { %v3737_v53 = vmul.f32 2.1237322e-06, %v7237_v56  ;;  %v3748_v39 = vmul.f32 3.8918573e-05, %v7237_v56  ;;  %v7249_v0 = vmul.f32 0.70710677, %v7240_v15  ;;  %v7252_v55 = vadd.f32 %v3180_v31, %v6750_v12 }
 0xbf0   : > { %4093 = vst [vmem:[#allocation2 + $0x30] sm:$0xff] %v7244_v40  ;;  %v4038_v35 = vpop.f32.mrf.mxu1  ;;  %v4643_v45 = vclamps-f32 %v3652_v46, 1.0 }
 0xbf1   : > { %v3738_v3 = vadd.f32 0.00028619796, %v3737_v53  ;;  %v3749_v50 = vadd.f32 0.001143296, %v3748_v39  ;;  %v3695_v62 = vmul.f32 %v7249_v0, %v7249_v0  ;;  %v7258_v8 = vmul.f32 0.70710677, %v7252_v55 }
 0xbf2   : > { %v4039_v12 = vadd.f32 %v7222_v32, %v4038_v35  ;;  %v3865_v61 = vadd.f32 1.0, %v4643_v45 }
 0xbf3   : > { %v3750_v44 = vmul.f32 %v3749_v50, %v7237_v56  ;;  %v7264_v13 = vmin.f32 %v3695_v62, 16.0  ;;  %v3815_v10 = vmul.f32 %v7258_v8, %v7258_v8  ;;  %v3739_v36 = vmul.f32 %v3738_v3, %v7237_v56 }
 0xbf4   : > { %v3151_v14 = vpop.f32.mrf.mxu3  ;;  %v3881_v17 = vmul.f32 %v3865_v61, %v3193_v41  ;;  %v4068_v23 = vadd.f32 %v4067_v29, %v4039_v12 }
 0xbf5   : > { %v3751_v30 = vadd.f32 0.014752088, %v3750_v44  ;;  %v7270_v33 = vadd.f32 %v3151_v14, %v6760_v19  ;;  %v3708_v59 = vmul.f32 3.8918573e-05, %v7264_v13  ;;  %v7273_v26 = vmin.f32 %v3815_v10, 16.0 }
 0xbf6   : > { %v3697_v48 = vmul.f32 2.1237322e-06, %v7264_v13  ;;  %v3891_v43 = vpack.c.bf16 %v3881_v17, %v3879_v63  ;;  %v3740_v60 = vadd.f32 0.0036580483, %v3739_v36  ;;  %v7286_v34 = vadd.f32 %v4068_v23, %v6627_v5 }
 0xbf7   : > { %v3752_v28 = vmul.f32 %v3751_v30, %v7237_v56  ;;  %v7277_v7 = vmul.f32 0.70710677, %v7270_v33  ;;  %v3709_v49 = vadd.f32 0.001143296, %v3708_v59  ;;  %v3817_v37 = vmul.f32 2.1237322e-06, %v7273_v26 }
 0xbf8   : > { %v3828_v22 = vmul.f32 3.8918573e-05, %v7273_v26  ;;  %4045 = vmatmul.bf16.gmra.mxu1 %v3891_v43  ;;  %v3698_v27 = vadd.f32 0.00028619796, %v3697_v48  ;;  %4094 = vst [vmem:[#allocation2] sm:$0xff] %v7286_v34  ;;  %v3741_v53 = vmul.f32 %v3740_v60, %v7237_v56 }
 0xbf9   : > { %v3753_v19 = vadd.f32 0.112945676, %v3752_v28  ;;  %v3775_v52 = vmul.f32 %v7277_v7, %v7277_v7  ;;  %v3710_v18 = vmul.f32 %v3709_v49, %v7264_v13  ;;  %v3818_v20 = vadd.f32 0.00028619796, %v3817_v37 }
 0xbfa   : > { %v3829_v21 = vadd.f32 0.001143296, %v3828_v22  ;;  %v3699_v3 = vmul.f32 %v3698_v27, %v7264_v13  ;;  %v3742_v12 = vadd.f32 0.05243302, %v3741_v53 }
 0xbfb   : > { %v3754_v57 = vmul.f32 %v3753_v19, %v7237_v56  ;;  %v7289_v42 = vmin.f32 %v3775_v52, 16.0  ;;  %v3711_v9 = vadd.f32 0.014752088, %v3710_v18  ;;  %v3819_v46 = vmul.f32 %v3818_v20, %v7273_v26 }
 0xbfc   : > { %v3830_v25 = vmul.f32 %v3829_v21, %v7273_v26  ;;  %v3700_v10 = vadd.f32 0.0036580483, %v3699_v3  ;;  %v3743_v29 = vmul.f32 %v3742_v12, %v7237_v56 }
 0xbfd   : > { %v3755_v54 = vadd.f32 0.4994258, %v3754_v57  ;;  %v3712_v31 = vmul.f32 %v3711_v9, %v7264_v13  ;;  %v3777_v16 = vmul.f32 2.1237322e-06, %v7289_v42  ;;  %v3788_v5 = vmul.f32 3.8918573e-05, %v7289_v42 }
 0xbfe   : > { %v3831_v2 = vadd.f32 0.014752088, %v3830_v25  ;;  %v3820_v41 = vadd.f32 0.0036580483, %v3819_v46  ;;  %v3701_v28 = vmul.f32 %v3700_v10, %v7264_v13  ;;  %v3744_v52 = vadd.f32 0.18741608, %v3743_v29 }
 0xbff   : > { %v3756_v39 = vmul.f32 %v3755_v54, %v7237_v56  ;;  %v3713_v50 = vadd.f32 0.112945676, %v3712_v31  ;;  %v3789_v35 = vadd.f32 0.001143296, %v3788_v5  ;;  %v3778_v44 = vadd.f32 0.00028619796, %v3777_v16 }
 0xc00   : > { %v3832_v62 = vmul.f32 %v3831_v2, %v7273_v26  ;;  %v3821_v17 = vmul.f32 %v3820_v41, %v7273_v26  ;;  %v3702_v57 = vadd.f32 0.05243302, %v3701_v28  ;;  %v3745_v31 = vmul.f32 %v3744_v52, %v7237_v56 }
 0xc01   : > { %v3757_v45 = vadd.f32 1.0, %v3756_v39  ;;  %v3714_v47 = vmul.f32 %v3713_v50, %v7264_v13  ;;  %v3790_v61 = vmul.f32 %v3789_v35, %v7289_v42  ;;  %v3779_v30 = vmul.f32 %v3778_v44, %v7289_v42 }
 0xc02   : > { %v3833_v63 = vadd.f32 0.112945676, %v3832_v62  ;;  %v3822_v60 = vadd.f32 0.05243302, %v3821_v17  ;;  %v3703_v39 = vmul.f32 %v3702_v57, %v7264_v13  ;;  %v3746_v56 = vadd.f32 1.1283791, %v3745_v31 }
 0xc03   : > { %5176 = vrcp.f32 %v3757_v45  ;;  %v3715_v14 = vadd.f32 0.4994258, %v3714_v47  ;;  %v3791_v23 = vadd.f32 0.014752088, %v3790_v61  ;;  %v3780_v22 = vadd.f32 0.0036580483, %v3779_v30 }
 0xc04   : > { %v3834_v59 = vmul.f32 %v3833_v63, %v7273_v26  ;;  %v3823_v16 = vmul.f32 %v3822_v60, %v7273_v26  ;;  %v3769_v46 = vand.u32 2147483648, %v3757_v45  ;;  %vm3763_vm6 = vweird.f32 %v3757_v45 }
 0xc05   : > { %v3716_v36 = vmul.f32 %v3715_v14, %v7264_v13  ;;  %v3792_v43 = vmul.f32 %v3791_v23, %v7289_v42  ;;  %v3781_v54 = vmul.f32 %v3780_v22, %v7289_v42  ;;  %v3767_v3 = vand.u32 2147483647, %v3757_v45 }
 0xc06   : > { %v3835_v37 = vadd.f32 0.4994258, %v3834_v59  ;;  %v3824_v47 = vadd.f32 0.18741608, %v3823_v16  ;;  %v3704_v12 = vadd.f32 0.18741608, %v3703_v39  ;;  %v3747_v17 = vmul.f32 %v3746_v56, %v7231_v24 }
 0xc07   : > { %v7309_v48 = vadd.f32 1.0, %v3716_v36  ;;  %v3793_v21 = vadd.f32 0.112945676, %v3792_v43  ;;  %v3782_v50 = vadd.f32 0.05243302, %v3781_v54  ;;  %v3770_v61 = vor.u32 1.1754944e-38, %v3769_v46 }
 0xc08   : > { %v3836_v20 = vmul.f32 %v3835_v37, %v7273_v26  ;;  %vm3768_vm8 = vcmp.eq.f32.partialorder %v3767_v3, 8.507059e+37  ;;  %v3705_v59 = vmul.f32 %v3704_v12, %v7264_v13 }
 0xc09   : > { %v5177_v49 = vpop.eup %5176  ;;  %5178 = vrcp.f32 %v7309_v48  ;;  %v3794_v25 = vmul.f32 %v3793_v21, %v7289_v42  ;;  %v3783_v63 = vmul.f32 %v3782_v50, %v7289_v42  ;;  %vm3723_vm9 = vweird.f32 %v7309_v48 }
 0xc0a   : > { %v3759_v19 = vmul.f32 %v5177_v49, %v3757_v45  ;;  %v7314_v9 = vadd.f32 1.0, %v3836_v20  ;;  %vm3764_vm5 = vweird.f32 %v5177_v49  ;;  %v3825_v45 = vmul.f32 %v3824_v47, %v7273_v26 }
 0xc0b   : > { %v3795_v35 = vadd.f32 0.4994258, %v3794_v25  ;;  %vm3765_vm7 = vmor %vm3763_vm6, %vm3764_vm5  ;;  %v3727_v28 = vand.u32 2147483647, %v7309_v48  ;;  %v3729_v43 = vand.u32 2147483648, %v7309_v48 }
 0xc0c   : > { %v3760_v18 = vsub.f32 1.0, %v3759_v19  ;;  %5180 = vrcp.f32 %v7314_v9  ;;  %v3849_v19 = vand.u32 2147483648, %v7314_v9  ;;  %v3784_v26 = vadd.f32 0.18741608, %v3783_v63 }
 0xc0d   : > { %v3796_v41 = vmul.f32 %v3795_v35, %v7289_v42  ;;  %v3826_v22 = vadd.f32 1.1283791, %v3825_v45  ;;  %v3847_v24 = vand.u32 2147483647, %v7314_v9  ;;  %v3706_v13 = vadd.f32 1.1283791, %v3705_v59 }
 0xc0e   : > { %v3761_v27 = vmul.f32 %v5177_v49, %v3760_v18  ;;  %vm3728_vm13 = vcmp.eq.f32.partialorder %v3727_v28, 8.507059e+37  ;;  %vm3843_vm14 = vweird.f32 %v7314_v9  ;;  %v3850_v54 = vor.u32 1.1754944e-38, %v3849_v19 }
 0xc0f   : > { %v5179_v5 = vpop.eup %5178  ;;  %v3797_v36 = vadd.f32 1.0, %v3796_v41  ;;  %v3785_v25 = vmul.f32 %v3784_v26, %v7289_v42  ;;  %vm3848_vm0 = vcmp.eq.f32.partialorder %v3847_v24, 8.507059e+37  ;;  %v3196_v42 = vmul.f32 0.5, %v7226_v38 }
 0xc10   : > { %v3762_v53 = vadd.f32 %v5177_v49, %v3761_v27  ;;  %v3719_v2 = vmul.f32 %v5179_v5, %v7309_v48  ;;  %vm3724_vm10 = vweird.f32 %v5179_v5  ;;  %v3730_v27 = vor.u32 1.1754944e-38, %v3729_v43 }
 0xc11   : > { %5182 = vrcp.f32 %v3797_v36  ;;  %vm7336_vm12 = vmor %vm3723_vm9, %vm3724_vm10  ;;  %v3827_v48 = vmul.f32 %v3826_v22, %v7258_v8  ;;  %v3807_v50 = vand.u32 2147483647, %v3797_v36  ;;  %v3809_v35 = vand.u32 2147483648, %v3797_v36 }
 0xc12   : > { %v3720_v62 = vsub.f32 1.0, %v3719_v2  ;;  %v3766_v44 = vsel %vm3765_vm7, %v5177_v49, %v3762_v53  ;;  %v5181_v14 = vpop.eup %5180  ;;  %v3198_v8 = vmul.f32 0.5, %v7252_v55  ;;  %vm3803_vm2 = vweird.f32 %v3797_v36 }
 0xc13   : > { %v3771_v30 = vsel %vm3768_vm8, %v3770_v61, %v3766_v44  ;;  %v3839_v29 = vmul.f32 %v5181_v14, %v7314_v9  ;;  %vm3844_vm11 = vweird.f32 %v5181_v14  ;;  %v3786_v9 = vadd.f32 1.1283791, %v3785_v25 }
 0xc14   : > { %v3721_v10 = vmul.f32 %v5179_v5, %v3720_v62  ;;  %v3772_v37 = vmul.f32 %v3771_v30, %v3747_v17  ;;  %vm3845_vm15 = vmor %vm3843_vm14, %vm3844_vm11  ;;  %v3810_v61 = vor.u32 1.1754944e-38, %v3809_v35  ;;  %vm3808_vm4 = vcmp.eq.f32.partialorder %v3807_v50, 8.507059e+37 }
 0xc15   : > { %v3840_v49 = vsub.f32 1.0, %v3839_v29  ;;  %v3195_v38 = vmul.f32 0.5, %v7240_v15  ;;  %v3197_v55 = vmul.f32 0.5, %v7270_v33 }
 0xc16   : > { %v3722_v23 = vadd.f32 %v5179_v5, %v3721_v10  ;;  %v4646_v21 = vclamps-f32 %v3772_v37, 1.0 }
 0xc17   : > { %v3841_v52 = vmul.f32 %v5181_v14, %v3840_v49  ;;  %v5183_v20 = vpop.eup %5182 }
 0xc18   : > { %v3726_v18 = vsel %vm7336_vm12, %v5179_v5, %v3722_v23  ;;  %v3799_v16 = vmul.f32 %v5183_v20, %v3797_v36  ;;  %v3707_v5 = vmul.f32 %v3706_v13, %v7249_v0  ;;  %v3868_v3 = vadd.f32 1.0, %v4646_v21 }
 0xc19   : > { %v3842_v57 = vadd.f32 %v5181_v14, %v3841_v52  ;;  %v3731_v53 = vsel %vm3728_vm13, %v3730_v27, %v3726_v18  ;;  %vm3804_vm1 = vweird.f32 %v5183_v20  ;;  %v3787_v0 = vmul.f32 %v3786_v9, %v7277_v7 }
 0xc1a   : > { %v3800_v2 = vsub.f32 1.0, %v3799_v16  ;;  %v3732_v62 = vmul.f32 %v3731_v53, %v3707_v5  ;;  %v3884_v41 = vmul.f32 %v3868_v3, %v3196_v42  ;;  %vm3805_vm3 = vmor %vm3803_vm2, %vm3804_vm1 }
 0xc1b   : > { %v3846_v31 = vsel %vm3845_vm15, %v5181_v14, %v3842_v57 }
 0xc1c   : > { %v3851_v39 = vsel %vm3848_vm0, %v3850_v54, %v3846_v31  ;;  %v3801_v56 = vmul.f32 %v5183_v20, %v3800_v2  ;;  %v4645_v10 = vclamps-f32 %v3732_v62, 1.0 }
 0xc1d   : > { %v3852_v46 = vmul.f32 %v3851_v39, %v3827_v48 }
 0xc1e   : > { %v3802_v12 = vadd.f32 %v5183_v20, %v3801_v56  ;;  %v3867_v17 = vadd.f32 1.0, %v4645_v10 }
 0xc1f   : > { %v4648_v47 = vclamps-f32 %v3852_v46, 1.0 }
 0xc20   : > { %v3806_v63 = vsel %vm3805_vm3, %v5183_v20, %v3802_v12  ;;  %v3883_v23 = vmul.f32 %v3867_v17, %v3195_v38 }
 0xc21   : > { %v3870_v44 = vadd.f32 1.0, %v4648_v47  ;;  %v3811_v30 = vsel %vm3808_vm4, %v3810_v61, %v3806_v63 }
 0xc22   : > { %v3812_v45 = vmul.f32 %v3811_v30, %v3787_v0 }
 0xc23   : > { %v3886_v14 = vmul.f32 %v3870_v44, %v3198_v8 }
 0xc24   : > { %v4647_v59 = vclamps-f32 %v3812_v45, 1.0 }
 0xc25   : > { %v3894_v29 = vpack.c.bf16 %v3886_v14, %v3884_v41 }
 0xc26   : > { %v3869_v36 = vadd.f32 1.0, %v4647_v59 }
 0xc27   : > { %4079 = vmatmul.bf16.gmra.mxu2 %v3894_v29 }
 0xc28   : > { %v3885_v28 = vmul.f32 %v3869_v36, %v3197_v55 }
 0xc2a   : > { %v3893_v7 = vpack.c.bf16 %v3885_v28, %v3883_v23 }
 0xc2c   : > { %4050 = vmatmul.bf16.gmra.mxu1 %v3893_v7 }
 0xc47   : > { %v4041_v49 = vpop.f32.mrf.mxu1 }
 0xc48   : > { %v4042_v43 = vadd.f32 %v7222_v32, %v4041_v49 }
 0xc49   : > { %v4070_v37 = vpop.f32.mrf.mxu2 }
 0xc4a   : > { %v4071_v19 = vadd.f32 %v4070_v37, %v4042_v43 }
 0xc4c   : > { %v4087_v26 = vadd.f32 %v4071_v19, %v6645_v4 }
 0xc4e   : > { %4095 = vst [vmem:[#allocation2 + $0x18] sm:$0xff] %v4087_v26 }
 0xc4f   : > { %v4043_v22 = vpop.f32.mrf.mxu1 }
 0xc50   : > { %v4044_v52 = vadd.f32 %v7222_v32, %v4043_v22 }
 0xc51   : > { %v4072_v24 = vpop.f32.mrf.mxu2 }
 0xc52   : > { %v4073_v15 = vadd.f32 %v4072_v24, %v4044_v52 }
 0xc54   : > { %v4088_v33 = vadd.f32 %v4073_v15, %v6659_v11 }
 0xc56   : > { %4096 = vst [vmem:[#allocation2 + $0x10] sm:$0xff] %v4088_v33 }
 0xc6e   : > { %v4075_v60 = vpop.f32.mrf.mxu2 }
 0xc75   : > { %v4046_v13 = vpop.f32.mrf.mxu1 }
 0xc76   : > { %v4047_v18 = vadd.f32 %v7222_v32, %v4046_v13  ;;  %v4077_v27 = vpop.f32.mrf.mxu2 }
 0xc78   : > { %v4076_v57 = vadd.f32 %v4075_v60, %v4047_v18 }
 0xc7a   : > { %v4089_v20 = vadd.f32 %v4076_v57, %v6692_v58 }
 0xc7c   : > { %4097 = vst [vmem:[#allocation2 + $0x8] sm:$0xff] %v4089_v20 }
 0xc7d   : > { %v4048_v21 = vpop.f32.mrf.mxu1 }
 0xc7e   : > { %v4049_v4 = vadd.f32 %v7222_v32, %v4048_v21 }
 0xc80   : > { %v4078_v54 = vadd.f32 %v4077_v27, %v4049_v4 }
 0xc82   : > { %v4090_v25 = vadd.f32 %v4078_v54, %v6699_v1 }
 0xc84   : > { %4098 = vst [vmem:[#allocation2 + $0x20] sm:$0xff] %v4090_v25 }
 0xca9   : > { %v4051_v48 = vpop.f32.mrf.mxu1 }
 0xcaa   : > { %v4080_v31 = vpop.f32.mrf.mxu2  ;;  %v4052_v11 = vadd.f32 %v7222_v32, %v4051_v48 }
 0xcac   : > { %v4081_v16 = vadd.f32 %v4080_v31, %v4052_v11 }
 0xcae   : > { %v4091_v53 = vadd.f32 %v4081_v16, %v6720_v6 }
 0xcb0   : > { %4099 = vst [vmem:[#allocation2 + $0x28] sm:$0xff] %v4091_v53 }
 0xcb1   : > { %v4053_v39 = vpop.f32.mrf.mxu1 }
 0xcb2   : > { %v4054_v58 = vadd.f32 %v7222_v32, %v4053_v39  ;;  %v4082_v5 = vpop.f32.mrf.mxu2 }
 0xcb4   : > { %v4083_v46 = vadd.f32 %v4082_v5, %v4054_v58  ;;  %4104 = sbr.rel (%p4713_p3) target bundleno = 3265 (0xcc1), region = 120 }
 0xcb6   : > { %v4092_v2 = vadd.f32 %v4083_v46, %v6726_v51 }
 0xcb8   : > { %4100 = vst [vmem:[#allocation2 + $0x38] sm:$0xff] %v4092_v2 }
 0xcb9   : > { %4105 = vst [vmem:[#allocation20] sm:$0xff] %v7244_v40 }
 0xcba   : > { %4106 = vst [vmem:[#allocation20 + $0x8] sm:$0xff] %v7286_v34 }
 0xcbb   : > { %4107 = vst [vmem:[#allocation20 + $0x10] sm:$0xff] %v4087_v26 }
 0xcbc   : > { %4108 = vst [vmem:[#allocation20 + $0x18] sm:$0xff] %v4088_v33 }
 0xcbd   : > { %4109 = vst [vmem:[#allocation20 + $0x20] sm:$0xff] %v4089_v20 }
 0xcbe   : > { %4110 = vst [vmem:[#allocation20 + $0x28] sm:$0xff] %v4090_v25 }
 0xcbf   : > { %4111 = vst [vmem:[#allocation20 + $0x30] sm:$0xff] %v4091_v53 }
 0xcc0   : > { %4112 = vst [vmem:[#allocation20 + $0x38] sm:$0xff] %v4092_v2 }
 0xcc1 PF: > { %p4860_p4 = scmp.eq.s32.totalorder %s5783_s22, 1  ;;  %s7467_s24 = sld [smem:[#allocation39_spill]] }
 0xcc2   : > { %s5607_s6 = smov [#allocation20]   ;;  %s5608_s25 = smov 128  }
 0xcc3   : > { %s4121_s28 = sshll.u32 %s5607_s6, 4  ;;  %s5609_s3 = smov 8   ;;  %s4122_s28 = int_to_ptr.vmem [resolvable:$true] %s4121_s28 }
 0xcc7   : > { %s4123_s15 = sshll.u32 %s7467_s24, 4  ;;  %s4124_s15 = int_to_ptr.hbm [resolvable:$true] %s4123_s15 }
 0xcc8   : > { %4822 = dma.vmem_to_hbm [thread:$0]  (%p4860_p4), %s4122_s28, 1024, %s4124_s15, [#allocation5], %s5608_s25, %s5608_s25, %s5609_s3  }
 0xcc9   : > { %5569 = dma.done.wait (%p4860_p4), [#allocation5], 1024  }
 0xcca   : > { %5571 = vsyncadd (%p4860_p4), [#allocation5], 4294966272 }
 0xccb PF: > { %s40_s30 = sadd.s32 1, %s5594_s30   ;;  %s7468_s13 = sld [smem:[#allocation28_spill]] }
 0xccc   : > { %p37_p5 = scmp.ge.s32.totalorder %s40_s30, 4   ;;  %s7469_s27 = sld [smem:[#allocation30_spill]] }
 0xccd   : > { %s7470_s22 = sld [smem:[#allocation29_spill]]  ;;  %s7471_s25 = smov %s5578_s26 }
 0xcce   : > { %s7473_s28 = smov %s5590_s29 }
 0xccf   :  { %39 = sbr.rel (!%p37_p5) target bundleno = 24 (0x18), region = 229 }
 0xcd1   : > { %s7472_s26 = smov %s7468_s13 }
 0xcd3   : > { %s7474_s29 = smov %s7470_s22 }
 0xcd4   :  { %4140 = vsyncpa [#allocation4], 1 }
 0xcd5   :  { %4142 = vsyncpa [#allocation4 + $0x1], 1 }
 0xcd6   :  { %4143 = vsyncpa [#allocation7], 1 }
 0xcd7   :  { %4145 = vsyncpa [#allocation7 + $0x1], 1 }
 0xcd8   :  { %4146 = vsyncpa [#allocation10], 1 }
 0xcd9   :  { %4148 = vsyncpa [#allocation10 + $0x1], 1 }
 0xcda   :  { %4149 = vsyncpa [#allocation13], 1 }
 0xcdb   :  { %4151 = vsyncpa [#allocation13 + $0x1], 1 }
 0xcdc   :  { %4152 = vsyncpa [#allocation16], 1 }
 0xcdd   :  { %4154 = vsyncpa [#allocation16 + $0x1], 1 }
 0xcde   :  { %4155 = vsyncpa [#allocation19], 1 }
 0xcdf   :  { %4157 = vsyncpa [#allocation19 + $0x1], 1 }
 0xce0   :  { %4158 = vsyncpa [#allocation5], 1 }
 0xce1   :  { %4160 = vsyncpa [#allocation5 + $0x1], 1 }

</bundles_post_ra>
